<compile_context>
chip_gen: v7x
topology: tpu7x:2x2x1
jax: 0.10.0
libtpu: 0.0.40
codegen_flags: <defaults>
</compile_context>

<pallas_src>
import numpy as np

import jax
import jax.numpy as jnp
from jax.experimental import pallas as pl
from jax.experimental.pallas import tpu as pltpu

EPS = 1e-5
LEAKY_SLOPE = 0.2


# --------------------------------------------------------------------------
# trace-time constant builders (pure numpy, depend only on static shapes)
# --------------------------------------------------------------------------

def _tap_selectors(h_in, w_in, h_out, w_out, ksize, stride, pad):
    """Tt[k, in_idx, out_idx] = 1 iff output pixel out_idx reads input pixel in_idx
    through kernel tap k = di*ksize + dj (out-of-bounds taps == zero padding)."""
    taps = ksize * ksize
    tt = np.zeros((taps, h_in * w_in, h_out * w_out), np.float32)
    for di in range(ksize):
        for dj in range(ksize):
            k = di * ksize + dj
            for oy in range(h_out):
                iy = stride * oy + di - pad
                if not 0 <= iy < h_in:
                    continue
                for ox in range(w_out):
                    ix = stride * ox + dj - pad
                    if 0 <= ix < w_in:
                        tt[k, iy * w_in + ix, oy * w_out + ox] = 1.0
    return tt


def _spatial_tap_index_map(h, w, ksize):
    """M[in_idx, out_idx] = tap_index + 1 (0 => no contribution) for a stride-1
    ksize x ksize conv with 'same' zero padding on an (h, w) grid."""
    pad = (ksize - 1) // 2
    hw = h * w
    m = np.zeros((hw, hw), np.int32)
    for oy in range(h):
        for ox in range(w):
            o = oy * w + ox
            for di in range(ksize):
                iy = oy + di - pad
                if not 0 <= iy < h:
                    continue
                for dj in range(ksize):
                    ix = ox + dj - pad
                    if 0 <= ix < w:
                        m[iy * w + ix, o] = di * ksize + dj + 1
    return m


def _roll_conv_constants(w_oihw, h_in, w_in, stride, pad):
    """Constants for the roll-based conv path.

    Per tap k (= di*kw + dj) the kernel does a circular lane shift of the input by
    s_k = (di-pad)*w_in + (dj-pad), multiplies by a precomputed border mask, stacks
    the taps along the sublane axis and applies one matmul with the tap-major
    flattened weight W'[o, k*Cin + c] = W[o, c, di, dj].  For stride>1 / 'valid'
    convs a small 0/1 downselect matrix picks the output positions.
    """
    cout, cin, kh, kw = w_oihw.shape
    h_out = (h_in + 2 * pad - kh) // stride + 1
    w_out = (w_in + 2 * pad - kw) // stride + 1
    taps = kh * kw
    wp = jnp.transpose(w_oihw.astype(jnp.float32), (0, 2, 3, 1)).reshape(cout, taps * cin)
    shifts = []
    mask = np.zeros((taps, h_in * w_in), np.float32)
    for di in range(kh):
        for dj in range(kw):
            k = di * kw + dj
            shifts.append((di - pad) * w_in + (dj - pad))
            for iy in range(h_in):
                if not 0 <= iy + di - pad < h_in:
                    continue
                for ix in range(w_in):
                    if 0 <= ix + dj - pad < w_in:
                        mask[k, iy * w_in + ix] = 1.0
    sel = None
    if not (stride == 1 and h_out == h_in and w_out == w_in):
        selm = np.zeros((h_in * w_in, h_out * w_out), np.float32)
        for oy in range(h_out):
            for ox in range(w_out):
                selm[stride * oy * w_in + stride * ox, oy * w_out + ox] = 1.0
        sel = jnp.asarray(selm)
    return wp, jnp.asarray(mask), sel, tuple(shifts), (h_out, w_out, cout)


def _tap_conv_constants(w_oihw, h_in, w_in, stride, pad):
    """Fallback path: per-tap weights (taps,Cout,Cin) + per-tap 0/1 selection
    matrices (taps, HWin, HWout).  Used when HWin is not lane-aligned (e.g. the
    final 3x3 conv on the 8x8 map)."""
    cout, cin, kh, kw = w_oihw.shape
    h_out = (h_in + 2 * pad - kh) // stride + 1
    w_out = (w_in + 2 * pad - kw) // stride + 1
    wt = jnp.transpose(w_oihw.astype(jnp.float32), (2, 3, 0, 1)).reshape(kh * kw, cout, cin)
    tt = jnp.asarray(_tap_selectors(h_in, w_in, h_out, w_out, kh, stride, pad))
    return wt, tt, (h_out, w_out, cout)


def _cbam_constants(p, h, w):
    """CBAM constants: packed channel-attention MLP params ([W|b] per layer) and the
    7x7 spatial-attention conv folded with its BatchNorm scale into one dense
    (2*HW, HW) operator (avg rows on top, max rows below); BN shift returned as a
    scalar (goes to SMEM)."""
    cr, c = p["ca_w1"].shape
    ca1 = jnp.concatenate([p["ca_w1"].astype(jnp.float32),
                           p["ca_b1"].reshape(cr, 1).astype(jnp.float32)], axis=1)
    ca2 = jnp.concatenate([p["ca_w2"].astype(jnp.float32),
                           p["ca_b2"].reshape(c, 1).astype(jnp.float32)], axis=1)
    m = _spatial_tap_index_map(h, w, 7)
    scale = p["sa_bn_gamma"][0] / jnp.sqrt(p["sa_bn_var"][0] + EPS)
    shift = p["sa_bn_beta"][0] - p["sa_bn_mean"][0] * scale
    w_avg = jnp.concatenate([jnp.zeros((1,), jnp.float32),
                             p["sa_w"][0, 0].reshape(-1).astype(jnp.float32)])
    w_max = jnp.concatenate([jnp.zeros((1,), jnp.float32),
                             p["sa_w"][0, 1].reshape(-1).astype(jnp.float32)])
    a_avg = jnp.take(w_avg, m) * scale          # (HW, HW) in (in, out) orientation
    a_max = jnp.take(w_max, m) * scale
    sa = jnp.concatenate([a_avg, a_max], axis=0)  # (2*HW, HW)
    return [ca1, ca2, sa], shift


# --------------------------------------------------------------------------
# fused encoder kernel (driven by a static per-stage plan)
# --------------------------------------------------------------------------

def _build_encoder_kernel(plan):
    def leaky(v):
        return jnp.where(v >= 0.0, v, LEAKY_SLOPE * v)

    def kernel(*args):
        x_ref = args[0]
        o_ref = args[-1]
        smem_ref = args[-2]                                # (#cbam,) f32 SA BN shifts
        refs = list(args[1:-2])
        pos = 0

        def nxt():
            nonlocal pos
            r = refs[pos]
            pos += 1
            return r

        x = x_ref[0]                                       # (C, H*W) f32, lane-dense

        for op in plan:
            kind = op[0]

            if kind == "conv_roll":
                _, shifts, has_sel = op
                w_ref = nxt()
                m_ref = nxt()
                sel_ref = nxt() if has_sel else None
                masks = m_ref[...]                         # (taps, HWin)
                hw = x.shape[1]
                pieces = []
                for k, s in enumerate(shifts):
                    r = (-s) % hw
                    shifted = pltpu.roll(x, shift=r, axis=1) if r else x
                    pieces.append(shifted * masks[k:k + 1, :])
                stacked = jnp.concatenate(pieces, axis=0)  # (taps*Cin, HWin)
                if sel_ref is not None:                    # stride-2 / valid downselect
                    stacked = jnp.dot(stacked, sel_ref[...],
                                      preferred_element_type=jnp.float32)
                x = jnp.dot(w_ref[...], stacked, preferred_element_type=jnp.float32)

            elif kind == "conv_tap":
                _, taps = op
                wt_ref = nxt()
                tt_ref = nxt()
                acc = None
                for k in range(taps):
                    z = jnp.dot(wt_ref[k], x, preferred_element_type=jnp.float32)
                    z = jnp.dot(z, tt_ref[k], preferred_element_type=jnp.float32)
                    acc = z if acc is None else acc + z
                x = acc

            elif kind == "leaky":
                x = leaky(x)

            elif kind == "bn_leaky":
                bn = nxt()[...]                            # (C, 2): [scale | shift]
                x = leaky(x * bn[:, 0:1] + bn[:, 1:2])

            elif kind == "cbam":
                _, sidx = op
                ca1 = nxt()[...]                           # (Cr, C+1): [W1 | b1]
                ca2 = nxt()[...]                           # (C, Cr+1): [W2 | b2]
                sa_ref = nxt()                             # (2*HW, HW)
                c = x.shape[0]
                cr = ca1.shape[0]
                # channel attention: avg & max branches share one fused MLP pass
                pooled = jnp.concatenate(
                    [jnp.mean(x, axis=1, keepdims=True),
                     jnp.max(x, axis=1, keepdims=True)], axis=1)          # (C, 2)
                hmid = jnp.maximum(
                    jnp.dot(ca1[:, :c], pooled, preferred_element_type=jnp.float32)
                    + ca1[:, c:c + 1], 0.0)
                logits = (jnp.dot(ca2[:, :cr], hmid, preferred_element_type=jnp.float32)
                          + ca2[:, cr:cr + 1])
                x = x * jax.nn.sigmoid(logits[:, 0:1] + logits[:, 1:2])
                # spatial attention: folded 7x7 conv + BN, avg & max fused in one matmul
                v = jnp.concatenate(
                    [jnp.mean(x, axis=0, keepdims=True),
                     jnp.max(x, axis=0, keepdims=True)], axis=1)           # (1, 2*HW)
                pre = jnp.dot(v, sa_ref[...], preferred_element_type=jnp.float32)
                x = x * jax.nn.sigmoid(pre + smem_ref[sidx])

            else:
                raise ValueError(f"unknown plan op {kind}")

        o_ref[0] = x.astype(o_ref.dtype)

    return kernel


# --------------------------------------------------------------------------
# public forward pass (NCHW in / NCHW out)
# --------------------------------------------------------------------------

def encoder_forward(x_nchw, params):
    B, cin, H, W = x_nchw.shape
    x2 = x_nchw.reshape(B, cin, H * W).astype(jnp.float32)

    # Pad the input-channel axis to a multiple of 8 (sublane alignment) with zeros;
    # conv0's weight gets matching zero columns so the result is unchanged.
    cin_pad = -(-cin // 8) * 8
    conv0_w = params["conv0_w"]
    if cin_pad != cin:
        x2 = jnp.pad(x2, ((0, 0), (0, cin_pad - cin), (0, 0)))
        conv0_w = jnp.pad(conv0_w, ((0, 0), (0, cin_pad - cin), (0, 0), (0, 0)))

    plan = []
    sa_shifts = []
    kernel_inputs = [x2]
    in_specs = [pl.BlockSpec((1, cin_pad, H * W), lambda b: (b, 0, 0))]

    def add(arr):
        arr = jnp.asarray(arr, jnp.float32)
        kernel_inputs.append(arr)
        in_specs.append(pl.BlockSpec(arr.shape, lambda b, _n=arr.ndim: (0,) * _n))

    def add_conv(w, h_in, w_in, stride, pad):
        if (h_in * w_in) % 128 == 0:
            wp, mask, sel, shifts, out = _roll_conv_constants(w, h_in, w_in, stride, pad)
            add(wp)
            add(mask)
            if sel is not None:
                add(sel)
            plan.append(("conv_roll", shifts, sel is not None))
        else:
            wt, tt, out = _tap_conv_constants(w, h_in, w_in, stride, pad)
            add(wt)
            add(tt)
            plan.append(("conv_tap", int(wt.shape[0])))
        return out

    def add_cbam(p, h, w):
        arrs, shift = _cbam_constants(p, h, w)
        for a in arrs:
            add(a)
        plan.append(("cbam", len(sa_shifts)))
        sa_shifts.append(shift)

    # initial conv + LeakyReLU + CBAM
    h, w, _c = add_conv(conv0_w, H, W, stride=1, pad=1)
    plan.append(("leaky",))
    add_cbam(params["cbam0"], h, w)

    # pyramid blocks: conv4x4 s2 p1 -> BN -> LeakyReLU -> CBAM
    for blk in params["pyramid"]:
        h, w, c = add_conv(blk["conv_w"], h, w, stride=2, pad=1)
        scale = blk["bn_gamma"] / jnp.sqrt(blk["bn_var"] + EPS)
        shift = blk["bn_beta"] - blk["bn_mean"] * scale
        add(jnp.stack([scale, shift], axis=1))             # (C, 2) packed BN
        plan.append(("bn_leaky",))
        add_cbam(blk["cbam"], h, w)

    # final conv (no BN / activation)
    h_f, w_f, latent = add_conv(params["final_w"], h, w, stride=1, pad=0)

    # spatial-attention BN shifts -> SMEM scalars (always the last input)
    kernel_inputs.append(jnp.stack(sa_shifts).astype(jnp.float32))
    in_specs.append(pl.BlockSpec(memory_space=pltpu.MemorySpace.SMEM))

    out = pl.pallas_call(
        _build_encoder_kernel(tuple(plan)),
        grid=(B,),
        in_specs=in_specs,
        out_specs=pl.BlockSpec((1, latent, h_f * w_f), lambda b: (b, 0, 0)),
        out_shape=jax.ShapeDtypeStruct((B, latent, h_f * w_f), jnp.float32),
        compiler_params=pltpu.CompilerParams(
            dimension_semantics=("parallel",),
            vmem_limit_bytes=32 * 1024 * 1024,
        ),
    )(*kernel_inputs)
    return out.reshape(B, latent, h_f, w_f)


# --------------------------------------------------------------------------
# pure-JAX reference (for on-device correctness check)
# --------------------------------------------------------------------------

def _ref_conv(x, w, stride, pad):
    return jax.lax.conv_general_dilated(
        x, w, window_strides=(stride, stride), padding=[(pad, pad), (pad, pad)],
        dimension_numbers=("NCHW", "OIHW", "NCHW"), precision=jax.lax.Precision.HIGHEST)


def _ref_cbam(x, p):
    avg = jnp.mean(x, axis=(2, 3))
    mx = jnp.max(x, axis=(2, 3))

    def mlp(v):
        h = jnp.maximum(v @ p["ca_w1"].T + p["ca_b1"], 0.0)
        return h @ p["ca_w2"].T + p["ca_b2"]

    att = jax.nn.sigmoid(mlp(avg) + mlp(mx))[:, :, None, None]
    x = x * att
    a = jnp.mean(x, axis=1, keepdims=True)
    m = jnp.max(x, axis=1, keepdims=True)
    s = _ref_conv(jnp.concatenate([a, m], axis=1), p["sa_w"], 1, 3)
    scale = p["sa_bn_gamma"] / jnp.sqrt(p["sa_bn_var"] + EPS)
    shift = p["sa_bn_beta"] - p["sa_bn_mean"] * scale
    s = s * scale[None, :, None, None] + shift[None, :, None, None]
    return x * jax.nn.sigmoid(s)


def encoder_reference(x, params):
    h = _ref_conv(x, params["conv0_w"], 1, 1)
    h = jnp.where(h >= 0, h, LEAKY_SLOPE * h)
    h = _ref_cbam(h, params["cbam0"])
    for blk in params["pyramid"]:
        h = _ref_conv(h, blk["conv_w"], 2, 1)
        scale = blk["bn_gamma"] / jnp.sqrt(blk["bn_var"] + EPS)
        shift = blk["bn_beta"] - blk["bn_mean"] * scale
        h = h * scale[None, :, None, None] + shift[None, :, None, None]
        h = jnp.where(h >= 0, h, LEAKY_SLOPE * h)
        h = _ref_cbam(h, blk["cbam"])
    return _ref_conv(h, params["final_w"], 1, 0)


# --------------------------------------------------------------------------
# parameter init (PyTorch-convention shapes)
# --------------------------------------------------------------------------

def init_encoder_params(key, *, num_input_channels, n_features, latent_vec_size,
                        input_size, reduction_ratio=16):
    keys = jax.random.split(key, 64)
    ki = iter(keys)

    def nrm(shape, fan_in):
        return jax.random.normal(next(ki), shape, jnp.float32) / jnp.sqrt(float(fan_in))

    def cbam_params(c):
        cr = max(c // reduction_ratio, 1)
        return {
            "ca_w1": nrm((cr, c), c), "ca_b1": nrm((cr,), c),
            "ca_w2": nrm((c, cr), cr), "ca_b2": nrm((c,), cr),
            "sa_w": nrm((1, 2, 7, 7), 2 * 49),
            "sa_bn_gamma": jnp.ones((1,), jnp.float32),
            "sa_bn_beta": jnp.zeros((1,), jnp.float32),
            "sa_bn_mean": jnp.zeros((1,), jnp.float32),
            "sa_bn_var": jnp.ones((1,), jnp.float32),
        }

    nf = n_features
    params = {
        "conv0_w": nrm((nf, num_input_channels, 3, 3), 9 * num_input_channels),
        "cbam0": cbam_params(nf),
        "pyramid": [],
    }
    pyr_dim = min(*input_size) // 2
    while pyr_dim > 4:
        in_f, out_f = nf, nf * 2
        params["pyramid"].append({
            "conv_w": nrm((out_f, in_f, 4, 4), 16 * in_f),
            "bn_gamma": 1.0 + 0.1 * jax.random.normal(next(ki), (out_f,), jnp.float32),
            "bn_beta": 0.1 * jax.random.normal(next(ki), (out_f,), jnp.float32),
            "bn_mean": jnp.zeros((out_f,), jnp.float32),
            "bn_var": jnp.ones((out_f,), jnp.float32),
            "cbam": cbam_params(out_f),
        })
        nf = out_f
        pyr_dim //= 2
    params["final_w"] = nrm((latent_vec_size, nf, 3, 3), 9 * nf)
    return params


if __name__ == "__main__":
    key = jax.random.PRNGKey(0)
    k_params, k_x = jax.random.split(key)

    input_size = (16, 16)
    batch, num_input_channels, n_features, latent_vec_size = 2, 4, 16, 8

    params = init_encoder_params(
        k_params, num_input_channels=num_input_channels, n_features=n_features,
        latent_vec_size=latent_vec_size, input_size=input_size)

    x = jax.random.normal(k_x, (batch, num_input_channels, *input_size), jnp.float32)

    fwd = jax.jit(encoder_forward)
    out = fwd(x, params)
    jax.block_until_ready(out)

    # 16x16 -> conv3x3(p1): 16x16 -> pyramid conv4x4 s2 p1: 8x8 -> final conv3x3 p0: 6x6
    assert out.shape == (batch, latent_vec_size, 6, 6), out.shape
    assert bool(jnp.all(jnp.isfinite(out)))

    ref = encoder_reference(x, params)
    max_err = float(jnp.max(jnp.abs(out - ref)))
    assert max_err < 3e-2, f"mismatch vs pure-JAX reference: {max_err}"

    print("KERNEL_OK")
</pallas_src>

<mosaic_0001>
module attributes {stable_mosaic.version = 11 : i64} {
  func.func @kernel(%arg0: i32, %arg1: memref<1x8x256xf32, #tpu.memory_space<vmem>>, %arg2: memref<16x72xf32, #tpu.memory_space<vmem>>, %arg3: memref<9x256xf32, #tpu.memory_space<vmem>>, %arg4: memref<1x17xf32, #tpu.memory_space<vmem>>, %arg5: memref<16x2xf32, #tpu.memory_space<vmem>>, %arg6: memref<512x256xf32, #tpu.memory_space<vmem>>, %arg7: memref<32x256xf32, #tpu.memory_space<vmem>>, %arg8: memref<16x256xf32, #tpu.memory_space<vmem>>, %arg9: memref<256x64xf32, #tpu.memory_space<vmem>>, %arg10: memref<32x2xf32, #tpu.memory_space<vmem>>, %arg11: memref<2x33xf32, #tpu.memory_space<vmem>>, %arg12: memref<32x3xf32, #tpu.memory_space<vmem>>, %arg13: memref<128x64xf32, #tpu.memory_space<vmem>>, %arg14: memref<9x8x32xf32, #tpu.memory_space<vmem>>, %arg15: memref<9x64x36xf32, #tpu.memory_space<vmem>>, %arg16: memref<2xf32, #tpu.memory_space<smem>>, %arg17: memref<1x8x36xf32, #tpu.memory_space<vmem>>) attributes {dimension_semantics = [#tpu.dimension_semantics<parallel>], iteration_bounds = array<i64: 2>, scalar_prefetch = 0 : i64, scratch_operands = 0 : i64, tpu.core_type = #tpu.core_type<tc>, window_params = [{transform_indices = @transform_0, window_bounds = array<i64: 1, 8, 256>}, {pipeline_mode = #tpu.pipeline_mode<synchronous>, transform_indices = @transform_1, window_bounds = array<i64: 16, 72>}, {pipeline_mode = #tpu.pipeline_mode<synchronous>, transform_indices = @transform_2, window_bounds = array<i64: 9, 256>}, {pipeline_mode = #tpu.pipeline_mode<synchronous>, transform_indices = @transform_3, window_bounds = array<i64: 1, 17>}, {pipeline_mode = #tpu.pipeline_mode<synchronous>, transform_indices = @transform_4, window_bounds = array<i64: 16, 2>}, {pipeline_mode = #tpu.pipeline_mode<synchronous>, transform_indices = @transform_5, window_bounds = array<i64: 512, 256>}, {pipeline_mode = #tpu.pipeline_mode<synchronous>, transform_indices = @transform_6, window_bounds = array<i64: 32, 256>}, {pipeline_mode = #tpu.pipeline_mode<synchronous>, transform_indices = @transform_7, window_bounds = array<i64: 16, 256>}, {pipeline_mode = #tpu.pipeline_mode<synchronous>, transform_indices = @transform_8, window_bounds = array<i64: 256, 64>}, {pipeline_mode = #tpu.pipeline_mode<synchronous>, transform_indices = @transform_9, window_bounds = array<i64: 32, 2>}, {pipeline_mode = #tpu.pipeline_mode<synchronous>, transform_indices = @transform_10, window_bounds = array<i64: 2, 33>}, {pipeline_mode = #tpu.pipeline_mode<synchronous>, transform_indices = @transform_11, window_bounds = array<i64: 32, 3>}, {pipeline_mode = #tpu.pipeline_mode<synchronous>, transform_indices = @transform_12, window_bounds = array<i64: 128, 64>}, {pipeline_mode = #tpu.pipeline_mode<synchronous>, transform_indices = @transform_13, window_bounds = array<i64: 9, 8, 32>}, {pipeline_mode = #tpu.pipeline_mode<synchronous>, transform_indices = @transform_14, window_bounds = array<i64: 9, 64, 36>}, {transform_indices = @transform_15, window_bounds = array<i64: 2>}, {transform_indices = @transform_16, window_bounds = array<i64: 1, 8, 36>}]} {
    %c0 = arith.constant 0 : index
    %c0_0 = arith.constant 0 : index
    %c0_1 = arith.constant 0 : index
    %0 = vector.load %arg1[%c0, %c0_0, %c0_1] : memref<1x8x256xf32, #tpu.memory_space<vmem>>, vector<1x8x256xf32>
    %1 = vector.shape_cast %0 : vector<1x8x256xf32> to vector<8x256xf32>
    %c0_2 = arith.constant 0 : index
    %c0_3 = arith.constant 0 : index
    %2 = vector.load %arg3[%c0_2, %c0_3] : memref<9x256xf32, #tpu.memory_space<vmem>>, vector<9x256xf32>
    %c17_i32 = arith.constant 17 : i32
    %3 = tpu.dynamic_rotate %1 by %c17_i32 dim 1 : vector<8x256xf32>, i32 -> vector<8x256xf32>
    %4 = vector.extract_strided_slice %2 {offsets = [0, 0], sizes = [1, 256], strides = [1, 1]} : vector<9x256xf32> to vector<1x256xf32>
    %5 = vector.broadcast %4 : vector<1x256xf32> to vector<8x256xf32>
    %6 = arith.mulf %3, %5 : vector<8x256xf32>
    %c16_i32 = arith.constant 16 : i32
    %7 = tpu.dynamic_rotate %1 by %c16_i32 dim 1 : vector<8x256xf32>, i32 -> vector<8x256xf32>
    %8 = vector.extract_strided_slice %2 {offsets = [1, 0], sizes = [1, 256], strides = [1, 1]} : vector<9x256xf32> to vector<1x256xf32>
    %9 = vector.broadcast %8 : vector<1x256xf32> to vector<8x256xf32>
    %10 = arith.mulf %7, %9 : vector<8x256xf32>
    %c15_i32 = arith.constant 15 : i32
    %11 = tpu.dynamic_rotate %1 by %c15_i32 dim 1 : vector<8x256xf32>, i32 -> vector<8x256xf32>
    %12 = vector.extract_strided_slice %2 {offsets = [2, 0], sizes = [1, 256], strides = [1, 1]} : vector<9x256xf32> to vector<1x256xf32>
    %13 = vector.broadcast %12 : vector<1x256xf32> to vector<8x256xf32>
    %14 = arith.mulf %11, %13 : vector<8x256xf32>
    %c1_i32 = arith.constant 1 : i32
    %15 = tpu.dynamic_rotate %1 by %c1_i32 dim 1 : vector<8x256xf32>, i32 -> vector<8x256xf32>
    %16 = vector.extract_strided_slice %2 {offsets = [3, 0], sizes = [1, 256], strides = [1, 1]} : vector<9x256xf32> to vector<1x256xf32>
    %17 = vector.broadcast %16 : vector<1x256xf32> to vector<8x256xf32>
    %18 = arith.mulf %15, %17 : vector<8x256xf32>
    %19 = vector.extract_strided_slice %2 {offsets = [4, 0], sizes = [1, 256], strides = [1, 1]} : vector<9x256xf32> to vector<1x256xf32>
    %20 = vector.broadcast %19 : vector<1x256xf32> to vector<8x256xf32>
    %21 = arith.mulf %1, %20 : vector<8x256xf32>
    %c255_i32 = arith.constant 255 : i32
    %22 = tpu.dynamic_rotate %1 by %c255_i32 dim 1 : vector<8x256xf32>, i32 -> vector<8x256xf32>
    %23 = vector.extract_strided_slice %2 {offsets = [5, 0], sizes = [1, 256], strides = [1, 1]} : vector<9x256xf32> to vector<1x256xf32>
    %24 = vector.broadcast %23 : vector<1x256xf32> to vector<8x256xf32>
    %25 = arith.mulf %22, %24 : vector<8x256xf32>
    %c241_i32 = arith.constant 241 : i32
    %26 = tpu.dynamic_rotate %1 by %c241_i32 dim 1 : vector<8x256xf32>, i32 -> vector<8x256xf32>
    %27 = vector.extract_strided_slice %2 {offsets = [6, 0], sizes = [1, 256], strides = [1, 1]} : vector<9x256xf32> to vector<1x256xf32>
    %28 = vector.broadcast %27 : vector<1x256xf32> to vector<8x256xf32>
    %29 = arith.mulf %26, %28 : vector<8x256xf32>
    %c240_i32 = arith.constant 240 : i32
    %30 = tpu.dynamic_rotate %1 by %c240_i32 dim 1 : vector<8x256xf32>, i32 -> vector<8x256xf32>
    %31 = vector.extract_strided_slice %2 {offsets = [7, 0], sizes = [1, 256], strides = [1, 1]} : vector<9x256xf32> to vector<1x256xf32>
    %32 = vector.broadcast %31 : vector<1x256xf32> to vector<8x256xf32>
    %33 = arith.mulf %30, %32 : vector<8x256xf32>
    %c239_i32 = arith.constant 239 : i32
    %34 = tpu.dynamic_rotate %1 by %c239_i32 dim 1 : vector<8x256xf32>, i32 -> vector<8x256xf32>
    %35 = vector.extract_strided_slice %2 {offsets = [8, 0], sizes = [1, 256], strides = [1, 1]} : vector<9x256xf32> to vector<1x256xf32>
    %36 = vector.broadcast %35 : vector<1x256xf32> to vector<8x256xf32>
    %37 = arith.mulf %34, %36 : vector<8x256xf32>
    %38 = tpu.concatenate %6, %10, %14, %18, %21, %25, %29, %33, %37 in 0 : vector<8x256xf32>, vector<8x256xf32>, vector<8x256xf32>, vector<8x256xf32>, vector<8x256xf32>, vector<8x256xf32>, vector<8x256xf32>, vector<8x256xf32>, vector<8x256xf32> -> vector<72x256xf32>
    %c0_4 = arith.constant 0 : index
    %c0_5 = arith.constant 0 : index
    %39 = vector.load %arg2[%c0_4, %c0_5] : memref<16x72xf32, #tpu.memory_space<vmem>>, vector<16x72xf32>
    %cst = arith.constant dense<0.000000e+00> : vector<16x256xf32>
    %40 = tpu.matmul %39, %38, %cst {dimension_numbers = #tpu.dot_dimension_numbers<[1], [0], [0], [1], [0, 0, 1, 1], [], []>} : vector<16x72xf32>, vector<72x256xf32>, vector<16x256xf32> -> vector<16x256xf32>
    %cst_6 = arith.constant 0.000000e+00 : f32
    %41 = vector.broadcast %cst_6 : f32 to vector<16x256xf32>
    %42 = arith.cmpf oge, %40, %41 : vector<16x256xf32>
    %cst_7 = arith.constant 2.000000e-01 : f32
    %43 = vector.broadcast %cst_7 : f32 to vector<16x256xf32>
    %44 = arith.mulf %43, %40 : vector<16x256xf32>
    %45 = arith.select %42, %40, %44 : vector<16x256xi1>, vector<16x256xf32>
    %c0_8 = arith.constant 0 : index
    %c0_9 = arith.constant 0 : index
    %46 = vector.load %arg4[%c0_8, %c0_9] : memref<1x17xf32, #tpu.memory_space<vmem>>, vector<1x17xf32>
    %c0_10 = arith.constant 0 : index
    %c0_11 = arith.constant 0 : index
    %47 = vector.load %arg5[%c0_10, %c0_11] : memref<16x2xf32, #tpu.memory_space<vmem>>, vector<16x2xf32>
    %cst_12 = arith.constant dense<0.000000e+00> : vector<16xf32>
    %48 = vector.multi_reduction <add>, %45, %cst_12 [1] : vector<16x256xf32> to vector<16xf32>
    %49 = vector.shape_cast %48 : vector<16xf32> to vector<16x1xf32>
    %cst_13 = arith.constant 2.560000e+02 : f32
    %50 = vector.broadcast %cst_13 : f32 to vector<16x1xf32>
    %51 = arith.divf %49, %50 : vector<16x1xf32>
    %cst_14 = arith.constant dense<0xFF800000> : vector<16xf32>
    %52 = vector.multi_reduction <maximumf>, %45, %cst_14 [1] : vector<16x256xf32> to vector<16xf32>
    %53 = vector.shape_cast %52 : vector<16xf32> to vector<16x1xf32>
    %54 = tpu.concatenate %51, %53 in 1 : vector<16x1xf32>, vector<16x1xf32> -> vector<16x2xf32>
    %55 = vector.extract_strided_slice %46 {offsets = [0, 0], sizes = [1, 16], strides = [1, 1]} : vector<1x17xf32> to vector<1x16xf32>
    %cst_15 = arith.constant dense<0.000000e+00> : vector<1x2xf32>
    %56 = tpu.matmul %55, %54, %cst_15 {dimension_numbers = #tpu.dot_dimension_numbers<[1], [0], [0], [1], [0, 0, 1, 1], [], []>} : vector<1x16xf32>, vector<16x2xf32>, vector<1x2xf32> -> vector<1x2xf32>
    %57 = vector.extract_strided_slice %46 {offsets = [0, 16], sizes = [1, 1], strides = [1, 1]} : vector<1x17xf32> to vector<1x1xf32>
    %58 = vector.broadcast %57 : vector<1x1xf32> to vector<1x2xf32>
    %59 = arith.addf %56, %58 : vector<1x2xf32>
    %cst_16 = arith.constant 0.000000e+00 : f32
    %60 = vector.broadcast %cst_16 : f32 to vector<1x2xf32>
    %61 = arith.maximumf %59, %60 : vector<1x2xf32>
    %62 = vector.extract_strided_slice %47 {offsets = [0, 0], sizes = [16, 1], strides = [1, 1]} : vector<16x2xf32> to vector<16x1xf32>
    %cst_17 = arith.constant dense<0.000000e+00> : vector<16x2xf32>
    %63 = tpu.matmul %62, %61, %cst_17 {dimension_numbers = #tpu.dot_dimension_numbers<[1], [0], [0], [1], [0, 0, 1, 1], [], []>} : vector<16x1xf32>, vector<1x2xf32>, vector<16x2xf32> -> vector<16x2xf32>
    %64 = vector.extract_strided_slice %47 {offsets = [0, 1], sizes = [16, 1], strides = [1, 1]} : vector<16x2xf32> to vector<16x1xf32>
    %65 = vector.broadcast %64 : vector<16x1xf32> to vector<16x2xf32>
    %66 = arith.addf %63, %65 : vector<16x2xf32>
    %67 = vector.extract_strided_slice %66 {offsets = [0, 0], sizes = [16, 1], strides = [1, 1]} : vector<16x2xf32> to vector<16x1xf32>
    %68 = vector.extract_strided_slice %66 {offsets = [0, 1], sizes = [16, 1], strides = [1, 1]} : vector<16x2xf32> to vector<16x1xf32>
    %69 = arith.addf %67, %68 : vector<16x1xf32>
    %70 = arith.negf %69 : vector<16x1xf32>
    %71 = math.exp %70 : vector<16x1xf32>
    %cst_18 = arith.constant 1.000000e+00 : f32
    %72 = vector.broadcast %cst_18 : f32 to vector<16x1xf32>
    %73 = arith.addf %72, %71 : vector<16x1xf32>
    %74 = arith.divf %72, %73 : vector<16x1xf32>
    %75 = vector.broadcast %74 : vector<16x1xf32> to vector<16x256xf32>
    %76 = arith.mulf %45, %75 : vector<16x256xf32>
    %cst_19 = arith.constant dense<0.000000e+00> : vector<256xf32>
    %77 = vector.multi_reduction <add>, %76, %cst_19 [0] : vector<16x256xf32> to vector<256xf32>
    %78 = vector.shape_cast %77 : vector<256xf32> to vector<1x256xf32>
    %cst_20 = arith.constant 1.600000e+01 : f32
    %79 = vector.broadcast %cst_20 : f32 to vector<1x256xf32>
    %80 = arith.divf %78, %79 : vector<1x256xf32>
    %cst_21 = arith.constant dense<0xFF800000> : vector<256xf32>
    %81 = vector.multi_reduction <maximumf>, %76, %cst_21 [0] : vector<16x256xf32> to vector<256xf32>
    %82 = vector.shape_cast %81 : vector<256xf32> to vector<1x256xf32>
    %83 = tpu.concatenate %80, %82 in 1 : vector<1x256xf32>, vector<1x256xf32> -> vector<1x512xf32>
    %c0_22 = arith.constant 0 : index
    %c0_23 = arith.constant 0 : index
    %84 = vector.load %arg6[%c0_22, %c0_23] : memref<512x256xf32, #tpu.memory_space<vmem>>, vector<512x256xf32>
    %cst_24 = arith.constant dense<0.000000e+00> : vector<1x256xf32>
    %85 = tpu.matmul %83, %84, %cst_24 {dimension_numbers = #tpu.dot_dimension_numbers<[1], [0], [0], [1], [0, 0, 1, 1], [], []>} : vector<1x512xf32>, vector<512x256xf32>, vector<1x256xf32> -> vector<1x256xf32>
    %c0_25 = arith.constant 0 : index
    %86 = memref.load %arg16[%c0_25] : memref<2xf32, #tpu.memory_space<smem>>
    %87 = vector.broadcast %86 : f32 to vector<1x256xf32>
    %88 = arith.addf %85, %87 : vector<1x256xf32>
    %89 = arith.negf %88 : vector<1x256xf32>
    %90 = math.exp %89 : vector<1x256xf32>
    %cst_26 = arith.constant 1.000000e+00 : f32
    %91 = vector.broadcast %cst_26 : f32 to vector<1x256xf32>
    %92 = arith.addf %91, %90 : vector<1x256xf32>
    %93 = arith.divf %91, %92 : vector<1x256xf32>
    %94 = vector.broadcast %93 : vector<1x256xf32> to vector<16x256xf32>
    %95 = arith.mulf %76, %94 : vector<16x256xf32>
    %c0_27 = arith.constant 0 : index
    %c0_28 = arith.constant 0 : index
    %96 = vector.load %arg8[%c0_27, %c0_28] : memref<16x256xf32, #tpu.memory_space<vmem>>, vector<16x256xf32>
    %c17_i32_29 = arith.constant 17 : i32
    %97 = tpu.dynamic_rotate %95 by %c17_i32_29 dim 1 : vector<16x256xf32>, i32 -> vector<16x256xf32>
    %98 = vector.extract_strided_slice %96 {offsets = [0, 0], sizes = [1, 256], strides = [1, 1]} : vector<16x256xf32> to vector<1x256xf32>
    %99 = vector.broadcast %98 : vector<1x256xf32> to vector<16x256xf32>
    %100 = arith.mulf %97, %99 : vector<16x256xf32>
    %c16_i32_30 = arith.constant 16 : i32
    %101 = tpu.dynamic_rotate %95 by %c16_i32_30 dim 1 : vector<16x256xf32>, i32 -> vector<16x256xf32>
    %102 = vector.extract_strided_slice %96 {offsets = [1, 0], sizes = [1, 256], strides = [1, 1]} : vector<16x256xf32> to vector<1x256xf32>
    %103 = vector.broadcast %102 : vector<1x256xf32> to vector<16x256xf32>
    %104 = arith.mulf %101, %103 : vector<16x256xf32>
    %c15_i32_31 = arith.constant 15 : i32
    %105 = tpu.dynamic_rotate %95 by %c15_i32_31 dim 1 : vector<16x256xf32>, i32 -> vector<16x256xf32>
    %106 = vector.extract_strided_slice %96 {offsets = [2, 0], sizes = [1, 256], strides = [1, 1]} : vector<16x256xf32> to vector<1x256xf32>
    %107 = vector.broadcast %106 : vector<1x256xf32> to vector<16x256xf32>
    %108 = arith.mulf %105, %107 : vector<16x256xf32>
    %c14_i32 = arith.constant 14 : i32
    %109 = tpu.dynamic_rotate %95 by %c14_i32 dim 1 : vector<16x256xf32>, i32 -> vector<16x256xf32>
    %110 = vector.extract_strided_slice %96 {offsets = [3, 0], sizes = [1, 256], strides = [1, 1]} : vector<16x256xf32> to vector<1x256xf32>
    %111 = vector.broadcast %110 : vector<1x256xf32> to vector<16x256xf32>
    %112 = arith.mulf %109, %111 : vector<16x256xf32>
    %c1_i32_32 = arith.constant 1 : i32
    %113 = tpu.dynamic_rotate %95 by %c1_i32_32 dim 1 : vector<16x256xf32>, i32 -> vector<16x256xf32>
    %114 = vector.extract_strided_slice %96 {offsets = [4, 0], sizes = [1, 256], strides = [1, 1]} : vector<16x256xf32> to vector<1x256xf32>
    %115 = vector.broadcast %114 : vector<1x256xf32> to vector<16x256xf32>
    %116 = arith.mulf %113, %115 : vector<16x256xf32>
    %117 = vector.extract_strided_slice %96 {offsets = [5, 0], sizes = [1, 256], strides = [1, 1]} : vector<16x256xf32> to vector<1x256xf32>
    %118 = vector.broadcast %117 : vector<1x256xf32> to vector<16x256xf32>
    %119 = arith.mulf %95, %118 : vector<16x256xf32>
    %c255_i32_33 = arith.constant 255 : i32
    %120 = tpu.dynamic_rotate %95 by %c255_i32_33 dim 1 : vector<16x256xf32>, i32 -> vector<16x256xf32>
    %121 = vector.extract_strided_slice %96 {offsets = [6, 0], sizes = [1, 256], strides = [1, 1]} : vector<16x256xf32> to vector<1x256xf32>
    %122 = vector.broadcast %121 : vector<1x256xf32> to vector<16x256xf32>
    %123 = arith.mulf %120, %122 : vector<16x256xf32>
    %c254_i32 = arith.constant 254 : i32
    %124 = tpu.dynamic_rotate %95 by %c254_i32 dim 1 : vector<16x256xf32>, i32 -> vector<16x256xf32>
    %125 = vector.extract_strided_slice %96 {offsets = [7, 0], sizes = [1, 256], strides = [1, 1]} : vector<16x256xf32> to vector<1x256xf32>
    %126 = vector.broadcast %125 : vector<1x256xf32> to vector<16x256xf32>
    %127 = arith.mulf %124, %126 : vector<16x256xf32>
    %c241_i32_34 = arith.constant 241 : i32
    %128 = tpu.dynamic_rotate %95 by %c241_i32_34 dim 1 : vector<16x256xf32>, i32 -> vector<16x256xf32>
    %129 = vector.extract_strided_slice %96 {offsets = [8, 0], sizes = [1, 256], strides = [1, 1]} : vector<16x256xf32> to vector<1x256xf32>
    %130 = vector.broadcast %129 : vector<1x256xf32> to vector<16x256xf32>
    %131 = arith.mulf %128, %130 : vector<16x256xf32>
    %c240_i32_35 = arith.constant 240 : i32
    %132 = tpu.dynamic_rotate %95 by %c240_i32_35 dim 1 : vector<16x256xf32>, i32 -> vector<16x256xf32>
    %133 = vector.extract_strided_slice %96 {offsets = [9, 0], sizes = [1, 256], strides = [1, 1]} : vector<16x256xf32> to vector<1x256xf32>
    %134 = vector.broadcast %133 : vector<1x256xf32> to vector<16x256xf32>
    %135 = arith.mulf %132, %134 : vector<16x256xf32>
    %c239_i32_36 = arith.constant 239 : i32
    %136 = tpu.dynamic_rotate %95 by %c239_i32_36 dim 1 : vector<16x256xf32>, i32 -> vector<16x256xf32>
    %137 = vector.extract_strided_slice %96 {offsets = [10, 0], sizes = [1, 256], strides = [1, 1]} : vector<16x256xf32> to vector<1x256xf32>
    %138 = vector.broadcast %137 : vector<1x256xf32> to vector<16x256xf32>
    %139 = arith.mulf %136, %138 : vector<16x256xf32>
    %c238_i32 = arith.constant 238 : i32
    %140 = tpu.dynamic_rotate %95 by %c238_i32 dim 1 : vector<16x256xf32>, i32 -> vector<16x256xf32>
    %141 = vector.extract_strided_slice %96 {offsets = [11, 0], sizes = [1, 256], strides = [1, 1]} : vector<16x256xf32> to vector<1x256xf32>
    %142 = vector.broadcast %141 : vector<1x256xf32> to vector<16x256xf32>
    %143 = arith.mulf %140, %142 : vector<16x256xf32>
    %c225_i32 = arith.constant 225 : i32
    %144 = tpu.dynamic_rotate %95 by %c225_i32 dim 1 : vector<16x256xf32>, i32 -> vector<16x256xf32>
    %145 = vector.extract_strided_slice %96 {offsets = [12, 0], sizes = [1, 256], strides = [1, 1]} : vector<16x256xf32> to vector<1x256xf32>
    %146 = vector.broadcast %145 : vector<1x256xf32> to vector<16x256xf32>
    %147 = arith.mulf %144, %146 : vector<16x256xf32>
    %c224_i32 = arith.constant 224 : i32
    %148 = tpu.dynamic_rotate %95 by %c224_i32 dim 1 : vector<16x256xf32>, i32 -> vector<16x256xf32>
    %149 = vector.extract_strided_slice %96 {offsets = [13, 0], sizes = [1, 256], strides = [1, 1]} : vector<16x256xf32> to vector<1x256xf32>
    %150 = vector.broadcast %149 : vector<1x256xf32> to vector<16x256xf32>
    %151 = arith.mulf %148, %150 : vector<16x256xf32>
    %c223_i32 = arith.constant 223 : i32
    %152 = tpu.dynamic_rotate %95 by %c223_i32 dim 1 : vector<16x256xf32>, i32 -> vector<16x256xf32>
    %153 = vector.extract_strided_slice %96 {offsets = [14, 0], sizes = [1, 256], strides = [1, 1]} : vector<16x256xf32> to vector<1x256xf32>
    %154 = vector.broadcast %153 : vector<1x256xf32> to vector<16x256xf32>
    %155 = arith.mulf %152, %154 : vector<16x256xf32>
    %c222_i32 = arith.constant 222 : i32
    %156 = tpu.dynamic_rotate %95 by %c222_i32 dim 1 : vector<16x256xf32>, i32 -> vector<16x256xf32>
    %157 = vector.extract_strided_slice %96 {offsets = [15, 0], sizes = [1, 256], strides = [1, 1]} : vector<16x256xf32> to vector<1x256xf32>
    %158 = vector.broadcast %157 : vector<1x256xf32> to vector<16x256xf32>
    %159 = arith.mulf %156, %158 : vector<16x256xf32>
    %160 = tpu.concatenate %100, %104, %108, %112, %116, %119, %123, %127, %131, %135, %139, %143, %147, %151, %155, %159 in 0 : vector<16x256xf32>, vector<16x256xf32>, vector<16x256xf32>, vector<16x256xf32>, vector<16x256xf32>, vector<16x256xf32>, vector<16x256xf32>, vector<16x256xf32>, vector<16x256xf32>, vector<16x256xf32>, vector<16x256xf32>, vector<16x256xf32>, vector<16x256xf32>, vector<16x256xf32>, vector<16x256xf32>, vector<16x256xf32> -> vector<256x256xf32>
    %c0_37 = arith.constant 0 : index
    %c0_38 = arith.constant 0 : index
    %161 = vector.load %arg9[%c0_37, %c0_38] : memref<256x64xf32, #tpu.memory_space<vmem>>, vector<256x64xf32>
    %cst_39 = arith.constant dense<0.000000e+00> : vector<256x64xf32>
    %162 = tpu.matmul %160, %161, %cst_39 {dimension_numbers = #tpu.dot_dimension_numbers<[1], [0], [0], [1], [0, 0, 1, 1], [], []>} : vector<256x256xf32>, vector<256x64xf32>, vector<256x64xf32> -> vector<256x64xf32>
    %c0_40 = arith.constant 0 : index
    %c0_41 = arith.constant 0 : index
    %163 = vector.load %arg7[%c0_40, %c0_41] : memref<32x256xf32, #tpu.memory_space<vmem>>, vector<32x256xf32>
    %cst_42 = arith.constant dense<0.000000e+00> : vector<32x64xf32>
    %164 = tpu.matmul %163, %162, %cst_42 {dimension_numbers = #tpu.dot_dimension_numbers<[1], [0], [0], [1], [0, 0, 1, 1], [], []>} : vector<32x256xf32>, vector<256x64xf32>, vector<32x64xf32> -> vector<32x64xf32>
    %c0_43 = arith.constant 0 : index
    %c0_44 = arith.constant 0 : index
    %165 = vector.load %arg10[%c0_43, %c0_44] : memref<32x2xf32, #tpu.memory_space<vmem>>, vector<32x2xf32>
    %166 = vector.extract_strided_slice %165 {offsets = [0, 0], sizes = [32, 1], strides = [1, 1]} : vector<32x2xf32> to vector<32x1xf32>
    %167 = vector.broadcast %166 : vector<32x1xf32> to vector<32x64xf32>
    %168 = arith.mulf %164, %167 : vector<32x64xf32>
    %169 = vector.extract_strided_slice %165 {offsets = [0, 1], sizes = [32, 1], strides = [1, 1]} : vector<32x2xf32> to vector<32x1xf32>
    %170 = vector.broadcast %169 : vector<32x1xf32> to vector<32x64xf32>
    %171 = arith.addf %168, %170 : vector<32x64xf32>
    %cst_45 = arith.constant 0.000000e+00 : f32
    %172 = vector.broadcast %cst_45 : f32 to vector<32x64xf32>
    %173 = arith.cmpf oge, %171, %172 : vector<32x64xf32>
    %cst_46 = arith.constant 2.000000e-01 : f32
    %174 = vector.broadcast %cst_46 : f32 to vector<32x64xf32>
    %175 = arith.mulf %174, %171 : vector<32x64xf32>
    %176 = arith.select %173, %171, %175 : vector<32x64xi1>, vector<32x64xf32>
    %c0_47 = arith.constant 0 : index
    %c0_48 = arith.constant 0 : index
    %177 = vector.load %arg11[%c0_47, %c0_48] : memref<2x33xf32, #tpu.memory_space<vmem>>, vector<2x33xf32>
    %c0_49 = arith.constant 0 : index
    %c0_50 = arith.constant 0 : index
    %178 = vector.load %arg12[%c0_49, %c0_50] : memref<32x3xf32, #tpu.memory_space<vmem>>, vector<32x3xf32>
    %cst_51 = arith.constant dense<0.000000e+00> : vector<32xf32>
    %179 = vector.multi_reduction <add>, %176, %cst_51 [1] : vector<32x64xf32> to vector<32xf32>
    %180 = vector.shape_cast %179 : vector<32xf32> to vector<32x1xf32>
    %cst_52 = arith.constant 6.400000e+01 : f32
    %181 = vector.broadcast %cst_52 : f32 to vector<32x1xf32>
    %182 = arith.divf %180, %181 : vector<32x1xf32>
    %cst_53 = arith.constant dense<0xFF800000> : vector<32xf32>
    %183 = vector.multi_reduction <maximumf>, %176, %cst_53 [1] : vector<32x64xf32> to vector<32xf32>
    %184 = vector.shape_cast %183 : vector<32xf32> to vector<32x1xf32>
    %185 = tpu.concatenate %182, %184 in 1 : vector<32x1xf32>, vector<32x1xf32> -> vector<32x2xf32>
    %186 = vector.extract_strided_slice %177 {offsets = [0, 0], sizes = [2, 32], strides = [1, 1]} : vector<2x33xf32> to vector<2x32xf32>
    %cst_54 = arith.constant dense<0.000000e+00> : vector<2x2xf32>
    %187 = tpu.matmul %186, %185, %cst_54 {dimension_numbers = #tpu.dot_dimension_numbers<[1], [0], [0], [1], [0, 0, 1, 1], [], []>} : vector<2x32xf32>, vector<32x2xf32>, vector<2x2xf32> -> vector<2x2xf32>
    %188 = vector.extract_strided_slice %177 {offsets = [0, 32], sizes = [2, 1], strides = [1, 1]} : vector<2x33xf32> to vector<2x1xf32>
    %189 = vector.broadcast %188 : vector<2x1xf32> to vector<2x2xf32>
    %190 = arith.addf %187, %189 : vector<2x2xf32>
    %cst_55 = arith.constant 0.000000e+00 : f32
    %191 = vector.broadcast %cst_55 : f32 to vector<2x2xf32>
    %192 = arith.maximumf %190, %191 : vector<2x2xf32>
    %193 = vector.extract_strided_slice %178 {offsets = [0, 0], sizes = [32, 2], strides = [1, 1]} : vector<32x3xf32> to vector<32x2xf32>
    %cst_56 = arith.constant dense<0.000000e+00> : vector<32x2xf32>
    %194 = tpu.matmul %193, %192, %cst_56 {dimension_numbers = #tpu.dot_dimension_numbers<[1], [0], [0], [1], [0, 0, 1, 1], [], []>} : vector<32x2xf32>, vector<2x2xf32>, vector<32x2xf32> -> vector<32x2xf32>
    %195 = vector.extract_strided_slice %178 {offsets = [0, 2], sizes = [32, 1], strides = [1, 1]} : vector<32x3xf32> to vector<32x1xf32>
    %196 = vector.broadcast %195 : vector<32x1xf32> to vector<32x2xf32>
    %197 = arith.addf %194, %196 : vector<32x2xf32>
    %198 = vector.extract_strided_slice %197 {offsets = [0, 0], sizes = [32, 1], strides = [1, 1]} : vector<32x2xf32> to vector<32x1xf32>
    %199 = vector.extract_strided_slice %197 {offsets = [0, 1], sizes = [32, 1], strides = [1, 1]} : vector<32x2xf32> to vector<32x1xf32>
    %200 = arith.addf %198, %199 : vector<32x1xf32>
    %201 = arith.negf %200 : vector<32x1xf32>
    %202 = math.exp %201 : vector<32x1xf32>
    %cst_57 = arith.constant 1.000000e+00 : f32
    %203 = vector.broadcast %cst_57 : f32 to vector<32x1xf32>
    %204 = arith.addf %203, %202 : vector<32x1xf32>
    %205 = arith.divf %203, %204 : vector<32x1xf32>
    %206 = vector.broadcast %205 : vector<32x1xf32> to vector<32x64xf32>
    %207 = arith.mulf %176, %206 : vector<32x64xf32>
    %cst_58 = arith.constant dense<0.000000e+00> : vector<64xf32>
    %208 = vector.multi_reduction <add>, %207, %cst_58 [0] : vector<32x64xf32> to vector<64xf32>
    %209 = vector.shape_cast %208 : vector<64xf32> to vector<1x64xf32>
    %cst_59 = arith.constant 3.200000e+01 : f32
    %210 = vector.broadcast %cst_59 : f32 to vector<1x64xf32>
    %211 = arith.divf %209, %210 : vector<1x64xf32>
    %cst_60 = arith.constant dense<0xFF800000> : vector<64xf32>
    %212 = vector.multi_reduction <maximumf>, %207, %cst_60 [0] : vector<32x64xf32> to vector<64xf32>
    %213 = vector.shape_cast %212 : vector<64xf32> to vector<1x64xf32>
    %214 = tpu.concatenate %211, %213 in 1 : vector<1x64xf32>, vector<1x64xf32> -> vector<1x128xf32>
    %c0_61 = arith.constant 0 : index
    %c0_62 = arith.constant 0 : index
    %215 = vector.load %arg13[%c0_61, %c0_62] : memref<128x64xf32, #tpu.memory_space<vmem>>, vector<128x64xf32>
    %cst_63 = arith.constant dense<0.000000e+00> : vector<1x64xf32>
    %216 = tpu.matmul %214, %215, %cst_63 {dimension_numbers = #tpu.dot_dimension_numbers<[1], [0], [0], [1], [0, 0, 1, 1], [], []>} : vector<1x128xf32>, vector<128x64xf32>, vector<1x64xf32> -> vector<1x64xf32>
    %c1 = arith.constant 1 : index
    %217 = memref.load %arg16[%c1] : memref<2xf32, #tpu.memory_space<smem>>
    %218 = vector.broadcast %217 : f32 to vector<1x64xf32>
    %219 = arith.addf %216, %218 : vector<1x64xf32>
    %220 = arith.negf %219 : vector<1x64xf32>
    %221 = math.exp %220 : vector<1x64xf32>
    %cst_64 = arith.constant 1.000000e+00 : f32
    %222 = vector.broadcast %cst_64 : f32 to vector<1x64xf32>
    %223 = arith.addf %222, %221 : vector<1x64xf32>
    %224 = arith.divf %222, %223 : vector<1x64xf32>
    %225 = vector.broadcast %224 : vector<1x64xf32> to vector<32x64xf32>
    %226 = arith.mulf %207, %225 : vector<32x64xf32>
    %c0_65 = arith.constant 0 : index
    %c0_66 = arith.constant 0 : index
    %c0_67 = arith.constant 0 : index
    %227 = vector.load %arg14[%c0_65, %c0_66, %c0_67] : memref<9x8x32xf32, #tpu.memory_space<vmem>>, vector<1x8x32xf32>
    %228 = vector.shape_cast %227 : vector<1x8x32xf32> to vector<8x32xf32>
    %cst_68 = arith.constant dense<0.000000e+00> : vector<8x64xf32>
    %229 = tpu.matmul %228, %226, %cst_68 {dimension_numbers = #tpu.dot_dimension_numbers<[1], [0], [0], [1], [0, 0, 1, 1], [], []>} : vector<8x32xf32>, vector<32x64xf32>, vector<8x64xf32> -> vector<8x64xf32>
    %c0_69 = arith.constant 0 : index
    %c0_70 = arith.constant 0 : index
    %c0_71 = arith.constant 0 : index
    %230 = vector.load %arg15[%c0_69, %c0_70, %c0_71] : memref<9x64x36xf32, #tpu.memory_space<vmem>>, vector<1x64x36xf32>
    %231 = vector.shape_cast %230 : vector<1x64x36xf32> to vector<64x36xf32>
    %cst_72 = arith.constant dense<0.000000e+00> : vector<8x36xf32>
    %232 = tpu.matmul %229, %231, %cst_72 {dimension_numbers = #tpu.dot_dimension_numbers<[1], [0], [0], [1], [0, 0, 1, 1], [], []>} : vector<8x64xf32>, vector<64x36xf32>, vector<8x36xf32> -> vector<8x36xf32>
    %c1_73 = arith.constant 1 : index
    %c0_74 = arith.constant 0 : index
    %c0_75 = arith.constant 0 : index
    %233 = vector.load %arg14[%c1_73, %c0_74, %c0_75] : memref<9x8x32xf32, #tpu.memory_space<vmem>>, vector<1x8x32xf32>
    %234 = vector.shape_cast %233 : vector<1x8x32xf32> to vector<8x32xf32>
    %cst_76 = arith.constant dense<0.000000e+00> : vector<8x64xf32>
    %235 = tpu.matmul %234, %226, %cst_76 {dimension_numbers = #tpu.dot_dimension_numbers<[1], [0], [0], [1], [0, 0, 1, 1], [], []>} : vector<8x32xf32>, vector<32x64xf32>, vector<8x64xf32> -> vector<8x64xf32>
    %c1_77 = arith.constant 1 : index
    %c0_78 = arith.constant 0 : index
    %c0_79 = arith.constant 0 : index
    %236 = vector.load %arg15[%c1_77, %c0_78, %c0_79] : memref<9x64x36xf32, #tpu.memory_space<vmem>>, vector<1x64x36xf32>
    %237 = vector.shape_cast %236 : vector<1x64x36xf32> to vector<64x36xf32>
    %cst_80 = arith.constant dense<0.000000e+00> : vector<8x36xf32>
    %238 = tpu.matmul %235, %237, %cst_80 {dimension_numbers = #tpu.dot_dimension_numbers<[1], [0], [0], [1], [0, 0, 1, 1], [], []>} : vector<8x64xf32>, vector<64x36xf32>, vector<8x36xf32> -> vector<8x36xf32>
    %239 = arith.addf %232, %238 : vector<8x36xf32>
    %c2 = arith.constant 2 : index
    %c0_81 = arith.constant 0 : index
    %c0_82 = arith.constant 0 : index
    %240 = vector.load %arg14[%c2, %c0_81, %c0_82] : memref<9x8x32xf32, #tpu.memory_space<vmem>>, vector<1x8x32xf32>
    %241 = vector.shape_cast %240 : vector<1x8x32xf32> to vector<8x32xf32>
    %cst_83 = arith.constant dense<0.000000e+00> : vector<8x64xf32>
    %242 = tpu.matmul %241, %226, %cst_83 {dimension_numbers = #tpu.dot_dimension_numbers<[1], [0], [0], [1], [0, 0, 1, 1], [], []>} : vector<8x32xf32>, vector<32x64xf32>, vector<8x64xf32> -> vector<8x64xf32>
    %c2_84 = arith.constant 2 : index
    %c0_85 = arith.constant 0 : index
    %c0_86 = arith.constant 0 : index
    %243 = vector.load %arg15[%c2_84, %c0_85, %c0_86] : memref<9x64x36xf32, #tpu.memory_space<vmem>>, vector<1x64x36xf32>
    %244 = vector.shape_cast %243 : vector<1x64x36xf32> to vector<64x36xf32>
    %cst_87 = arith.constant dense<0.000000e+00> : vector<8x36xf32>
    %245 = tpu.matmul %242, %244, %cst_87 {dimension_numbers = #tpu.dot_dimension_numbers<[1], [0], [0], [1], [0, 0, 1, 1], [], []>} : vector<8x64xf32>, vector<64x36xf32>, vector<8x36xf32> -> vector<8x36xf32>
    %246 = arith.addf %239, %245 : vector<8x36xf32>
    %c3 = arith.constant 3 : index
    %c0_88 = arith.constant 0 : index
    %c0_89 = arith.constant 0 : index
    %247 = vector.load %arg14[%c3, %c0_88, %c0_89] : memref<9x8x32xf32, #tpu.memory_space<vmem>>, vector<1x8x32xf32>
    %248 = vector.shape_cast %247 : vector<1x8x32xf32> to vector<8x32xf32>
    %cst_90 = arith.constant dense<0.000000e+00> : vector<8x64xf32>
    %249 = tpu.matmul %248, %226, %cst_90 {dimension_numbers = #tpu.dot_dimension_numbers<[1], [0], [0], [1], [0, 0, 1, 1], [], []>} : vector<8x32xf32>, vector<32x64xf32>, vector<8x64xf32> -> vector<8x64xf32>
    %c3_91 = arith.constant 3 : index
    %c0_92 = arith.constant 0 : index
    %c0_93 = arith.constant 0 : index
    %250 = vector.load %arg15[%c3_91, %c0_92, %c0_93] : memref<9x64x36xf32, #tpu.memory_space<vmem>>, vector<1x64x36xf32>
    %251 = vector.shape_cast %250 : vector<1x64x36xf32> to vector<64x36xf32>
    %cst_94 = arith.constant dense<0.000000e+00> : vector<8x36xf32>
    %252 = tpu.matmul %249, %251, %cst_94 {dimension_numbers = #tpu.dot_dimension_numbers<[1], [0], [0], [1], [0, 0, 1, 1], [], []>} : vector<8x64xf32>, vector<64x36xf32>, vector<8x36xf32> -> vector<8x36xf32>
    %253 = arith.addf %246, %252 : vector<8x36xf32>
    %c4 = arith.constant 4 : index
    %c0_95 = arith.constant 0 : index
    %c0_96 = arith.constant 0 : index
    %254 = vector.load %arg14[%c4, %c0_95, %c0_96] : memref<9x8x32xf32, #tpu.memory_space<vmem>>, vector<1x8x32xf32>
    %255 = vector.shape_cast %254 : vector<1x8x32xf32> to vector<8x32xf32>
    %cst_97 = arith.constant dense<0.000000e+00> : vector<8x64xf32>
    %256 = tpu.matmul %255, %226, %cst_97 {dimension_numbers = #tpu.dot_dimension_numbers<[1], [0], [0], [1], [0, 0, 1, 1], [], []>} : vector<8x32xf32>, vector<32x64xf32>, vector<8x64xf32> -> vector<8x64xf32>
    %c4_98 = arith.constant 4 : index
    %c0_99 = arith.constant 0 : index
    %c0_100 = arith.constant 0 : index
    %257 = vector.load %arg15[%c4_98, %c0_99, %c0_100] : memref<9x64x36xf32, #tpu.memory_space<vmem>>, vector<1x64x36xf32>
    %258 = vector.shape_cast %257 : vector<1x64x36xf32> to vector<64x36xf32>
    %cst_101 = arith.constant dense<0.000000e+00> : vector<8x36xf32>
    %259 = tpu.matmul %256, %258, %cst_101 {dimension_numbers = #tpu.dot_dimension_numbers<[1], [0], [0], [1], [0, 0, 1, 1], [], []>} : vector<8x64xf32>, vector<64x36xf32>, vector<8x36xf32> -> vector<8x36xf32>
    %260 = arith.addf %253, %259 : vector<8x36xf32>
    %c5 = arith.constant 5 : index
    %c0_102 = arith.constant 0 : index
    %c0_103 = arith.constant 0 : index
    %261 = vector.load %arg14[%c5, %c0_102, %c0_103] : memref<9x8x32xf32, #tpu.memory_space<vmem>>, vector<1x8x32xf32>
    %262 = vector.shape_cast %261 : vector<1x8x32xf32> to vector<8x32xf32>
    %cst_104 = arith.constant dense<0.000000e+00> : vector<8x64xf32>
    %263 = tpu.matmul %262, %226, %cst_104 {dimension_numbers = #tpu.dot_dimension_numbers<[1], [0], [0], [1], [0, 0, 1, 1], [], []>} : vector<8x32xf32>, vector<32x64xf32>, vector<8x64xf32> -> vector<8x64xf32>
    %c5_105 = arith.constant 5 : index
    %c0_106 = arith.constant 0 : index
    %c0_107 = arith.constant 0 : index
    %264 = vector.load %arg15[%c5_105, %c0_106, %c0_107] : memref<9x64x36xf32, #tpu.memory_space<vmem>>, vector<1x64x36xf32>
    %265 = vector.shape_cast %264 : vector<1x64x36xf32> to vector<64x36xf32>
    %cst_108 = arith.constant dense<0.000000e+00> : vector<8x36xf32>
    %266 = tpu.matmul %263, %265, %cst_108 {dimension_numbers = #tpu.dot_dimension_numbers<[1], [0], [0], [1], [0, 0, 1, 1], [], []>} : vector<8x64xf32>, vector<64x36xf32>, vector<8x36xf32> -> vector<8x36xf32>
    %267 = arith.addf %260, %266 : vector<8x36xf32>
    %c6 = arith.constant 6 : index
    %c0_109 = arith.constant 0 : index
    %c0_110 = arith.constant 0 : index
    %268 = vector.load %arg14[%c6, %c0_109, %c0_110] : memref<9x8x32xf32, #tpu.memory_space<vmem>>, vector<1x8x32xf32>
    %269 = vector.shape_cast %268 : vector<1x8x32xf32> to vector<8x32xf32>
    %cst_111 = arith.constant dense<0.000000e+00> : vector<8x64xf32>
    %270 = tpu.matmul %269, %226, %cst_111 {dimension_numbers = #tpu.dot_dimension_numbers<[1], [0], [0], [1], [0, 0, 1, 1], [], []>} : vector<8x32xf32>, vector<32x64xf32>, vector<8x64xf32> -> vector<8x64xf32>
    %c6_112 = arith.constant 6 : index
    %c0_113 = arith.constant 0 : index
    %c0_114 = arith.constant 0 : index
    %271 = vector.load %arg15[%c6_112, %c0_113, %c0_114] : memref<9x64x36xf32, #tpu.memory_space<vmem>>, vector<1x64x36xf32>
    %272 = vector.shape_cast %271 : vector<1x64x36xf32> to vector<64x36xf32>
    %cst_115 = arith.constant dense<0.000000e+00> : vector<8x36xf32>
    %273 = tpu.matmul %270, %272, %cst_115 {dimension_numbers = #tpu.dot_dimension_numbers<[1], [0], [0], [1], [0, 0, 1, 1], [], []>} : vector<8x64xf32>, vector<64x36xf32>, vector<8x36xf32> -> vector<8x36xf32>
    %274 = arith.addf %267, %273 : vector<8x36xf32>
    %c7 = arith.constant 7 : index
    %c0_116 = arith.constant 0 : index
    %c0_117 = arith.constant 0 : index
    %275 = vector.load %arg14[%c7, %c0_116, %c0_117] : memref<9x8x32xf32, #tpu.memory_space<vmem>>, vector<1x8x32xf32>
    %276 = vector.shape_cast %275 : vector<1x8x32xf32> to vector<8x32xf32>
    %cst_118 = arith.constant dense<0.000000e+00> : vector<8x64xf32>
    %277 = tpu.matmul %276, %226, %cst_118 {dimension_numbers = #tpu.dot_dimension_numbers<[1], [0], [0], [1], [0, 0, 1, 1], [], []>} : vector<8x32xf32>, vector<32x64xf32>, vector<8x64xf32> -> vector<8x64xf32>
    %c7_119 = arith.constant 7 : index
    %c0_120 = arith.constant 0 : index
    %c0_121 = arith.constant 0 : index
    %278 = vector.load %arg15[%c7_119, %c0_120, %c0_121] : memref<9x64x36xf32, #tpu.memory_space<vmem>>, vector<1x64x36xf32>
    %279 = vector.shape_cast %278 : vector<1x64x36xf32> to vector<64x36xf32>
    %cst_122 = arith.constant dense<0.000000e+00> : vector<8x36xf32>
    %280 = tpu.matmul %277, %279, %cst_122 {dimension_numbers = #tpu.dot_dimension_numbers<[1], [0], [0], [1], [0, 0, 1, 1], [], []>} : vector<8x64xf32>, vector<64x36xf32>, vector<8x36xf32> -> vector<8x36xf32>
    %281 = arith.addf %274, %280 : vector<8x36xf32>
    %c8 = arith.constant 8 : index
    %c0_123 = arith.constant 0 : index
    %c0_124 = arith.constant 0 : index
    %282 = vector.load %arg14[%c8, %c0_123, %c0_124] : memref<9x8x32xf32, #tpu.memory_space<vmem>>, vector<1x8x32xf32>
    %283 = vector.shape_cast %282 : vector<1x8x32xf32> to vector<8x32xf32>
    %cst_125 = arith.constant dense<0.000000e+00> : vector<8x64xf32>
    %284 = tpu.matmul %283, %226, %cst_125 {dimension_numbers = #tpu.dot_dimension_numbers<[1], [0], [0], [1], [0, 0, 1, 1], [], []>} : vector<8x32xf32>, vector<32x64xf32>, vector<8x64xf32> -> vector<8x64xf32>
    %c8_126 = arith.constant 8 : index
    %c0_127 = arith.constant 0 : index
    %c0_128 = arith.constant 0 : index
    %285 = vector.load %arg15[%c8_126, %c0_127, %c0_128] : memref<9x64x36xf32, #tpu.memory_space<vmem>>, vector<1x64x36xf32>
    %286 = vector.shape_cast %285 : vector<1x64x36xf32> to vector<64x36xf32>
    %cst_129 = arith.constant dense<0.000000e+00> : vector<8x36xf32>
    %287 = tpu.matmul %284, %286, %cst_129 {dimension_numbers = #tpu.dot_dimension_numbers<[1], [0], [0], [1], [0, 0, 1, 1], [], []>} : vector<8x64xf32>, vector<64x36xf32>, vector<8x36xf32> -> vector<8x36xf32>
    %288 = arith.addf %281, %287 : vector<8x36xf32>
    %c0_130 = arith.constant 0 : index
    %c0_131 = arith.constant 0 : index
    %c0_132 = arith.constant 0 : index
    %289 = vector.load %arg17[%c0_130, %c0_131, %c0_132] : memref<1x8x36xf32, #tpu.memory_space<vmem>>, vector<1x8x36xf32>
    %290 = vector.shape_cast %289 : vector<1x8x36xf32> to vector<8x36xf32>
    %291 = vector.shape_cast %288 : vector<8x36xf32> to vector<1x8x36xf32>
    tpu.vector_store %arg17[%c0_130, %c0_131, %c0_132], %291 {strides = array<i32>} : memref<1x8x36xf32, #tpu.memory_space<vmem>>, vector<1x8x36xf32>,
    return
  }
  func.func @transform_0(%arg0: i32) -> (i32, i32, i32) {
    %c0_i32 = arith.constant 0 : i32
    %c0_i32_0 = arith.constant 0 : i32
    %c0_i32_1 = arith.constant 0 : i32
    return %arg0, %c0_i32, %c0_i32_0 : i32, i32, i32
  }
  func.func @transform_1(%arg0: i32) -> (i32, i32) {
    %c0_i32 = arith.constant 0 : i32
    %c0_i32_0 = arith.constant 0 : i32
    %c0_i32_1 = arith.constant 0 : i32
    return %c0_i32, %c0_i32_0 : i32, i32
  }
  func.func @transform_2(%arg0: i32) -> (i32, i32) {
    %c0_i32 = arith.constant 0 : i32
    %c0_i32_0 = arith.constant 0 : i32
    %c0_i32_1 = arith.constant 0 : i32
    return %c0_i32, %c0_i32_0 : i32, i32
  }
  func.func @transform_3(%arg0: i32) -> (i32, i32) {
    %c0_i32 = arith.constant 0 : i32
    %c0_i32_0 = arith.constant 0 : i32
    %c0_i32_1 = arith.constant 0 : i32
    return %c0_i32, %c0_i32_0 : i32, i32
  }
  func.func @transform_4(%arg0: i32) -> (i32, i32) {
    %c0_i32 = arith.constant 0 : i32
    %c0_i32_0 = arith.constant 0 : i32
    %c0_i32_1 = arith.constant 0 : i32
    return %c0_i32, %c0_i32_0 : i32, i32
  }
  func.func @transform_5(%arg0: i32) -> (i32, i32) {
    %c0_i32 = arith.constant 0 : i32
    %c0_i32_0 = arith.constant 0 : i32
    %c0_i32_1 = arith.constant 0 : i32
    return %c0_i32, %c0_i32_0 : i32, i32
  }
  func.func @transform_6(%arg0: i32) -> (i32, i32) {
    %c0_i32 = arith.constant 0 : i32
    %c0_i32_0 = arith.constant 0 : i32
    %c0_i32_1 = arith.constant 0 : i32
    return %c0_i32, %c0_i32_0 : i32, i32
  }
  func.func @transform_7(%arg0: i32) -> (i32, i32) {
    %c0_i32 = arith.constant 0 : i32
    %c0_i32_0 = arith.constant 0 : i32
    %c0_i32_1 = arith.constant 0 : i32
    return %c0_i32, %c0_i32_0 : i32, i32
  }
  func.func @transform_8(%arg0: i32) -> (i32, i32) {
    %c0_i32 = arith.constant 0 : i32
    %c0_i32_0 = arith.constant 0 : i32
    %c0_i32_1 = arith.constant 0 : i32
    return %c0_i32, %c0_i32_0 : i32, i32
  }
  func.func @transform_9(%arg0: i32) -> (i32, i32) {
    %c0_i32 = arith.constant 0 : i32
    %c0_i32_0 = arith.constant 0 : i32
    %c0_i32_1 = arith.constant 0 : i32
    return %c0_i32, %c0_i32_0 : i32, i32
  }
  func.func @transform_10(%arg0: i32) -> (i32, i32) {
    %c0_i32 = arith.constant 0 : i32
    %c0_i32_0 = arith.constant 0 : i32
    %c0_i32_1 = arith.constant 0 : i32
    return %c0_i32, %c0_i32_0 : i32, i32
  }
  func.func @transform_11(%arg0: i32) -> (i32, i32) {
    %c0_i32 = arith.constant 0 : i32
    %c0_i32_0 = arith.constant 0 : i32
    %c0_i32_1 = arith.constant 0 : i32
    return %c0_i32, %c0_i32_0 : i32, i32
  }
  func.func @transform_12(%arg0: i32) -> (i32, i32) {
    %c0_i32 = arith.constant 0 : i32
    %c0_i32_0 = arith.constant 0 : i32
    %c0_i32_1 = arith.constant 0 : i32
    return %c0_i32, %c0_i32_0 : i32, i32
  }
  func.func @transform_13(%arg0: i32) -> (i32, i32, i32) {
    %c0_i32 = arith.constant 0 : i32
    %c0_i32_0 = arith.constant 0 : i32
    %c0_i32_1 = arith.constant 0 : i32
    %c0_i32_2 = arith.constant 0 : i32
    return %c0_i32, %c0_i32_0, %c0_i32_1 : i32, i32, i32
  }
  func.func @transform_14(%arg0: i32) -> (i32, i32, i32) {
    %c0_i32 = arith.constant 0 : i32
    %c0_i32_0 = arith.constant 0 : i32
    %c0_i32_1 = arith.constant 0 : i32
    %c0_i32_2 = arith.constant 0 : i32
    return %c0_i32, %c0_i32_0, %c0_i32_1 : i32, i32, i32
  }
  func.func @transform_15(%arg0: i32) -> i32 {
    %c0_i32 = arith.constant 0 : i32
    %c0_i32_0 = arith.constant 0 : i32
    return %c0_i32 : i32
  }
  func.func @transform_16(%arg0: i32) -> (i32, i32, i32) {
    %c0_i32 = arith.constant 0 : i32
    %c0_i32_0 = arith.constant 0 : i32
    %c0_i32_1 = arith.constant 0 : i32
    return %arg0, %c0_i32, %c0_i32_0 : i32, i32, i32
  }
}

</mosaic_0001>

<bundles_post_ra>
// kernel: squeeze.16
= control target key start
LH: loop header
LB: loop body
LE: loop exit
PB: predicated region body
PF: predicated region fallthrough
CT: control target
= control target key end

     0   :  { %s59_s10 = smov 42   ;;  %s60_s11 = smov 28   ;;  %vm3_vm0 = vcmask 56320   ;;  %vm9_vm1 = vcmask 400720   ;;  %vm15_vm2 = vcmask 343320   ;;  %vm21_vm3 = vcmask 285920   ;;  %s99_s0 = inlined_call_operand.vmem [shape: f32[7,7], index: 0, kind: input, shape index: {}]   ;;  %s100_s1 = inlined_call_operand.vmem [shape: f32[49], index: 1, kind: output, shape index: {}]  }
   0x1   :  { %v47_v0 = vld [vmem:[%s99_s0 + $0x6] sm:$0x1]   ;;  %v49_v1 = vld [vmem:[%s99_s0 + $0x4] sm:$0x1]   ;;  %v48_v2 = vld [vmem:[%s99_s0 + $0x5] sm:$0x1]  }
   0x2   :  { %7 = vrot.lane.b32.xlu0 %v47_v0, %s59_s10  ;;  %19 = vrot.lane.b32.xlu1 %v49_v1, %s60_s11  ;;  %v50_v3 = vld [vmem:[%s99_s0 + $0x3] sm:$0x1]   ;;  %v2_v4 = vld [vmem:[%s99_s0] sm:$0x1]   ;;  %s61_s18 = smov 35   ;;  %s62_s19 = smov 21  }
   0x3   :  { %4 = vst.msk [vmem:[#allocation0] sm:$0x1] %vm3_vm0, %v2_v4   ;;  %v51_v5 = vld [vmem:[%s99_s0 + $0x2] sm:$0x1]   ;;  %v52_v6 = vld [vmem:[%s99_s0 + $0x1] sm:$0x1]  }
   0x4   :  { %s63_s0 = smov 14   ;;  %s64_s24 = smov 7   ;;  %vm27_vm4 = vcmask 228520   ;;  %vm33_vm5 = vcmask 171120   ;;  %vm39_vm6 = vcmask 113720  }
   0x6   :  { %13 = vrot.lane.b32.xlu0 %v48_v2, %s61_s18  ;;  %25 = vrot.lane.b32.xlu1 %v50_v3, %s62_s19 }
   0xa   :  { %31 = vrot.lane.b32.xlu0 %v51_v5, %s63_s0  ;;  %37 = vrot.lane.b32.xlu1 %v52_v6, %s64_s24 }
  0x74   :  { %v8_v7 = vpop.permute.xlu0 %7   ;;  %v20_v8 = vpop.permute.xlu1 %19  }
  0x75   :  { %10 = vst.msk [vmem:[#allocation0] sm:$0x1] %vm9_vm1, %v8_v7  }
  0x78   :  { %v14_v9 = vpop.permute.xlu0 %13   ;;  %v26_v10 = vpop.permute.xlu1 %25  }
  0x79   :  { %16 = vst.msk [vmem:[#allocation0] sm:$0x1] %vm15_vm2, %v14_v9  }
  0x7a   :  { %22 = vst.msk [vmem:[#allocation0] sm:$0x1] %vm21_vm3, %v20_v8  }
  0x7b   :  { %28 = vst.msk [vmem:[#allocation0] sm:$0x1] %vm27_vm4, %v26_v10  }
  0x7c   :  { %v32_v11 = vpop.permute.xlu0 %31   ;;  %v38_v12 = vpop.permute.xlu1 %37  }
  0x7d   :  { %34 = vst.msk [vmem:[#allocation0] sm:$0x1] %vm33_vm5, %v32_v11  }
  0x7e   :  { %40 = vst.msk [vmem:[#allocation0] sm:$0x1] %vm39_vm6, %v38_v12  }
  0x85   :  { %v44_v13 = vld [vmem:[#allocation0] sm:$0x1] }
  0x86   :  { %46 = vst [vmem:[%s100_s1] sm:$0x1] %v44_v13 }

// kernel: encoder_forward.1
= control target key start
LH: loop header
LB: loop body
LE: loop exit
PB: predicated region body
PF: predicated region fallthrough
CT: control target
= control target key end

     0   :  { %s7042_s0 = inlined_call_operand.vmem [shape: f32[2,8,256], index: 0, kind: input, shape index: {}]   ;;  %s7043_s1 = inlined_call_operand.vmem [shape: f32[16,72], index: 1, kind: input, shape index: {}]   ;;  %s7044_s2 = inlined_call_operand.vmem [shape: f32[9,256], index: 2, kind: input, shape index: {}]   ;;  %s7045_s3 = inlined_call_operand.vmem [shape: f32[1,17], index: 3, kind: input, shape index: {}]   ;;  %s7046_s4 = inlined_call_operand.vmem [shape: f32[16,2], index: 4, kind: input, shape index: {}]   ;;  %s7047_s5 = inlined_call_operand.vmem [shape: f32[512,256], index: 5, kind: input, shape index: {}]   ;;  %s7048_s6 = inlined_call_operand.vmem [shape: f32[32,256], index: 6, kind: input, shape index: {}]   ;;  %s7049_s7 = inlined_call_operand.vmem [shape: f32[16,256], index: 7, kind: input, shape index: {}]   ;;  %s7050_s8 = inlined_call_operand.vmem [shape: f32[256,64], index: 8, kind: input, shape index: {}]   ;;  %s7051_s9 = inlined_call_operand.vmem [shape: f32[32,2], index: 9, kind: input, shape index: {}]   ;;  %s7052_s10 = inlined_call_operand.vmem [shape: f32[2,33], index: 10, kind: input, shape index: {}]   ;;  %s7053_s11 = inlined_call_operand.vmem [shape: f32[32,3], index: 11, kind: input, shape index: {}]   ;;  %s7054_s12 = inlined_call_operand.vmem [shape: f32[128,64], index: 12, kind: input, shape index: {}]   ;;  %s7055_s13 = inlined_call_operand.vmem [shape: f32[9,8,32], index: 13, kind: input, shape index: {}]   ;;  %s7056_s14 = inlined_call_operand.vmem [shape: f32[9,64,36], index: 14, kind: input, shape index: {}]   ;;  %s7057_s15 = inlined_call_operand.vmem [shape: f32[2], index: 15, kind: input, shape index: {}]   ;;  %s7058_s16 = inlined_call_operand.vmem [shape: f32[2,8,36], index: 16, kind: output, shape index: {}]  }
   0x1   :  { %7071 = sst [smem:[#allocation5_spill]] %s7042_s0 }
   0x2   :  { %21 = vsyncpa [#allocation3], 0  ;;  %s5397_s21 = smov 0  }
   0x3 LB: > { %s4063_s22 = sadd.s32 4294967295, %s5285_s21   ;;  %p4065_p0 = scmp.ge.s32.totalorder %s5285_s21, 1  ;;  %s5285_s21 = sphi %s5397_s21, %s27_s21  }
   0x4   : > { %p399_p1 = scmp.lt.s32.totalorder %s5285_s21, 3  ;;  %s454_s25 = sshll.u32 %s7057_s15, 4  ;;  %s455_s25 = int_to_ptr.vmem [resolvable:$true] %s454_s25 }
   0x5   : > { %p5176_p3 = scmp.eq.s32.totalorder %s4063_s22, 0  ;;  %s5260_s27 = scalar_lea.vmem %s455_s25, 16 }
   0x6   : > { %p5408_p2 = pnand %p4065_p0, %p399_p1  ;;  %p5261_p6 = scmp.ne.s32.totalorder %s455_s25, %s5260_s27 }
   0x7   : > { %p5268_p10 = scmp.lt.s32.totalorder %s455_s25, %s455_s25  ;;  %p5269_p11 = scmp.lt.s32.totalorder %s5260_s27, %s5260_s27 }
   0x8   : > { %p5172_p4 = pneg %p5408_p2 }
   0x9   : > { %p5270_p12 = por %p5269_p11, %p5268_p10 }
   0xa   : > { %p5173_p5 = pnand %p5176_p3, %p5172_p4 }
   0xc   : > { %p5262_p7 = pneg %p5173_p5 }
   0xe   : > { %p5263_p8 = pnand %p5262_p7, %p5261_p6 }
  0x10   : > { %p5264_p9 = pneg %p5263_p8 }
  0x12   : > { %p5271_p13 = pnand %p5270_p12, %p5264_p9 }
  0x14   : > { %5274 = shalt.err (!%p5271_p13)
}
  0x15   : > { %s5287_s28 = smov [#allocation2]   ;;  %475 = sbr.rel (%p5408_p2) target bundleno = 4114 (0x1012), region = 84 }
  0x16   : > { %5175 = dma.vmem_to_smem (!%p5173_p5), %s455_s25, 16, %s5287_s28, [#allocation3]  }
  0x1c   : > { %5280 = dma.done.wait (%p5176_p3), [#allocation3], 16  }
  0x1d   : > { %5282 = vsyncadd (%p5176_p3), [#allocation3], 4294967280 }
  0x1e   : > { %481 = sfence }
  0x1f   : > { %p525_p0 = scmp.lt.s32.totalorder %s4063_s22, 1  ;;  %s7073_s17 = sld [smem:[#allocation5_spill]]  ;;  %v5294_v2 = vmov 0.0   ;;  %v544_v3 = vlaneseq  ;;  %v5475_v8 = vld [vmem:[%s7044_s2] sm:$0xff]  ;;  %v5480_v9 = vld [vmem:[%s7044_s2 + $0x8] sm:$0xff]  ;;  %vm690_vm8 = vcmask 588800  }
  0x20   : > { %s5288_s19 = smov 16   ;;  %s5289_s20 = smov 17   ;;  %761 = vmatprep.mubr.f32.mxu0 %v5294_v2  ;;  %vm5298_vm13 = vmmov 0   ;;  %vm804_vm14 = vcmask 7168   ;;  %vm816_vm15 = vcmask 130048  }
  0x21   : > { %s7081_s22 = smov (!%p525_p0, %s4063_s22), 1  ;;  %s7069_s23 = smov 15   ;;  %v5462_v4 = vshrl.u32 %v544_v3, 7  ;;  %v5464_v5 = vand.u32 127, %v544_v3 }
  0x22   : > { %s4189_s29 = sshll.u32 %s7081_s22, 4  ;;  %s7067_s24 = smov 1  }
  0x23   : > { %s7065_s25 = smov 127   ;;  %s7063_s26 = smov 113   ;;  %v5467_v6 = vsub.s32 0, %v5462_v4  ;;  %v5470_v7 = vsub.s32 1, %v5462_v4  ;;  %vm563_vm0 = vcmp.lt.s32.totalorder %v5464_v5, 16  ;;  %vm546_vm1 = vcmp.lt.s32.totalorder %v5464_v5, 17 }
  0x24   : > { %s7061_s27 = smov 112   ;;  %s7059_s28 = smov 111   ;;  %v5493_v18 = vsub.s32 2, %v5462_v4  ;;  %v5496_v19 = vsub.s32 3, %v5462_v4  ;;  %vm580_vm2 = vcmp.lt.s32.totalorder %v5464_v5, 15  ;;  %v5508_v32 = vsub.s32 4, %v5462_v4 }
  0x25   : > { %s529_s18 = scalar_lea.vmem %s7073_s17, %s4189_s29  ;;  %v556_v12 = vrot.slane %v5480_v9, %v5467_v6  ;;  %v573_v13 = vrot.slane %v5480_v9, %v5470_v7  ;;  %v552_v14 = vrot.slane %v5475_v8, %v5467_v6  ;;  %v569_v15 = vrot.slane %v5475_v8, %v5470_v7  ;;  %s7074_s29 = smov 15  }
  0x26   : > { %v5425_v0 = vld [vmem:[%s529_s18] sm:$0xff]  ;;  %v5431_v1 = vld [vmem:[%s529_s18 + $0x8] sm:$0xff]  ;;  %vm597_vm3 = vcmp.lt.s32.totalorder %v5464_v5, 1  ;;  %v5512_v33 = vsub.s32 5, %v5462_v4  ;;  %v586_v34 = vrot.slane %v5475_v8, %v5493_v18  ;;  %v590_v35 = vrot.slane %v5480_v9, %v5493_v18  ;;  %s5303_s30 = smov 126   ;;  %s5305_s0 = smov 97  }
  0x27   : > { %559 = vrot.lane.b32.xlu1 %v5425_v0, %s5288_s19  ;;  %540 = vrot.lane.b32.xlu0 %v5425_v0, %s5289_s20  ;;  %v603_v36 = vrot.slane %v5475_v8, %v5496_v19  ;;  %v607_v37 = vrot.slane %v5480_v9, %v5496_v19  ;;  %vm624_vm4 = vcmp.lt.s32.totalorder %v5464_v5, 127  ;;  %v617_v42 = vrot.slane %v5480_v9, %v5508_v32  ;;  %s5306_s17 = smov 96   ;;  %s5307_s18 = smov 95  }
  0x28   : > { %v613_v43 = vrot.slane %v5475_v8, %v5508_v32  ;;  %v630_v46 = vrot.slane %v5475_v8, %v5512_v33  ;;  %v634_v47 = vrot.slane %v5480_v9, %v5512_v33  ;;  %v5546_v60 = vsub.s32 6, %v5462_v4 }
  0x29   : > { %v619_v56 = vmul.f32 %v617_v42, %v5431_v1  ;;  %v5549_v63 = vsub.s32 7, %v5462_v4  ;;  %vm641_vm5 = vcmp.lt.s32.totalorder %v5464_v5, 113  ;;  %vm658_vm6 = vcmp.lt.s32.totalorder %v5464_v5, 112 }
  0x2a   : > { %v618_v57 = vmul.f32 %v613_v43, %v5425_v0  ;;  %vm675_vm7 = vcmp.lt.s32.totalorder %v5464_v5, 111 }
  0x2b   : > { %561 = vrot.lane.b32.xlu1 %v5431_v1, %s5288_s19  ;;  %542 = vrot.lane.b32.xlu0 %v5431_v1, %s5289_s20  ;;  %v664_v4 = vrot.slane %v5475_v8, %v5549_v63 }
  0x2f   : > { %578 = vrot.lane.b32.xlu1 %v5431_v1, %s7069_s23  ;;  %576 = vrot.lane.b32.xlu0 %v5425_v0, %s7069_s23  ;;  %s1178_s23 = sld [smem:[#allocation2]] }
  0x33   : > { %595 = vrot.lane.b32.xlu1 %v5431_v1, %s7067_s24  ;;  %593 = vrot.lane.b32.xlu0 %v5425_v0, %s7067_s24  ;;  %s7079_s24 = smov 111  }
  0x37   : > { %622 = vrot.lane.b32.xlu1 %v5431_v1, %s7065_s25  ;;  %620 = vrot.lane.b32.xlu0 %v5425_v0, %s7065_s25 }
  0x3b   : > { %639 = vrot.lane.b32.xlu1 %v5431_v1, %s7063_s26  ;;  %637 = vrot.lane.b32.xlu0 %v5425_v0, %s7063_s26  ;;  %s7077_s26 = smov 113  }
  0x3f   : > { %656 = vrot.lane.b32.xlu1 %v5431_v1, %s7061_s27  ;;  %654 = vrot.lane.b32.xlu0 %v5425_v0, %s7061_s27  ;;  %s7078_s27 = smov 112  }
  0x43   : > { %673 = vrot.lane.b32.xlu1 %v5431_v1, %s7059_s28  ;;  %671 = vrot.lane.b32.xlu0 %v5425_v0, %s7059_s28  ;;  %s5302_s28 = smov 14  }
  0x99   : > { %v560_v10 = vpop.permute.xlu1 %559  ;;  %v541_v11 = vpop.permute.xlu0 %540 }
  0x9d   : > { %v562_v16 = vpop.permute.xlu1 %561  ;;  %v543_v17 = vpop.permute.xlu0 %542 }
  0x9e   : > { %v565_v20 = vsel %vm563_vm0, %v562_v16, %v560_v10  ;;  %v548_v21 = vsel %vm546_vm1, %v543_v17, %v541_v11  ;;  %v547_v22 = vsel %vm546_vm1, %v541_v11, %v543_v17  ;;  %v564_v23 = vsel %vm563_vm0, %v560_v10, %v562_v16 }
  0x9f   : > { %v558_v24 = vmul.f32 %v556_v12, %v547_v22  ;;  %v575_v25 = vmul.f32 %v573_v13, %v564_v23  ;;  %v557_v26 = vmul.f32 %v552_v14, %v548_v21  ;;  %v574_v27 = vmul.f32 %v569_v15, %v565_v20 }
  0xa0   : > { %v647_v11 = vrot.slane %v5475_v8, %v5546_v60  ;;  %v651_v12 = vrot.slane %v5480_v9, %v5546_v60  ;;  %v668_v13 = vrot.slane %v5480_v9, %v5549_v63 }
  0xa1   : > { %v579_v28 = vpop.permute.xlu1 %578  ;;  %v577_v29 = vpop.permute.xlu0 %576  ;;  %v4729_v30 = vpack.c.bf16 %v575_v25, %v558_v24  ;;  %v4731_v31 = vpack.c.bf16 %v574_v27, %v557_v26  ;;  %v4074_v24 = vld [vmem:[%s7044_s2 + $0x18] ss:$0 sm:$0xff]  ;;  %v4073_v26 = vld [vmem:[%s7044_s2 + $0x10] ss:$0 sm:$0xff] }
  0xa2   : > { %v581_v38 = vsel %vm580_vm2, %v577_v29, %v579_v28  ;;  %v582_v39 = vsel %vm580_vm2, %v579_v28, %v577_v29 }
  0xa3   : > { %4730 = vmatprep.subr.bf16.mxu0 %v4729_v30  ;;  %v591_v48 = vmul.f32 %v586_v34, %v582_v39  ;;  %v592_v49 = vmul.f32 %v590_v35, %v581_v38 }
  0xa4   : > { %4732 = vmatpush1.bf16.msra.mxu0 %v4731_v31 }
  0xa5   : > { %v596_v40 = vpop.permute.xlu1 %595  ;;  %v594_v41 = vpop.permute.xlu0 %593 }
  0xa6   : > { %v598_v44 = vsel %vm597_vm3, %v594_v41, %v596_v40  ;;  %v599_v45 = vsel %vm597_vm3, %v596_v40, %v594_v41 }
  0xa7   : > { %v608_v50 = vmul.f32 %v603_v36, %v599_v45  ;;  %v609_v51 = vmul.f32 %v607_v37, %v598_v44  ;;  %v688_v36 = vld [vmem:[%s7043_s1] sm:$0xff]  ;;  %v689_v37 = vld [vmem:[%s7043_s1 + $0x8] sm:$0xff] }
  0xa9   : > { %v623_v52 = vpop.permute.xlu1 %622  ;;  %v621_v53 = vpop.permute.xlu0 %620  ;;  %v4733_v54 = vpack.c.bf16 %v609_v51, %v592_v49  ;;  %v4735_v55 = vpack.c.bf16 %v608_v50, %v591_v48 }
  0xaa   : > { %v625_v58 = vsel %vm624_vm4, %v621_v53, %v623_v52  ;;  %v626_v59 = vsel %vm624_vm4, %v623_v52, %v621_v53 }
  0xab   : > { %v635_v61 = vmul.f32 %v630_v46, %v625_v58  ;;  %v636_v62 = vmul.f32 %v634_v47, %v626_v59  ;;  %4734 = vmatprep.subr.bf16.mxu0 %v4733_v54  ;;  %v5297_v54 = vmov 0.0|0.0  }
  0xac   : > { %4736 = vmatpush1.bf16.msra.mxu0 %v4735_v55  ;;  %v786_v55 = vld [vmem:[%s7045_s3] sm:$0x1] }
  0xad   : > { %v640_v3 = vpop.permute.xlu1 %639  ;;  %v638_v0 = vpop.permute.xlu0 %637  ;;  %v4737_v1 = vpack.c.bf16 %v636_v62, %v619_v56  ;;  %v4739_v10 = vpack.c.bf16 %v635_v61, %v618_v57  ;;  %v5299_v56 = vmov 16  }
  0xae   : > { %v642_v14 = vsel %vm641_vm5, %v638_v0, %v640_v3  ;;  %v643_v15 = vsel %vm641_vm5, %v640_v3, %v638_v0  ;;  %5211 = vset.pattern.permute.xlu1 %v5299_v56  ;;  %v1067_v56 = vld [vmem:[%s7047_s5 + $0x88] sm:$0xff] }
  0xaf   : > { %4738 = vmatprep.subr.bf16.mxu0 %v4737_v1  ;;  %v652_v8 = vmul.f32 %v647_v11, %v642_v14  ;;  %v653_v22 = vmul.f32 %v651_v12, %v643_v15  ;;  %v787_v11 = vld [vmem:[%s7046_s4] sm:$0xff]  ;;  %v788_v12 = vld [vmem:[%s7046_s4 + $0x8] sm:$0xff] }
  0xb0   : > { %4740 = vmatpush1.bf16.msra.mxu0 %v4739_v10  ;;  %4402 = vmatprep.mubr.msk.f32.mxu1 %vm804_vm14, %v787_v11 }
  0xb1   : > { %v657_v16 = vpop.permute.xlu1 %656  ;;  %v655_v17 = vpop.permute.xlu0 %654 }
  0xb2   : > { %v659_v20 = vsel %vm658_vm6, %v655_v17, %v657_v16  ;;  %v660_v21 = vsel %vm658_vm6, %v657_v16, %v655_v17 }
  0xb3   : > { %v669_v9 = vmul.f32 %v664_v4, %v659_v20  ;;  %v670_v23 = vmul.f32 %v668_v13, %v660_v21  ;;  %v5300_v4 = vmov 1  }
  0xb4   : > { %5212 = vset.pattern.permute.xlu0 %v5300_v4 }
  0xb5   : > { %v674_v25 = vpop.permute.xlu1 %673  ;;  %v672_v27 = vpop.permute.xlu0 %671  ;;  %v4741_v28 = vpack.c.bf16 %v670_v23, %v653_v22  ;;  %v4743_v29 = vpack.c.bf16 %v669_v9, %v652_v8 }
  0xb6   : > { %v676_v30 = vsel %vm675_vm7, %v672_v27, %v674_v25  ;;  %v677_v31 = vsel %vm675_vm7, %v674_v25, %v672_v27  ;;  %v5301_v25 = vmov 0   ;;  %v1053_v27 = vld [vmem:[%s7047_s5 + $0x18] sm:$0xff] }
  0xb7   : > { %v687_v34 = vmul.f32 %v4074_v24, %v677_v31  ;;  %4742 = vmatprep.subr.bf16.mxu0 %v4741_v28  ;;  %v686_v35 = vmul.f32 %v4073_v26, %v676_v30  ;;  %v1051_v26 = vld [vmem:[%s7047_s5 + $0x8] sm:$0xff]  ;;  %v1050_v28 = vld [vmem:[%s7047_s5] sm:$0xff]  ;;  %v1052_v30 = vld [vmem:[%s7047_s5 + $0x10] sm:$0xff] }
  0xb8   : > { %4744 = vmatpush1.bf16.msra.mxu0 %v4743_v29  ;;  %v4748_v29 = vpack.c.bf16 %v1053_v27, %v1051_v26  ;;  %v1055_v31 = vld [vmem:[%s7047_s5 + $0x28] sm:$0xff]  ;;  %v1078_v26 = vld [vmem:[%s7047_s5 + $0xe0] sm:$0xff]  ;;  %v1080_v27 = vld [vmem:[%s7047_s5 + $0xf0] sm:$0xff] }
  0xb9   : > { %713 = vmatprep.subr.mxu0 %v687_v34  ;;  %v1057_v34 = vld [vmem:[%s7047_s5 + $0x38] sm:$0xff] }
  0xbc   : > { %714 = vmatpush1.msra.mxu0 %v686_v35  ;;  %v4750_v35 = vpack.c.bf16 %v1052_v30, %v1050_v28  ;;  %v1083_v28 = vld [vmem:[%s7047_s5 + $0x108] sm:$0xff]  ;;  %v4778_v30 = vpack.c.bf16 %v1080_v27, %v1078_v26  ;;  %v1102_v27 = vld [vmem:[%s7047_s5 + $0x1a0] sm:$0xff] }
  0xbd   : > { %4075 = vmatmul.mubr.msk.f32.vlgmr.msra.gmra.mrb[0].mxu0 %vm690_vm8, %v688_v36  ;;  %4745 = vmatprep.subr.bf16.mxu0 %v5297_v54  ;;  %v4752_v36 = vpack.c.bf16 %v1057_v34, %v1055_v31  ;;  %v1082_v34 = vld [vmem:[%s7047_s5 + $0x100] sm:$0xff] }
  0xbe   : > { %767 = vmatprep.mubr.f32.mxu0 %v5294_v2 }
  0xc1   : > { %4076 = vmatmul.mubr.msk.f32.gmra.mrb[2].mxu0 %vm690_vm8, %v689_v37  ;;  %vm904_vm8 = vcmask 1040384   ;;  %v1054_v37 = vld [vmem:[%s7047_s5 + $0x20] sm:$0xff] }
  0xc2   : > { %4397 = vmatprep.mubr.msk.f32.mxu0 %vm5298_vm13, %v5294_v2 }
 0x190   : > { %v763_v38 = vpop.f32.mrb[0].mxu0 }
 0x191   : > { %vm774_vm9 = vcmp.ge.f32.partialorder %v763_v38, 0.0  ;;  %v778_v39 = vmul.f32 0.2, %v763_v38  ;;  %v765_v40 = vpop.f32.mrb[1].mxu0 }
 0x192   : > { %vm775_vm10 = vcmp.ge.f32.partialorder %v765_v40, 0.0  ;;  %v779_v41 = vmul.f32 0.2, %v765_v40 }
 0x193   : > { %v5587_v42 = vsel %vm774_vm9, %v763_v38, %v778_v39  ;;  %v1056_v38 = vld [vmem:[%s7047_s5 + $0x30] sm:$0xff]  ;;  %v1059_v39 = vld [vmem:[%s7047_s5 + $0x48] sm:$0xff]  ;;  %vm2144_vm9 = vcmask 523264  }
 0x194   : > { %v5589_v43 = vsel %vm775_vm10, %v765_v40, %v779_v41  ;;  %v769_v44 = vpop.f32.mrb[2].mxu0  ;;  %v1061_v40 = vld [vmem:[%s7047_s5 + $0x58] sm:$0xff]  ;;  %v4754_v41 = vpack.c.bf16 %v1056_v38, %v1054_v37 }
 0x195   : > { %vm776_vm11 = vcmp.ge.f32.partialorder %v769_v44, 0.0  ;;  %v780_v45 = vmul.f32 0.2, %v769_v44  ;;  %v771_v46 = vpop.f32.mrb[3].mxu0  ;;  %v789_v47 = vadd.f32 %v5589_v43, %v5587_v42  ;;  %v798_v51 = vmax.f32 %v5587_v42, %v5589_v43  ;;  %v1089_v37 = vld [vmem:[%s7047_s5 + $0x138] sm:$0xff] }
 0x196   : > { %vm777_vm12 = vcmp.ge.f32.partialorder %v771_v46, 0.0  ;;  %v781_v48 = vmul.f32 0.2, %v771_v46 }
 0x197   : > { %v5593_v49 = vsel %vm776_vm11, %v769_v44, %v780_v45  ;;  %790 = vadd.xlane.f32.xlu0 %v789_v47  ;;  %v4756_v44 = vpack.c.bf16 %v1061_v40, %v1059_v39  ;;  %v1058_v45 = vld [vmem:[%s7047_s5 + $0x40] sm:$0xff]  ;;  %v1063_v47 = vld [vmem:[%s7047_s5 + $0x68] sm:$0xff] }
 0x198   : > { %v5595_v50 = vsel %vm777_vm12, %v771_v46, %v781_v48  ;;  %v1060_v46 = vld [vmem:[%s7047_s5 + $0x50] sm:$0xff]  ;;  %v1065_v48 = vld [vmem:[%s7047_s5 + $0x78] sm:$0xff]  ;;  %v1086_v40 = vld [vmem:[%s7047_s5 + $0x120] sm:$0xff] }
 0x199   : > { %v792_v52 = vadd.f32 %v5595_v50, %v5593_v49  ;;  %v801_v53 = vmax.f32 %v5593_v49, %v5595_v50 }
 0x19b   : > { %799 = vmax.xlane.f32.xlu0 %v798_v51  ;;  %793 = vadd.xlane.f32.xlu1 %v792_v52  ;;  %v4758_v51 = vpack.c.bf16 %v1060_v46, %v1058_v45  ;;  %v4760_v52 = vpack.c.bf16 %v1065_v48, %v1063_v47  ;;  %v1093_v45 = vld [vmem:[%s7047_s5 + $0x158] sm:$0xff]  ;;  %v1090_v48 = vld [vmem:[%s7047_s5 + $0x140] sm:$0xff] }
 0x19f   : > { %802 = vmax.xlane.f32.xlu0 %v801_v53  ;;  %v1062_v53 = vld [vmem:[%s7047_s5 + $0x60] sm:$0xff] }
 0x1ac   : > { %809 = vperm.xlu1 %5211, %v786_v55  }
 0x1b0   : > { %5213 = vset.pattern.permute.xlu1 %v5300_v4 }
 0x1b1   : > { %897 = vperm.xlu1 %5213, %v788_v12  }
 0x1b5   : > { %892 = vperm.xlu0 %5212, %v787_v11   ;;  %5214 = vset.pattern.permute.xlu1 %v5301_v25  ;;  %v1070_v11 = vld [vmem:[%s7047_s5 + $0xa0] sm:$0xff] }
 0x1b9   : > { %5215 = vset.pattern.permute.xlu0 %v5301_v25 }
 0x224   : > { %v791_v57 = vpop.xlane.xlu0 %790 }
 0x225   : > { %v796_v61 = vmul.f32 0.00390625, %v791_v57  ;;  %v1069_v57 = vld [vmem:[%s7047_s5 + $0x98] sm:$0xff] }
 0x228   : > { %v800_v58 = vpop.xlane.xlu0 %799  ;;  %v794_v59 = vpop.xlane.xlu1 %793 }
 0x229   : > { %v797_v62 = vmul.f32 0.00390625, %v794_v59  ;;  %v805_v0 = vsel %vm804_vm14, %v796_v61, %v800_v58  ;;  %v4764_v59 = vpack.c.bf16 %v1069_v57, %v1067_v56  ;;  %v1066_v61 = vld [vmem:[%s7047_s5 + $0x80] sm:$0xff] }
 0x22c   : > { %v803_v3 = vpop.xlane.xlu0 %802  ;;  %v810_v13 = vpop.permute.xlu1 %809 }
 0x22d   : > { %v806_v1 = vsel %vm804_vm14, %v797_v62, %v803_v3  ;;  %v815_v14 = vrot.slane %v810_v13, %v5467_v6  ;;  %v1068_v62 = vld [vmem:[%s7047_s5 + $0x90] sm:$0xff]  ;;  %v1071_v3 = vld [vmem:[%s7047_s5 + $0xa8] sm:$0xff] }
 0x22e   : > { %v4746_v10 = vpack.c.bf16 %v806_v1, %v805_v0  ;;  %v1073_v0 = vld [vmem:[%s7047_s5 + $0xb8] sm:$0xff]  ;;  %v4766_v1 = vpack.c.bf16 %v1068_v62, %v1066_v61  ;;  %v1075_v13 = vld [vmem:[%s7047_s5 + $0xc8] sm:$0xff] }
 0x230   : > { %4747 = vmatpush3.bf16.msra.mxu0 %v4746_v10  ;;  %v898_v23 = vpop.permute.xlu1 %897  ;;  %v4768_v10 = vpack.c.bf16 %v1073_v0, %v1071_v3 }
 0x231   : > { %4876 = vmatprep.subr.bf16.mxu0 %v5297_v54 }
 0x233   : > { %4398 = vmatmul.mubr.msk.f32.vlgmr.msra.gmra.mrb[4].mxu0 %vm816_vm15, %v786_v55  ;;  %v1064_v55 = vld [vmem:[%s7047_s5 + $0x70] sm:$0xff]  ;;  %vm2183_vm15 = vcmask 261120  }
 0x234   : > { %v893_v21 = vpop.permute.xlu0 %892  ;;  %v4762_v58 = vpack.c.bf16 %v1064_v55, %v1062_v53 }
 0x306   : > { %v885_v15 = vpop.f32.mrb[4].mxu0 }
 0x307   : > { %v886_v16 = vadd.f32 %v885_v15, %v815_v14  ;;  %v4399_v17 = vpop.f32.mrb[5].mxu0  ;;  %v1077_v14 = vld [vmem:[%s7047_s5 + $0xd8] sm:$0xff] }
 0x308   : > { %v1074_v17 = vld [vmem:[%s7047_s5 + $0xc0] sm:$0xff] }
 0x309   : > { %v889_v20 = vmax.f32 %v886_v16, 0.0  ;;  %v4772_v16 = vpack.c.bf16 %v1077_v14, %v1075_v13 }
 0x30b   : > { %4400 = vmatprep.subr.msk.mxu1 %vm904_vm8, %v889_v20 }
 0x30c   : > { %4401 = vmatpush3.msk.msra.mxu1 %vm904_vm8, %v889_v20  ;;  %v1076_v20 = vld [vmem:[%s7047_s5 + $0xd0] sm:$0xff]  ;;  %vm2277_vm8 = vcmask 15360  }
 0x30d   : > { %4403 = vmatmul.mubr.msk.f32.vlgmr.msra.gmra.mrb[0].mxu1 %vm804_vm14, %v788_v12  ;;  %4749 = vmatprep.subr.bf16.mxu1 %v4748_v29  ;;  %v1072_v12 = vld [vmem:[%s7047_s5 + $0xb0] sm:$0xff]  ;;  %v1085_v29 = vld [vmem:[%s7047_s5 + $0x118] sm:$0xff] }
 0x30e   : > { %4751 = vmatpush1.bf16.msra.mxu1 %v4750_v35  ;;  %v4770_v15 = vpack.c.bf16 %v1072_v12, %v1070_v11  ;;  %v4780_v31 = vpack.c.bf16 %v1085_v29, %v1083_v28  ;;  %v1084_v35 = vld [vmem:[%s7047_s5 + $0x110] sm:$0xff] }
 0x30f   : > { %4753 = vmatprep.subr.bf16.mxu1 %v4752_v36  ;;  %v1087_v36 = vld [vmem:[%s7047_s5 + $0x128] sm:$0xff]  ;;  %v4782_v38 = vpack.c.bf16 %v1084_v35, %v1082_v34  ;;  %v1096_v12 = vld [vmem:[%s7047_s5 + $0x170] sm:$0xff]  ;;  %v1106_v34 = vld [vmem:[%s7047_s5 + $0x1c0] sm:$0xff] }
 0x310   : > { %v4784_v39 = vpack.c.bf16 %v1089_v37, %v1087_v36  ;;  %v1104_v28 = vld [vmem:[%s7047_s5 + $0x1b0] sm:$0xff]  ;;  %v1111_v37 = vld [vmem:[%s7047_s5 + $0x1e8] sm:$0xff] }
 0x311   : > { %v4802_v29 = vpack.c.bf16 %v1104_v28, %v1102_v27  ;;  %v1108_v36 = vld [vmem:[%s7047_s5 + $0x1d0] sm:$0xff]  ;;  %v1118_v28 = vld [vmem:[%s7047_s5 + $0x220] sm:$0xff] }
 0x312   : > { %4755 = vmatpush1.bf16.msra.mxu1 %v4754_v41  ;;  %v1088_v41 = vld [vmem:[%s7047_s5 + $0x130] sm:$0xff] }
 0x313   : > { %4757 = vmatprep.subr.bf16.mxu1 %v4756_v44  ;;  %v1091_v44 = vld [vmem:[%s7047_s5 + $0x148] sm:$0xff]  ;;  %v4786_v46 = vpack.c.bf16 %v1088_v41, %v1086_v40  ;;  %v1110_v41 = vld [vmem:[%s7047_s5 + $0x1e0] sm:$0xff] }
 0x314   : > { %v4788_v47 = vpack.c.bf16 %v1093_v45, %v1091_v44  ;;  %v1112_v44 = vld [vmem:[%s7047_s5 + $0x1f0] sm:$0xff] }
 0x315   : > { %v4810_v45 = vpack.c.bf16 %v1112_v44, %v1110_v41 }
 0x316   : > { %4759 = vmatpush1.bf16.msra.mxu1 %v4758_v51  ;;  %v1092_v51 = vld [vmem:[%s7047_s5 + $0x150] sm:$0xff] }
 0x317   : > { %4761 = vmatprep.subr.bf16.mxu1 %v4760_v52  ;;  %v4790_v52 = vpack.c.bf16 %v1092_v51, %v1090_v48 }
 0x31a   : > { %4763 = vmatpush1.bf16.msra.mxu1 %v4762_v58 }
 0x31b   : > { %4765 = vmatprep.subr.bf16.mxu1 %v4764_v59 }
 0x31e   : > { %4767 = vmatpush1.bf16.msra.mxu1 %v4766_v1 }
 0x31f   : > { %4769 = vmatprep.subr.bf16.mxu1 %v4768_v10  ;;  %v1095_v10 = vld [vmem:[%s7047_s5 + $0x168] sm:$0xff] }
 0x322   : > { %4771 = vmatpush1.bf16.msra.mxu1 %v4770_v15  ;;  %v1099_v15 = vld [vmem:[%s7047_s5 + $0x188] sm:$0xff] }
 0x323   : > { %4773 = vmatprep.subr.bf16.mxu1 %v4772_v16  ;;  %v1101_v16 = vld [vmem:[%s7047_s5 + $0x198] sm:$0xff] }
 0x3e0   : > { %v4404_v8 = vpop.f32.mrb[0].mxu1 }
 0x3e1   : > { %v974_v22 = vpop.f32.mrb[1].mxu1  ;;  %v5627_v24 = vadd.f32 %v4404_v8, %v898_v23  ;;  %v1081_v8 = vld [vmem:[%s7047_s5 + $0xf8] sm:$0xff] }
 0x3e2   : > { %v5623_v9 = vadd.f32 %v974_v22, %v893_v21  ;;  %v1079_v21 = vld [vmem:[%s7047_s5 + $0xe8] sm:$0xff]  ;;  %v4774_v22 = vpack.c.bf16 %v1076_v20, %v1074_v17  ;;  %v4796_v17 = vpack.c.bf16 %v1101_v16, %v1099_v15  ;;  %v1098_v20 = vld [vmem:[%s7047_s5 + $0x180] sm:$0xff]  ;;  %v1116_v15 = vld [vmem:[%s7047_s5 + $0x210] sm:$0xff] }
 0x3e3   : > { %v4776_v23 = vpack.c.bf16 %v1081_v8, %v1079_v21  ;;  %v1100_v21 = vld [vmem:[%s7047_s5 + $0x190] sm:$0xff] }
 0x3e4   : > { %985 = vrot.lane.b32.xlu1 %v5623_v9, %s7065_s25  ;;  %4775 = vmatpush1.bf16.msra.mxu1 %v4774_v22  ;;  %v4798_v8 = vpack.c.bf16 %v1100_v21, %v1098_v20  ;;  %v1103_v22 = vld [vmem:[%s7047_s5 + $0x1a8] sm:$0xff] }
 0x3e5   : > { %4777 = vmatprep.subr.bf16.mxu1 %v4776_v23  ;;  %v1105_v23 = vld [vmem:[%s7047_s5 + $0x1b8] sm:$0xff]  ;;  %v1119_v21 = vld [vmem:[%s7047_s5 + $0x228] sm:$0xff] }
 0x3e6   : > { %v4800_v26 = vpack.c.bf16 %v1105_v23, %v1103_v22 }
 0x3e8   : > { %987 = vrot.lane.b32.xlu1 %v5627_v24, %s7065_s25  ;;  %4779 = vmatpush1.bf16.msra.mxu1 %v4778_v30  ;;  %v1107_v30 = vld [vmem:[%s7047_s5 + $0x1c8] sm:$0xff]  ;;  %s5304_s25 = smov 110  }
 0x3e9   : > { %4781 = vmatprep.subr.bf16.mxu1 %v4780_v31  ;;  %v1109_v31 = vld [vmem:[%s7047_s5 + $0x1d8] sm:$0xff] }
 0x3ea   : > { %v4804_v35 = vpack.c.bf16 %v1109_v31, %v1107_v30  ;;  %v1123_v31 = vld [vmem:[%s7047_s5 + $0x248] sm:$0xff] }
 0x3ec   : > { %4783 = vmatpush1.bf16.msra.mxu1 %v4782_v38  ;;  %v1113_v38 = vld [vmem:[%s7047_s5 + $0x1f8] sm:$0xff] }
 0x3ed   : > { %4785 = vmatprep.subr.bf16.mxu1 %v4784_v39  ;;  %v4806_v39 = vpack.c.bf16 %v1108_v36, %v1106_v34  ;;  %v4808_v40 = vpack.c.bf16 %v1113_v38, %v1111_v37  ;;  %v1125_v34 = vld [vmem:[%s7047_s5 + $0x258] sm:$0xff]  ;;  %v1122_v37 = vld [vmem:[%s7047_s5 + $0x240] sm:$0xff]  ;;  %v1124_v38 = vld [vmem:[%s7047_s5 + $0x250] sm:$0xff] }
 0x3ee   : > { %v4820_v36 = vpack.c.bf16 %v1125_v34, %v1123_v31  ;;  %v4822_v41 = vpack.c.bf16 %v1124_v38, %v1122_v37  ;;  %v1152_v31 = vld [vmem:[%s7047_s5 + $0x330] sm:$0xff]  ;;  %v1155_v34 = vld [vmem:[%s7047_s5 + $0x348] sm:$0xff]  ;;  %v1154_v38 = vld [vmem:[%s7047_s5 + $0x340] sm:$0xff] }
 0x3f0   : > { %4787 = vmatpush1.bf16.msra.mxu1 %v4786_v46  ;;  %v1115_v46 = vld [vmem:[%s7047_s5 + $0x208] sm:$0xff] }
 0x3f1   : > { %4789 = vmatprep.subr.bf16.mxu1 %v4788_v47  ;;  %v1117_v47 = vld [vmem:[%s7047_s5 + $0x218] sm:$0xff] }
 0x3f2   : > { %v4812_v48 = vpack.c.bf16 %v1117_v47, %v1115_v46  ;;  %v1128_v46 = vld [vmem:[%s7047_s5 + $0x270] sm:$0xff]  ;;  %v1131_v47 = vld [vmem:[%s7047_s5 + $0x288] sm:$0xff] }
 0x3f4   : > { %4791 = vmatpush1.bf16.msra.mxu1 %v4790_v52 }
 0x456   : > { %v986_v53 = vpop.permute.xlu1 %985 }
 0x457   : > { %v991_v55 = vadd.f32 %v986_v53, %v5623_v9  ;;  %v1097_v9 = vld [vmem:[%s7047_s5 + $0x178] sm:$0xff] }
 0x458   : > { %v4792_v11 = vpack.c.bf16 %v1097_v9, %v1095_v10 }
 0x459   : > { %v4081_v56 = vmul.f32 -1.442695, %v991_v55 }
 0x45a   : > { %v988_v57 = vpop.permute.xlu1 %987  ;;  %4793 = vmatprep.subr.bf16.mxu1 %v4792_v11 }
 0x45b   : > { %5224 = vpow2.f32 %v4081_v56  ;;  %v992_v58 = vadd.f32 %v988_v57, %v5627_v24  ;;  %v1094_v24 = vld [vmem:[%s7047_s5 + $0x160] sm:$0xff] }
 0x45c   : > { %v4794_v13 = vpack.c.bf16 %v1096_v12, %v1094_v24 }
 0x45d   : > { %v4082_v59 = vmul.f32 -1.442695, %v992_v58 }
 0x45e   : > { %4795 = vmatpush1.bf16.msra.mxu1 %v4794_v13 }
 0x45f   : > { %5226 = vpow2.f32 %v4082_v59  ;;  %4797 = vmatprep.subr.bf16.mxu1 %v4796_v17 }
 0x462   : > { %4799 = vmatpush1.bf16.msra.mxu1 %v4798_v8  ;;  %v1121_v8 = vld [vmem:[%s7047_s5 + $0x238] sm:$0xff] }
 0x463   : > { %4801 = vmatprep.subr.bf16.mxu1 %v4800_v26  ;;  %v4816_v27 = vpack.c.bf16 %v1121_v8, %v1119_v21 }
 0x465   : > { %v5225_v61 = vpop.eup %5224 }
 0x466   : > { %v999_v62 = vadd.f32 1.0, %v5225_v61  ;;  %4803 = vmatpush1.bf16.msra.mxu1 %v4802_v29  ;;  %v1120_v29 = vld [vmem:[%s7047_s5 + $0x230] sm:$0xff] }
 0x467   : > { %4805 = vmatprep.subr.bf16.mxu1 %v4804_v35  ;;  %v4818_v35 = vpack.c.bf16 %v1120_v29, %v1118_v28 }
 0x468   : > { %5228 = vrcp.f32 %v999_v62 }
 0x469   : > { %v5227_v3 = vpop.eup %5226 }
 0x46a   : > { %v1000_v0 = vadd.f32 1.0, %v5227_v3  ;;  %4807 = vmatpush1.bf16.msra.mxu1 %v4806_v39  ;;  %v1127_v39 = vld [vmem:[%s7047_s5 + $0x268] sm:$0xff] }
 0x46b   : > { %4809 = vmatprep.subr.bf16.mxu1 %v4808_v40  ;;  %v1129_v40 = vld [vmem:[%s7047_s5 + $0x278] sm:$0xff] }
 0x46c   : > { %5230 = vrcp.f32 %v1000_v0  ;;  %v4824_v44 = vpack.c.bf16 %v1129_v40, %v1127_v39  ;;  %v1156_v39 = vld [vmem:[%s7047_s5 + $0x350] sm:$0xff]  ;;  %v1159_v40 = vld [vmem:[%s7047_s5 + $0x368] sm:$0xff] }
 0x46e   : > { %4811 = vmatpush1.bf16.msra.mxu1 %v4810_v45  ;;  %v1126_v45 = vld [vmem:[%s7047_s5 + $0x260] sm:$0xff] }
 0x46f   : > { %4813 = vmatprep.subr.bf16.mxu1 %v4812_v48  ;;  %v1133_v48 = vld [vmem:[%s7047_s5 + $0x298] sm:$0xff] }
 0x472   : > { %v5229_v1 = vpop.eup %5228 }
 0x473   : > { %1007 = vperm.xlu1 %5214, %v5229_v1  }
 0x476   : > { %v5231_v14 = vpop.eup %5230 }
 0x477   : > { %1012 = vperm.xlu1 %5214, %v5231_v14   ;;  %v1114_v14 = vld [vmem:[%s7047_s5 + $0x200] sm:$0xff] }
 0x478   : > { %v4814_v26 = vpack.c.bf16 %v1116_v15, %v1114_v14  ;;  %v1142_v15 = vld [vmem:[%s7047_s5 + $0x2e0] sm:$0xff] }
 0x4f2   : > { %v1008_v51 = vpop.permute.xlu1 %1007 }
 0x4f3   : > { %v5834_v53 = vmul.f32 %v1008_v51, %v5587_v42  ;;  %v5837_v55 = vmul.f32 %v1008_v51, %v5589_v43  ;;  %v4826_v51 = vpack.c.bf16 %v1128_v46, %v1126_v45 }
 0x4f6   : > { %v1013_v52 = vpop.permute.xlu1 %1012 }
 0x4f7   : > { %v5840_v56 = vmul.f32 %v1013_v52, %v5593_v49  ;;  %v5843_v57 = vmul.f32 %v1013_v52, %v5595_v50  ;;  %v4828_v52 = vpack.c.bf16 %v1133_v48, %v1131_v47  ;;  %v1158_v47 = vld [vmem:[%s7047_s5 + $0x360] sm:$0xff]  ;;  %v1160_v48 = vld [vmem:[%s7047_s5 + $0x370] sm:$0xff] }
 0x4f9   : > { %v1019_v58 = vadd.f32 %v5840_v56, %v5834_v53  ;;  %v1026_v59 = vadd.f32 %v5843_v57, %v5837_v55  ;;  %v1043_v61 = vmax.f32 %v5837_v55, %v5843_v57  ;;  %v1036_v45 = vmax.f32 %v5834_v53, %v5840_v56 }
 0x4fb   : > { %v1020_v42 = vrot.slane %v1019_v58, 4  ;;  %v1027_v62 = vrot.slane %v1026_v59, 4  ;;  %v1044_v3 = vrot.slane %v1043_v61, 4 }
 0x4fd   : > { %v1021_v43 = vadd.f32 %v1020_v42, %v1019_v58  ;;  %v1028_v0 = vadd.f32 %v1027_v62, %v1026_v59  ;;  %v1045_v1 = vmax.f32 %v1043_v61, %v1044_v3  ;;  %v1130_v58 = vld [vmem:[%s7047_s5 + $0x280] sm:$0xff]  ;;  %v1132_v59 = vld [vmem:[%s7047_s5 + $0x290] sm:$0xff]  ;;  %v1135_v61 = vld [vmem:[%s7047_s5 + $0x2a8] sm:$0xff] }
 0x4fe   : > { %v1137_v42 = vld [vmem:[%s7047_s5 + $0x2b8] sm:$0xff]  ;;  %v4830_v62 = vpack.c.bf16 %v1132_v59, %v1130_v58  ;;  %v4858_v58 = vpack.c.bf16 %v1160_v48, %v1158_v47  ;;  %v1037_v59 = vrot.slane %v1036_v45, 4  ;;  %v1739_v48 = vld [vmem:[%s7050_s8 + $0x50] sm:$0xff] }
 0x4ff   : > { %v1029_v49 = vrot.slane %v1028_v0, 2  ;;  %v1022_v10 = vrot.slane %v1021_v43, 2  ;;  %v1046_v9 = vrot.slane %v1045_v1, 2  ;;  %v4832_v3 = vpack.c.bf16 %v1137_v42, %v1135_v61  ;;  %v1162_v42 = vld [vmem:[%s7047_s5 + $0x380] sm:$0xff] }
 0x501   : > { %v1030_v50 = vadd.f32 %v1029_v49, %v1028_v0  ;;  %v1023_v11 = vadd.f32 %v1022_v10, %v1021_v43  ;;  %v1047_v24 = vmax.f32 %v1045_v1, %v1046_v9  ;;  %v1134_v43 = vld [vmem:[%s7047_s5 + $0x2a0] sm:$0xff]  ;;  %v1136_v0 = vld [vmem:[%s7047_s5 + $0x2b0] sm:$0xff]  ;;  %v1139_v1 = vld [vmem:[%s7047_s5 + $0x2c8] sm:$0xff] }
 0x502   : > { %v1141_v49 = vld [vmem:[%s7047_s5 + $0x2d8] sm:$0xff]  ;;  %v4834_v10 = vpack.c.bf16 %v1136_v0, %v1134_v43 }
 0x503   : > { %v1031_v12 = vrot.slane %v1030_v50, 1  ;;  %v1024_v13 = vrot.slane %v1023_v11, 1  ;;  %v1048_v20 = vrot.slane %v1047_v24, 1  ;;  %v4836_v9 = vpack.c.bf16 %v1141_v49, %v1139_v1  ;;  %v1169_v43 = vld [vmem:[%s7047_s5 + $0x3b8] sm:$0xff] }
 0x504   : > { %v1038_v1 = vmax.f32 %v1036_v45, %v1037_v59  ;;  %v1737_v45 = vld [vmem:[%s7050_s8 + $0x40] sm:$0xff]  ;;  %v1742_v59 = vld [vmem:[%s7050_s8 + $0x68] sm:$0xff] }
 0x505   : > { %v1032_v16 = vadd.f32 %v1031_v12, %v1030_v50  ;;  %v1025_v17 = vadd.f32 %v1024_v13, %v1023_v11  ;;  %v1049_v30 = vmax.f32 %v1047_v24, %v1048_v20  ;;  %v1138_v50 = vld [vmem:[%s7047_s5 + $0x2c0] sm:$0xff]  ;;  %v1140_v11 = vld [vmem:[%s7047_s5 + $0x2d0] sm:$0xff]  ;;  %v1143_v24 = vld [vmem:[%s7047_s5 + $0x2e8] sm:$0xff] }
 0x506   : > { %v1145_v12 = vld [vmem:[%s7047_s5 + $0x2f8] sm:$0xff]  ;;  %v4838_v13 = vpack.c.bf16 %v1140_v11, %v1138_v50  ;;  %v1171_v50 = vld [vmem:[%s7047_s5 + $0x3c8] sm:$0xff] }
 0x507   : > { %v1035_v22 = vmul.f32 0.0625, %v1032_v16  ;;  %v1034_v23 = vmul.f32 0.0625, %v1025_v17  ;;  %v4840_v14 = vpack.c.bf16 %v1145_v12, %v1143_v24  ;;  %v1144_v16 = vld [vmem:[%s7047_s5 + $0x2f0] sm:$0xff]  ;;  %v1147_v17 = vld [vmem:[%s7047_s5 + $0x308] sm:$0xff]  ;;  %v1149_v20 = vld [vmem:[%s7047_s5 + $0x318] sm:$0xff] }
 0x508   : > { %v4842_v21 = vpack.c.bf16 %v1144_v16, %v1142_v15  ;;  %v4844_v8 = vpack.c.bf16 %v1149_v20, %v1147_v17  ;;  %v1173_v11 = vld [vmem:[%s7047_s5 + $0x3d8] sm:$0xff]  ;;  %v1039_v15 = vrot.slane %v1038_v1, 2  ;;  %v1175_v16 = vld [vmem:[%s7047_s5 + $0x3e8] sm:$0xff] }
 0x509   : > { %1244 = vmatprep.mubr.f32.mxu1 %v1035_v22  ;;  %v1146_v22 = vld [vmem:[%s7047_s5 + $0x300] sm:$0xff]  ;;  %v4868_v12 = vpack.c.bf16 %v1173_v11, %v1171_v50  ;;  %v1177_v17 = vld [vmem:[%s7047_s5 + $0x3f8] sm:$0xff] }
 0x50a   : > { %1245 = vmatmul.mubr.f32.vlgmr.msra.gmra.mrb[2].mxu1 %v1034_v23  ;;  %v1148_v23 = vld [vmem:[%s7047_s5 + $0x310] sm:$0xff] }
 0x50b   : > { %4815 = vmatpush1.bf16.msra.mxu1 %v4814_v26  ;;  %1315 = vmatprep.mubr.f32.mxu1 %v1049_v30  ;;  %v1151_v26 = vld [vmem:[%s7047_s5 + $0x328] sm:$0xff]  ;;  %v4846_v28 = vpack.c.bf16 %v1148_v23, %v1146_v22  ;;  %v1150_v30 = vld [vmem:[%s7047_s5 + $0x320] sm:$0xff]  ;;  %v1176_v22 = vld [vmem:[%s7047_s5 + $0x3f0] sm:$0xff]  ;;  %v1040_v23 = vmax.f32 %v1038_v1, %v1039_v15 }
 0x50c   : > { %4817 = vmatprep.subr.bf16.mxu1 %v4816_v27  ;;  %v1153_v27 = vld [vmem:[%s7047_s5 + $0x338] sm:$0xff]  ;;  %v1750_v15 = vld [vmem:[%s7050_s8 + $0xa8] sm:$0xff] }
 0x50d   : > { %v4848_v29 = vpack.c.bf16 %v1153_v27, %v1151_v26  ;;  %v1041_v27 = vrot.slane %v1040_v23, 1 }
 0x50f   : > { %4819 = vmatpush1.bf16.msra.mxu1 %v4818_v35  ;;  %v1157_v35 = vld [vmem:[%s7047_s5 + $0x358] sm:$0xff] }
 0x510   : > { %4821 = vmatprep.subr.bf16.mxu1 %v4820_v36  ;;  %v4850_v36 = vpack.c.bf16 %v1152_v31, %v1150_v30  ;;  %v4852_v37 = vpack.c.bf16 %v1157_v35, %v1155_v34  ;;  %v1730_v30 = vld [vmem:[%s7050_s8 + $0x8] sm:$0xff]  ;;  %v1731_v34 = vld [vmem:[%s7050_s8 + $0x10] sm:$0xff]  ;;  %v1732_v35 = vld [vmem:[%s7050_s8 + $0x18] sm:$0xff] }
 0x513   : > { %4823 = vmatpush1.bf16.msra.mxu1 %v4822_v41  ;;  %v1161_v41 = vld [vmem:[%s7047_s5 + $0x378] sm:$0xff] }
 0x514   : > { %4825 = vmatprep.subr.bf16.mxu1 %v4824_v44  ;;  %v4854_v44 = vpack.c.bf16 %v1156_v39, %v1154_v38  ;;  %v4856_v46 = vpack.c.bf16 %v1161_v41, %v1159_v40  ;;  %v1734_v38 = vld [vmem:[%s7050_s8 + $0x28] sm:$0xff]  ;;  %v1735_v40 = vld [vmem:[%s7050_s8 + $0x30] sm:$0xff]  ;;  %v1736_v41 = vld [vmem:[%s7050_s8 + $0x38] sm:$0xff] }
 0x517   : > { %4827 = vmatpush1.bf16.msra.mxu1 %v4826_v51  ;;  %v1163_v51 = vld [vmem:[%s7047_s5 + $0x388] sm:$0xff] }
 0x518   : > { %4829 = vmatprep.subr.bf16.mxu1 %v4828_v52  ;;  %v1165_v52 = vld [vmem:[%s7047_s5 + $0x398] sm:$0xff] }
 0x519   : > { %v4860_v61 = vpack.c.bf16 %v1165_v52, %v1163_v51  ;;  %v1740_v51 = vld [vmem:[%s7050_s8 + $0x58] sm:$0xff] }
 0x51a   : > { %v4892_v52 = vpack.c.bf16 %v1740_v51, %v1739_v48 }
 0x51b   : > { %4831 = vmatpush1.bf16.msra.mxu1 %v4830_v62  ;;  %v1164_v62 = vld [vmem:[%s7047_s5 + $0x390] sm:$0xff] }
 0x51c   : > { %4833 = vmatprep.subr.bf16.mxu1 %v4832_v3  ;;  %v1167_v3 = vld [vmem:[%s7047_s5 + $0x3a8] sm:$0xff]  ;;  %v4862_v0 = vpack.c.bf16 %v1164_v62, %v1162_v42  ;;  %v1743_v42 = vld [vmem:[%s7050_s8 + $0x70] sm:$0xff]  ;;  %v1744_v62 = vld [vmem:[%s7050_s8 + $0x78] sm:$0xff] }
 0x51d   : > { %v4864_v49 = vpack.c.bf16 %v1169_v43, %v1167_v3  ;;  %v4898_v3 = vpack.c.bf16 %v1744_v62, %v1743_v42  ;;  %v1745_v43 = vld [vmem:[%s7050_s8 + $0x80] sm:$0xff] }
 0x51f   : > { %4835 = vmatpush1.bf16.msra.mxu1 %v4834_v10  ;;  %v1166_v10 = vld [vmem:[%s7047_s5 + $0x3a0] sm:$0xff] }
 0x520   : > { %4837 = vmatprep.subr.bf16.mxu1 %v4836_v9  ;;  %v1168_v9 = vld [vmem:[%s7047_s5 + $0x3b0] sm:$0xff] }
 0x521   : > { %v4866_v24 = vpack.c.bf16 %v1168_v9, %v1166_v10  ;;  %v1747_v10 = vld [vmem:[%s7050_s8 + $0x90] sm:$0xff]  ;;  %v1748_v9 = vld [vmem:[%s7050_s8 + $0x98] sm:$0xff] }
 0x522   : > { %v4904_v50 = vpack.c.bf16 %v1748_v9, %v1747_v10  ;;  %v2079_v10 = vld [vmem:[%s7051_s9] sm:$0xff] }
 0x523   : > { %4839 = vmatpush1.bf16.msra.mxu1 %v4838_v13  ;;  %v1170_v13 = vld [vmem:[%s7047_s5 + $0x3c0] sm:$0xff] }
 0x524   : > { %4841 = vmatprep.subr.bf16.mxu1 %v4840_v14  ;;  %v1172_v14 = vld [vmem:[%s7047_s5 + $0x3d0] sm:$0xff] }
 0x525   : > { %v4870_v20 = vpack.c.bf16 %v1172_v14, %v1170_v13  ;;  %v1749_v14 = vld [vmem:[%s7050_s8 + $0xa0] sm:$0xff] }
 0x527   : > { %4843 = vmatpush1.bf16.msra.mxu1 %v4842_v21  ;;  %v4872_v21 = vpack.c.bf16 %v1177_v17, %v1175_v16  ;;  %v4907_v17 = vpack.c.bf16 %v1750_v15, %v1749_v14 }
 0x528   : > { %4845 = vmatprep.subr.bf16.mxu1 %v4844_v8  ;;  %v1174_v8 = vld [vmem:[%s7047_s5 + $0x3e0] sm:$0xff] }
 0x529   : > { %v4874_v26 = vpack.c.bf16 %v1176_v22, %v1174_v8  ;;  %v1752_v8 = vld [vmem:[%s7050_s8 + $0xb8] sm:$0xff] }
 0x52b   : > { %4847 = vmatpush1.bf16.msra.mxu1 %v4846_v28  ;;  %v1042_v28 = vmax.f32 %v1040_v23, %v1041_v27  ;;  %v1753_v23 = vld [vmem:[%s7050_s8 + $0xc0] sm:$0xff] }
 0x52c   : > { %4849 = vmatprep.subr.bf16.mxu1 %v4848_v29  ;;  %v1729_v29 = vld [vmem:[%s7050_s8] sm:$0xff] }
 0x52d   : > { %v4877_v31 = vpack.c.bf16 %v1730_v30, %v1729_v29  ;;  %v1756_v29 = vld [vmem:[%s7050_s8 + $0xd8] sm:$0xff] }
 0x52f   : > { %4851 = vmatpush1.bf16.msra.mxu1 %v4850_v36  ;;  %4878 = vmatpush1.bf16.msra.mxu0 %v4877_v31  ;;  %v4880_v36 = vpack.c.bf16 %v1732_v35, %v1731_v34 }
 0x530   : > { %4853 = vmatprep.subr.bf16.mxu1 %v4852_v37  ;;  %4879 = vmatprep.subr.bf16.mxu0 %v5297_v54  ;;  %v1733_v37 = vld [vmem:[%s7050_s8 + $0x20] sm:$0xff] }
 0x531   : > { %v4883_v39 = vpack.c.bf16 %v1734_v38, %v1733_v37  ;;  %v1757_v37 = vld [vmem:[%s7050_s8 + $0xe0] sm:$0xff]  ;;  %v1758_v38 = vld [vmem:[%s7050_s8 + $0xe8] sm:$0xff] }
 0x533   : > { %4855 = vmatpush1.bf16.msra.mxu1 %v4854_v44  ;;  %4881 = vmatpush1.bf16.msra.mxu0 %v4880_v36  ;;  %v4886_v44 = vpack.c.bf16 %v1736_v41, %v1735_v40  ;;  %v1759_v40 = vld [vmem:[%s7050_s8 + $0xf0] sm:$0xff]  ;;  %v1760_v41 = vld [vmem:[%s7050_s8 + $0xf8] sm:$0xff] }
 0x534   : > { %4857 = vmatprep.subr.bf16.mxu1 %v4856_v46  ;;  %4882 = vmatprep.subr.bf16.mxu0 %v5297_v54  ;;  %v1738_v46 = vld [vmem:[%s7050_s8 + $0x48] sm:$0xff] }
 0x535   : > { %v4889_v47 = vpack.c.bf16 %v1738_v46, %v1737_v45 }
 0x537   : > { %4859 = vmatpush1.bf16.msra.mxu1 %v4858_v58  ;;  %4884 = vmatpush1.bf16.msra.mxu0 %v4883_v39  ;;  %v1741_v58 = vld [vmem:[%s7050_s8 + $0x60] sm:$0xff]  ;;  %v4919_v39 = vpack.c.bf16 %v1758_v38, %v1757_v37 }
 0x538   : > { %4861 = vmatprep.subr.bf16.mxu1 %v4860_v61  ;;  %4885 = vmatprep.subr.bf16.mxu0 %v5297_v54  ;;  %v4895_v61 = vpack.c.bf16 %v1742_v59, %v1741_v58  ;;  %v6265_v59 = vld [vmem:[%s7049_s7 + $0x8] sm:$0xff] }
 0x539   : > { %v1369_v42 = vrot.slane %v6265_v59, %v5467_v6  ;;  %v1393_v15 = vrot.slane %v6265_v59, %v5470_v7 }
 0x53b   : > { %4863 = vmatpush1.bf16.msra.mxu1 %v4862_v0  ;;  %4887 = vmatpush1.bf16.msra.mxu0 %v4886_v44  ;;  %v1746_v0 = vld [vmem:[%s7050_s8 + $0x88] sm:$0xff]  ;;  %v4922_v44 = vpack.c.bf16 %v1760_v41, %v1759_v40 }
 0x53c   : > { %4865 = vmatprep.subr.bf16.mxu1 %v4864_v49  ;;  %4888 = vmatprep.subr.bf16.mxu0 %v5297_v54  ;;  %v4901_v1 = vpack.c.bf16 %v1746_v0, %v1745_v43  ;;  %v1179_v49 = vstv %s1178_s23  ;;  %s5308_s23 = smov 94  }
 0x53f   : > { %4867 = vmatpush1.bf16.msra.mxu1 %v4866_v24  ;;  %4890 = vmatpush1.bf16.msra.mxu0 %v4889_v47 }
 0x540   : > { %4869 = vmatprep.subr.bf16.mxu1 %v4868_v12  ;;  %4891 = vmatprep.subr.bf16.mxu0 %v5297_v54 }
 0x543   : > { %4871 = vmatpush1.bf16.msra.mxu1 %v4870_v20  ;;  %4893 = vmatpush1.bf16.msra.mxu0 %v4892_v52 }
 0x544   : > { %4873 = vmatprep.subr.bf16.mxu1 %v4872_v21  ;;  %4894 = vmatprep.subr.bf16.mxu0 %v5297_v54  ;;  %v1751_v21 = vld [vmem:[%s7050_s8 + $0xb0] sm:$0xff] }
 0x545   : > { %v4910_v22 = vpack.c.bf16 %v1752_v8, %v1751_v21 }
 0x547   : > { %4875 = vmatpush1.bf16.msra.mxu1 %v4874_v26  ;;  %4896 = vmatpush1.bf16.msra.mxu0 %v4895_v61  ;;  %v1754_v26 = vld [vmem:[%s7050_s8 + $0xc8] sm:$0xff] }
 0x548   : > { %4956 = vmatprep.subr.bf16.mxu1 %v5297_v54  ;;  %4897 = vmatprep.subr.bf16.mxu0 %v5297_v54  ;;  %v4913_v27 = vpack.c.bf16 %v1754_v26, %v1753_v23 }
 0x54a   : > { %1316 = vmatmul.mubr.f32.vlgmr.msra.gmra.mrb[2].mxu1 %v1042_v28  ;;  %v1755_v28 = vld [vmem:[%s7050_s8 + $0xd0] sm:$0xff] }
 0x54b   : > { %4413 = vmatprep.mubr.msk.f32.mxu1 %vm5298_vm13, %v5294_v2  ;;  %4899 = vmatpush1.bf16.msra.mxu0 %v4898_v3  ;;  %v4916_v31 = vpack.c.bf16 %v1756_v29, %v1755_v28 }
 0x54c   : > { %4900 = vmatprep.subr.bf16.mxu0 %v5297_v54 }
 0x54f   : > { %4902 = vmatpush1.bf16.msra.mxu0 %v4901_v1 }
 0x550   : > { %4903 = vmatprep.subr.bf16.mxu0 %v5297_v54 }
 0x553   : > { %4905 = vmatpush1.bf16.msra.mxu0 %v4904_v50 }
 0x554   : > { %4906 = vmatprep.subr.bf16.mxu0 %v5297_v54 }
 0x557   : > { %4908 = vmatpush1.bf16.msra.mxu0 %v4907_v17 }
 0x558   : > { %4909 = vmatprep.subr.bf16.mxu0 %v5297_v54 }
 0x55b   : > { %4911 = vmatpush1.bf16.msra.mxu0 %v4910_v22 }
 0x55c   : > { %4912 = vmatprep.subr.bf16.mxu0 %v5297_v54 }
 0x55f   : > { %4914 = vmatpush1.bf16.msra.mxu0 %v4913_v27 }
 0x560   : > { %4915 = vmatprep.subr.bf16.mxu0 %v5297_v54 }
 0x563   : > { %4917 = vmatpush1.bf16.msra.mxu0 %v4916_v31 }
 0x564   : > { %4918 = vmatprep.subr.bf16.mxu0 %v5297_v54 }
 0x567   : > { %4920 = vmatpush1.bf16.msra.mxu0 %v4919_v39 }
 0x568   : > { %4921 = vmatprep.subr.bf16.mxu0 %v5297_v54 }
 0x56b   : > { %4923 = vmatpush1.bf16.msra.mxu0 %v4922_v44 }
 0x61d   : > { %v1317_v11 = vpop.f32.mrb[2].mxu1 }
 0x61e   : > { %v5148_v24 = vadd.f32 %v1317_v11, %v1179_v49  ;;  %v1319_v12 = vpop.f32.mrb[3].mxu1 }
 0x61f   : > { %v5149_v13 = vadd.f32 %v1319_v12, %v1179_v49 }
 0x620   : > { %v4083_v16 = vmul.f32 -1.442695, %v5148_v24 }
 0x621   : > { %v4084_v20 = vmul.f32 -1.442695, %v5149_v13 }
 0x622   : > { %5232 = vpow2.f32 %v4083_v16 }
 0x623   : > { %5234 = vpow2.f32 %v4084_v20 }
 0x62c   : > { %v5233_v30 = vpop.eup %5232 }
 0x62d   : > { %v5235_v34 = vpop.eup %5234  ;;  %v1328_v35 = vadd.f32 1.0, %v5233_v30 }
 0x62e   : > { %v1329_v36 = vadd.f32 1.0, %v5235_v34  ;;  %v1417_v34 = vrot.slane %v6265_v59, %v5493_v18 }
 0x62f   : > { %5236 = vrcp.f32 %v1328_v35 }
 0x630   : > { %5238 = vrcp.f32 %v1329_v36 }
 0x639   : > { %v5237_v45 = vpop.eup %5236 }
 0x63a   : > { %v5239_v46 = vpop.eup %5238  ;;  %v1337_v47 = vrot.slane %v5237_v45, %v5467_v6 }
 0x63b   : > { %v1341_v48 = vrot.slane %v5239_v46, %v5467_v6 }
 0x63c   : > { %v6156_v51 = vmul.f32 %v1337_v47, %v5834_v53  ;;  %v6173_v53 = vmul.f32 %v1337_v47, %v5840_v56 }
 0x63d   : > { %v6159_v52 = vmul.f32 %v1341_v48, %v5843_v57  ;;  %v6166_v58 = vmul.f32 %v1341_v48, %v5837_v55  ;;  %v6260_v57 = vld [vmem:[%s7049_s7] sm:$0xff] }
 0x63e   : > { %1350 = vrot.lane.b32.xlu1 %v6156_v51, %s5289_s20  ;;  %v1365_v61 = vrot.slane %v6260_v57, %v5467_v6  ;;  %v1389_v14 = vrot.slane %v6260_v57, %v5470_v7  ;;  %v1413_v31 = vrot.slane %v6260_v57, %v5493_v18 }
 0x63f   : > { %1356 = vrot.lane.b32.xlu0 %v6159_v52, %s5289_s20 }
 0x642   : > { %1354 = vrot.lane.b32.xlu1 %v6166_v58, %s5289_s20 }
 0x643   : > { %1378 = vrot.lane.b32.xlu0 %v6166_v58, %s5288_s19 }
 0x646   : > { %1352 = vrot.lane.b32.xlu1 %v6173_v53, %s5289_s20  ;;  %s7075_s20 = smov 1  }
 0x647   : > { %1380 = vrot.lane.b32.xlu0 %v6159_v52, %s5288_s19 }
 0x64a   : > { %1374 = vrot.lane.b32.xlu1 %v6156_v51, %s5288_s19 }
 0x64b   : > { %1402 = vrot.lane.b32.xlu0 %v6166_v58, %s7074_s29 }
 0x64e   : > { %1376 = vrot.lane.b32.xlu1 %v6173_v53, %s5288_s19  ;;  %s7076_s19 = smov 127  }
 0x64f   : > { %1404 = vrot.lane.b32.xlu0 %v6159_v52, %s7074_s29 }
 0x652   : > { %1398 = vrot.lane.b32.xlu1 %v6156_v51, %s7074_s29 }
 0x653   : > { %1426 = vrot.lane.b32.xlu0 %v6166_v58, %s5302_s28 }
 0x656   : > { %1400 = vrot.lane.b32.xlu1 %v6173_v53, %s7074_s29  ;;  %s4095_s29 = sld [smem:[#allocation2 + $0x1]] }
 0x657   : > { %1428 = vrot.lane.b32.xlu0 %v6159_v52, %s5302_s28 }
 0x65a   : > { %1422 = vrot.lane.b32.xlu1 %v6156_v51, %s5302_s28 }
 0x65b   : > { %1451 = vrot.lane.b32.xlu0 %v6166_v58, %s7075_s20 }
 0x65e   : > { %1424 = vrot.lane.b32.xlu1 %v6173_v53, %s5302_s28 }
 0x65f   : > { %1453 = vrot.lane.b32.xlu0 %v6159_v52, %s7075_s20 }
 0x662   : > { %1447 = vrot.lane.b32.xlu1 %v6156_v51, %s7075_s20 }
 0x663   : > { %1487 = vrot.lane.b32.xlu0 %v6166_v58, %s7076_s19 }
 0x666   : > { %1449 = vrot.lane.b32.xlu1 %v6173_v53, %s7075_s20 }
 0x667   : > { %1489 = vrot.lane.b32.xlu0 %v6159_v52, %s7076_s19 }
 0x66a   : > { %1483 = vrot.lane.b32.xlu1 %v6156_v51, %s7076_s19 }
 0x66b   : > { %1511 = vrot.lane.b32.xlu0 %v6166_v58, %s5303_s30 }
 0x66e   : > { %1485 = vrot.lane.b32.xlu1 %v6173_v53, %s7076_s19 }
 0x66f   : > { %1513 = vrot.lane.b32.xlu0 %v6159_v52, %s5303_s30 }
 0x672   : > { %1507 = vrot.lane.b32.xlu1 %v6156_v51, %s5303_s30 }
 0x673   : > { %1536 = vrot.lane.b32.xlu0 %v6166_v58, %s7077_s26 }
 0x676   : > { %1509 = vrot.lane.b32.xlu1 %v6173_v53, %s5303_s30 }
 0x677   : > { %1538 = vrot.lane.b32.xlu0 %v6159_v52, %s7077_s26 }
 0x67a   : > { %1532 = vrot.lane.b32.xlu1 %v6156_v51, %s7077_s26 }
 0x67b   : > { %1560 = vrot.lane.b32.xlu0 %v6166_v58, %s7078_s27 }
 0x67e   : > { %1534 = vrot.lane.b32.xlu1 %v6173_v53, %s7077_s26 }
 0x67f   : > { %1562 = vrot.lane.b32.xlu0 %v6159_v52, %s7078_s27 }
 0x682   : > { %1556 = vrot.lane.b32.xlu1 %v6156_v51, %s7078_s27 }
 0x683   : > { %1584 = vrot.lane.b32.xlu0 %v6166_v58, %s7079_s24 }
 0x686   : > { %1558 = vrot.lane.b32.xlu1 %v6173_v53, %s7078_s27 }
 0x687   : > { %1586 = vrot.lane.b32.xlu0 %v6159_v52, %s7079_s24 }
 0x68a   : > { %1580 = vrot.lane.b32.xlu1 %v6156_v51, %s7079_s24 }
 0x68b   : > { %1608 = vrot.lane.b32.xlu0 %v6166_v58, %s5304_s25 }
 0x68e   : > { %1582 = vrot.lane.b32.xlu1 %v6173_v53, %s7079_s24  ;;  %s4072_s24 = sshll.u32 %s7081_s22, 3 }
 0x68f   : > { %1610 = vrot.lane.b32.xlu0 %v6159_v52, %s5304_s25 }
 0x692   : > { %1604 = vrot.lane.b32.xlu1 %v6156_v51, %s5304_s25 }
 0x693   : > { %1633 = vrot.lane.b32.xlu0 %v6166_v58, %s5305_s0 }
 0x696   : > { %1606 = vrot.lane.b32.xlu1 %v6173_v53, %s5304_s25 }
 0x697   : > { %1635 = vrot.lane.b32.xlu0 %v6159_v52, %s5305_s0 }
 0x69a   : > { %1629 = vrot.lane.b32.xlu1 %v6156_v51, %s5305_s0 }
 0x69b   : > { %1658 = vrot.lane.b32.xlu0 %v6166_v58, %s5306_s17 }
 0x69e   : > { %1631 = vrot.lane.b32.xlu1 %v6173_v53, %s5305_s0 }
 0x69f   : > { %1660 = vrot.lane.b32.xlu0 %v6159_v52, %s5306_s17 }
 0x6a2   : > { %1654 = vrot.lane.b32.xlu1 %v6156_v51, %s5306_s17 }
 0x6a3   : > { %1683 = vrot.lane.b32.xlu0 %v6166_v58, %s5307_s18 }
 0x6a6   : > { %1656 = vrot.lane.b32.xlu1 %v6173_v53, %s5306_s17  ;;  %s533_s17 = scalar_lea.vmem %s7058_s16, %s4072_s24 }
 0x6a7   : > { %1685 = vrot.lane.b32.xlu0 %v6159_v52, %s5307_s18 }
 0x6aa   : > { %1679 = vrot.lane.b32.xlu1 %v6156_v51, %s5307_s18 }
 0x6ab   : > { %1708 = vrot.lane.b32.xlu0 %v6166_v58, %s5308_s23 }
 0x6ae   : > { %1681 = vrot.lane.b32.xlu1 %v6173_v53, %s5307_s18 }
 0x6af   : > { %1710 = vrot.lane.b32.xlu0 %v6159_v52, %s5308_s23 }
 0x6b0   : > { %v1351_v55 = vpop.permute.xlu1 %1350 }
 0x6b1   : > { %v1357_v56 = vpop.permute.xlu0 %1356 }
 0x6b2   : > { %1704 = vrot.lane.b32.xlu1 %v6156_v51, %s5308_s23 }
 0x6b4   : > { %v1355_v62 = vpop.permute.xlu1 %1354 }
 0x6b5   : > { %v1358_v3 = vsel %vm546_vm1, %v1351_v55, %v1355_v62  ;;  %v1360_v43 = vsel %vm546_vm1, %v1355_v62, %v1351_v55  ;;  %v1379_v0 = vpop.permute.xlu0 %1378  ;;  %v1438_v55 = vrot.slane %v6260_v57, %v5496_v19 }
 0x6b6   : > { %v1370_v1 = vmul.f32 %v1365_v61, %v1360_v43  ;;  %v1371_v49 = vmul.f32 %v1369_v42, %v1358_v3  ;;  %1706 = vrot.lane.b32.xlu1 %v6173_v53, %s5308_s23  ;;  %s5311_s23 = smov 64  }
 0x6b8   : > { %1825 = vmatprep.mubr.f32.mxu0 %v1371_v49  ;;  %v1353_v9 = vpop.permute.xlu1 %1352 }
 0x6b9   : > { %v1359_v50 = vsel %vm546_vm1, %v1353_v9, %v1357_v56  ;;  %v1361_v11 = vsel %vm546_vm1, %v1357_v56, %v1353_v9  ;;  %v1381_v24 = vpop.permute.xlu0 %1380  ;;  %1826 = vmatmul.mubr.f32.vlgmr.msra.gmra.mrb[6].mxu0 %v1370_v1  ;;  %v1442_v56 = vrot.slane %v6265_v59, %v5496_v19  ;;  %vm1515_vm1 = vcmp.lt.s32.totalorder %v5464_v5, 126 }
 0x6ba   : > { %v1372_v12 = vmul.f32 %v1365_v61, %v1361_v11  ;;  %v1373_v13 = vmul.f32 %v1369_v42, %v1359_v50  ;;  %2085 = vperm.xlu1 %5214, %v2079_v10  }
 0x6bc   : > { %1830 = vmatprep.mubr.f32.mxu0 %v1373_v13  ;;  %v1375_v16 = vpop.permute.xlu1 %1374 }
 0x6bd   : > { %v1382_v17 = vsel %vm563_vm0, %v1375_v16, %v1379_v0  ;;  %v1384_v20 = vsel %vm563_vm0, %v1379_v0, %v1375_v16  ;;  %v1403_v21 = vpop.permute.xlu0 %1402  ;;  %1831 = vmatmul.mubr.f32.gmra.mrb[8].mxu0 %v1372_v12  ;;  %v1466_v12 = vrot.slane %v6265_v59, %v5508_v32 }
 0x6be   : > { %v1394_v8 = vmul.f32 %v1389_v14, %v1384_v20  ;;  %v1395_v22 = vmul.f32 %v1393_v15, %v1382_v17  ;;  %5216 = vset.pattern.permute.xlu1 %v5300_v4 }
 0x6bf   : > { %2108 = vperm.xlu1 %5216, %v2079_v10  }
 0x6c0   : > { %1835 = vmatprep.mubr.f32.mxu0 %v1395_v22  ;;  %v1377_v23 = vpop.permute.xlu1 %1376 }
 0x6c1   : > { %v1383_v26 = vsel %vm563_vm0, %v1377_v23, %v1381_v24  ;;  %v1385_v27 = vsel %vm563_vm0, %v1381_v24, %v1377_v23  ;;  %v1405_v28 = vpop.permute.xlu0 %1404  ;;  %1836 = vmatmul.mubr.f32.gmra.mrb[10].mxu0 %v1394_v8  ;;  %vm1430_vm0 = vcmp.lt.s32.totalorder %v5464_v5, 14  ;;  %v1462_v24 = vrot.slane %v6260_v57, %v5508_v32 }
 0x6c2   : > { %v1396_v29 = vmul.f32 %v1389_v14, %v1385_v27  ;;  %v1397_v30 = vmul.f32 %v1393_v15, %v1383_v26  ;;  %v1478_v8 = vrot.slane %v6265_v59, %v5512_v33 }
 0x6c4   : > { %1840 = vmatprep.mubr.f32.mxu0 %v1397_v30  ;;  %v1399_v35 = vpop.permute.xlu1 %1398 }
 0x6c5   : > { %v1406_v36 = vsel %vm580_vm2, %v1399_v35, %v1403_v21  ;;  %v1408_v37 = vsel %vm580_vm2, %v1403_v21, %v1399_v35  ;;  %v1427_v38 = vpop.permute.xlu0 %1426  ;;  %1841 = vmatmul.mubr.f32.gmra.mrb[12].mxu0 %v1396_v29  ;;  %v1474_v29 = vrot.slane %v6260_v57, %v5512_v33 }
 0x6c6   : > { %v1418_v39 = vmul.f32 %v1413_v31, %v1408_v37  ;;  %v1419_v40 = vmul.f32 %v1417_v34, %v1406_v36  ;;  %v1502_v36 = vrot.slane %v6265_v59, %v5546_v60 }
 0x6c7   : > { %v1479_v35 = vmul.f32 %v1474_v29, %v6156_v51 }
 0x6c8   : > { %1845 = vmatprep.mubr.f32.mxu0 %v1419_v40  ;;  %v1401_v41 = vpop.permute.xlu1 %1400 }
 0x6c9   : > { %v1407_v44 = vsel %vm580_vm2, %v1401_v41, %v1405_v28  ;;  %v1409_v45 = vsel %vm580_vm2, %v1405_v28, %v1401_v41  ;;  %v1429_v46 = vpop.permute.xlu0 %1428  ;;  %1846 = vmatmul.mubr.f32.gmra.mrb[14].mxu0 %v1418_v39  ;;  %v1481_v41 = vmul.f32 %v1474_v29, %v6173_v53  ;;  %v1527_v53 = vrot.slane %v6265_v59, %v5549_v63  ;;  %v6368_v59 = vld [vmem:[%s7049_s7 + $0x18] sm:$0xff] }
 0x6ca   : > { %v1420_v47 = vmul.f32 %v1413_v31, %v1409_v45  ;;  %v1421_v48 = vmul.f32 %v1417_v34, %v1407_v44  ;;  %v1480_v31 = vmul.f32 %v1478_v8, %v6166_v58  ;;  %v1498_v58 = vrot.slane %v6260_v57, %v5546_v60 }
 0x6cb   : > { %vm1612_vm2 = vcmp.lt.s32.totalorder %v5464_v5, 110 }
 0x6cc   : > { %1850 = vmatprep.mubr.f32.mxu0 %v1421_v48  ;;  %v1423_v61 = vpop.permute.xlu1 %1422 }
 0x6cd   : > { %v1431_v42 = vsel %vm1430_vm0, %v1423_v61, %v1427_v38  ;;  %v1433_v62 = vsel %vm1430_vm0, %v1427_v38, %v1423_v61  ;;  %v1452_v3 = vpop.permute.xlu0 %1451  ;;  %1851 = vmatmul.mubr.f32.gmra.mrb[16].mxu0 %v1420_v47  ;;  %v1482_v38 = vmul.f32 %v1478_v8, %v6159_v52 }
 0x6ce   : > { %v1443_v43 = vmul.f32 %v1438_v55, %v1433_v62  ;;  %v1444_v0 = vmul.f32 %v1442_v56, %v1431_v42 }
 0x6d0   : > { %1855 = vmatprep.mubr.f32.mxu0 %v1444_v0  ;;  %v1425_v1 = vpop.permute.xlu1 %1424 }
 0x6d1   : > { %v1432_v49 = vsel %vm1430_vm0, %v1425_v1, %v1429_v46  ;;  %v1434_v10 = vsel %vm1430_vm0, %v1429_v46, %v1425_v1  ;;  %v1454_v9 = vpop.permute.xlu0 %1453  ;;  %1856 = vmatmul.mubr.f32.gmra.mrb[18].mxu0 %v1443_v43 }
 0x6d2   : > { %v1445_v50 = vmul.f32 %v1438_v55, %v1434_v10  ;;  %v1446_v11 = vmul.f32 %v1442_v56, %v1432_v49 }
 0x6d4   : > { %1860 = vmatprep.mubr.f32.mxu0 %v1446_v11  ;;  %v1448_v13 = vpop.permute.xlu1 %1447  ;;  %v6375_v11 = vld [vmem:[%s7049_s7 + $0x10] sm:$0xff] }
 0x6d5   : > { %v1455_v14 = vsel %vm597_vm3, %v1448_v13, %v1452_v3  ;;  %v1457_v15 = vsel %vm597_vm3, %v1452_v3, %v1448_v13  ;;  %v1488_v16 = vpop.permute.xlu0 %1487  ;;  %1861 = vmatmul.mubr.f32.gmra.mrb[20].mxu0 %v1445_v50  ;;  %v1523_v3 = vrot.slane %v6260_v57, %v5549_v63 }
 0x6d6   : > { %v1467_v17 = vmul.f32 %v1462_v24, %v1457_v15  ;;  %v1468_v20 = vmul.f32 %v1466_v12, %v1455_v14 }
 0x6d8   : > { %1865 = vmatprep.mubr.f32.mxu0 %v1468_v20  ;;  %v1450_v21 = vpop.permute.xlu1 %1449 }
 0x6d9   : > { %v1456_v22 = vsel %vm597_vm3, %v1450_v21, %v1454_v9  ;;  %v1458_v23 = vsel %vm597_vm3, %v1454_v9, %v1450_v21  ;;  %v1490_v26 = vpop.permute.xlu0 %1489  ;;  %1866 = vmatmul.mubr.f32.gmra.mrb[22].mxu0 %v1467_v17  ;;  %vm1637_vm3 = vcmp.lt.s32.totalorder %v5464_v5, 97 }
 0x6da   : > { %v1469_v27 = vmul.f32 %v1462_v24, %v1458_v23  ;;  %v1470_v28 = vmul.f32 %v1466_v12, %v1456_v22  ;;  %v1551_v24 = vrot.slane %v6368_v59, %v5467_v6 }
 0x6dc   : > { %1870 = vmatprep.mubr.f32.mxu0 %v1470_v28  ;;  %v1484_v30 = vpop.permute.xlu1 %1483  ;;  %v1575_v28 = vrot.slane %v6368_v59, %v5470_v7 }
 0x6dd   : > { %v1512_v34 = vpop.permute.xlu0 %1511  ;;  %1871 = vmatmul.mubr.f32.gmra.mrb[24].mxu0 %v1469_v27  ;;  %v1493_v39 = vsel %vm624_vm4, %v1488_v16, %v1484_v30  ;;  %v1491_v51 = vsel %vm624_vm4, %v1484_v30, %v1488_v16  ;;  %v1547_v16 = vrot.slane %v6375_v11, %v5467_v6 }
 0x6de   : > { %1875 = vmatprep.mubr.f32.mxu0 %v1480_v31  ;;  %v1504_v44 = vmul.f32 %v1502_v36, %v1493_v39  ;;  %v1503_v47 = vmul.f32 %v1498_v58, %v1491_v51 }
 0x6e0   : > { %v1486_v37 = vpop.permute.xlu1 %1485 }
 0x6e1   : > { %v1514_v40 = vpop.permute.xlu0 %1513  ;;  %1876 = vmatmul.mubr.f32.gmra.mrb[26].mxu0 %v1479_v35  ;;  %v1494_v46 = vsel %vm624_vm4, %v1490_v26, %v1486_v37  ;;  %v1492_v48 = vsel %vm624_vm4, %v1486_v37, %v1490_v26  ;;  %v1571_v35 = vrot.slane %v6375_v11, %v5470_v7  ;;  %vm1662_vm4 = vcmp.lt.s32.totalorder %v5464_v5, 96 }
 0x6e2   : > { %1880 = vmatprep.mubr.f32.mxu0 %v1482_v38  ;;  %v1506_v55 = vmul.f32 %v1502_v36, %v1494_v46  ;;  %v1505_v62 = vmul.f32 %v1498_v58, %v1492_v48 }
 0x6e4   : > { %v1508_v45 = vpop.permute.xlu1 %1507 }
 0x6e5   : > { %v1537_v52 = vpop.permute.xlu0 %1536  ;;  %1881 = vmatmul.mubr.f32.gmra.mrb[28].mxu0 %v1481_v41  ;;  %v1518_v61 = vsel %vm1515_vm1, %v1512_v34, %v1508_v45  ;;  %v1516_v43 = vsel %vm1515_vm1, %v1508_v45, %v1512_v34 }
 0x6e6   : > { %1885 = vmatprep.mubr.f32.mxu0 %v1504_v44  ;;  %v1529_v0 = vmul.f32 %v1527_v53, %v1518_v61  ;;  %v1528_v9 = vmul.f32 %v1523_v3, %v1516_v43  ;;  %v1599_v44 = vrot.slane %v6368_v59, %v5493_v18 }
 0x6e8   : > { %v1510_v56 = vpop.permute.xlu1 %1509 }
 0x6e9   : > { %v1539_v42 = vpop.permute.xlu0 %1538  ;;  %1886 = vmatmul.mubr.f32.gmra.mrb[30].mxu0 %v1503_v47  ;;  %v1519_v49 = vsel %vm1515_vm1, %v1514_v40, %v1510_v56  ;;  %v1517_v57 = vsel %vm1515_vm1, %v1510_v56, %v1514_v40  ;;  %v1595_v47 = vrot.slane %v6375_v11, %v5493_v18  ;;  %v1624_v18 = vrot.slane %v6368_v59, %v5496_v19 }
 0x6ea   : > { %1890 = vmatprep.mubr.f32.mxu0 %v1506_v55  ;;  %v1531_v50 = vmul.f32 %v1527_v53, %v1519_v49  ;;  %v1530_v15 = vmul.f32 %v1523_v3, %v1517_v57 }
 0x6ec   : > { %v1533_v1 = vpop.permute.xlu1 %1532 }
 0x6ed   : > { %v1561_v10 = vpop.permute.xlu0 %1560  ;;  %1891 = vmatmul.mubr.f32.gmra.mrb[32].mxu0 %v1505_v62  ;;  %v1542_v13 = vsel %vm641_vm5, %v1537_v52, %v1533_v1  ;;  %v1540_v17 = vsel %vm641_vm5, %v1533_v1, %v1537_v52 }
 0x6ee   : > { %1895 = vmatprep.mubr.f32.mxu0 %v1529_v0  ;;  %v1553_v20 = vmul.f32 %v1551_v24, %v1542_v13  ;;  %v1552_v23 = vmul.f32 %v1547_v16, %v1540_v17 }
 0x6f0   : > { %v1535_v12 = vpop.permute.xlu1 %1534 }
 0x6f1   : > { %v1563_v14 = vpop.permute.xlu0 %1562  ;;  %1896 = vmatmul.mubr.f32.gmra.mrb[34].mxu0 %v1528_v9  ;;  %v1543_v8 = vsel %vm641_vm5, %v1539_v42, %v1535_v12  ;;  %v1541_v26 = vsel %vm641_vm5, %v1535_v12, %v1539_v42  ;;  %vm1687_vm5 = vcmp.lt.s32.totalorder %v5464_v5, 95 }
 0x6f2   : > { %1900 = vmatprep.mubr.f32.mxu0 %v1531_v50  ;;  %v1555_v27 = vmul.f32 %v1551_v24, %v1543_v8  ;;  %v1554_v34 = vmul.f32 %v1547_v16, %v1541_v26 }
 0x6f4   : > { %v1557_v21 = vpop.permute.xlu1 %1556 }
 0x6f5   : > { %v1585_v22 = vpop.permute.xlu0 %1584  ;;  %1901 = vmatmul.mubr.f32.gmra.mrb[36].mxu0 %v1530_v15  ;;  %v1566_v30 = vsel %vm658_vm6, %v1561_v10, %v1557_v21  ;;  %v1564_v36 = vsel %vm658_vm6, %v1557_v21, %v1561_v10  ;;  %v1620_v10 = vrot.slane %v6375_v11, %v5496_v19  ;;  %v1649_v19 = vrot.slane %v6368_v59, %v5508_v32 }
 0x6f6   : > { %1905 = vmatprep.mubr.f32.mxu0 %v1553_v20  ;;  %v1577_v37 = vmul.f32 %v1575_v28, %v1566_v30  ;;  %v1576_v58 = vmul.f32 %v1571_v35, %v1564_v36  ;;  %v1645_v21 = vrot.slane %v6375_v11, %v5508_v32  ;;  %v1674_v32 = vrot.slane %v6368_v59, %v5512_v33 }
 0x6f8   : > { %v1559_v29 = vpop.permute.xlu1 %1558 }
 0x6f9   : > { %v1587_v31 = vpop.permute.xlu0 %1586  ;;  %1906 = vmatmul.mubr.f32.gmra.mrb[38].mxu0 %v1552_v23  ;;  %v1567_v39 = vsel %vm658_vm6, %v1563_v14, %v1559_v29  ;;  %v1565_v41 = vsel %vm658_vm6, %v1559_v29, %v1563_v14  ;;  %vm1712_vm6 = vcmp.lt.s32.totalorder %v5464_v5, 94 }
 0x6fa   : > { %1910 = vmatprep.mubr.f32.mxu0 %v1555_v27  ;;  %v1579_v51 = vmul.f32 %v1575_v28, %v1567_v39  ;;  %v1578_v52 = vmul.f32 %v1571_v35, %v1565_v41 }
 0x6fc   : > { %v1581_v38 = vpop.permute.xlu1 %1580 }
 0x6fd   : > { %v1609_v40 = vpop.permute.xlu0 %1608  ;;  %1911 = vmatmul.mubr.f32.gmra.mrb[40].mxu0 %v1554_v34  ;;  %v1590_v45 = vsel %vm675_vm7, %v1585_v22, %v1581_v38  ;;  %v1588_v48 = vsel %vm675_vm7, %v1581_v38, %v1585_v22 }
 0x6fe   : > { %1915 = vmatprep.mubr.f32.mxu0 %v1577_v37  ;;  %v1601_v55 = vmul.f32 %v1599_v44, %v1590_v45  ;;  %v1600_v42 = vmul.f32 %v1595_v47, %v1588_v48  ;;  %v1670_v37 = vrot.slane %v6375_v11, %v5512_v33  ;;  %v1699_v33 = vrot.slane %v6368_v59, %v5546_v60 }
 0x700   : > { %v1583_v7 = vpop.permute.xlu1 %1582 }
 0x701   : > { %v1611_v46 = vpop.permute.xlu0 %1610  ;;  %1916 = vmatmul.mubr.f32.gmra.mrb[42].mxu0 %v1576_v58  ;;  %v1591_v56 = vsel %vm675_vm7, %v1587_v31, %v1583_v7  ;;  %v1589_v62 = vsel %vm675_vm7, %v1583_v7, %v1587_v31 }
 0x702   : > { %1920 = vmatprep.mubr.f32.mxu0 %v1579_v51  ;;  %v1603_v3 = vmul.f32 %v1599_v44, %v1591_v56  ;;  %v1602_v49 = vmul.f32 %v1595_v47, %v1589_v62  ;;  %v1695_v47 = vrot.slane %v6375_v11, %v5546_v60  ;;  %v1724_v60 = vrot.slane %v6368_v59, %v5549_v63 }
 0x704   : > { %v1605_v53 = vpop.permute.xlu1 %1604 }
 0x705   : > { %v1634_v61 = vpop.permute.xlu0 %1633  ;;  %1921 = vmatmul.mubr.f32.gmra.mrb[44].mxu0 %v1578_v52  ;;  %v1615_v0 = vsel %vm1612_vm2, %v1609_v40, %v1605_v53  ;;  %v1613_v9 = vsel %vm1612_vm2, %v1605_v53, %v1609_v40 }
 0x706   : > { %1925 = vmatprep.mubr.f32.mxu0 %v1601_v55  ;;  %v1626_v57 = vmul.f32 %v1624_v18, %v1615_v0  ;;  %v1625_v13 = vmul.f32 %v1620_v10, %v1613_v9 }
 0x708   : > { %v1607_v43 = vpop.permute.xlu1 %1606 }
 0x709   : > { %v1636_v1 = vpop.permute.xlu0 %1635  ;;  %1926 = vmatmul.mubr.f32.gmra.mrb[46].mxu0 %v1600_v42  ;;  %v1616_v24 = vsel %vm1612_vm2, %v1611_v46, %v1607_v43  ;;  %v1614_v14 = vsel %vm1612_vm2, %v1607_v43, %v1611_v46 }
 0x70a   : > { %1930 = vmatprep.mubr.f32.mxu0 %v1603_v3  ;;  %v1628_v15 = vmul.f32 %v1624_v18, %v1616_v24  ;;  %v1627_v20 = vmul.f32 %v1620_v10, %v1614_v14 }
 0x70c   : > { %v1630_v50 = vpop.permute.xlu1 %1629 }
 0x70d   : > { %1931 = vmatmul.mubr.f32.gmra.mrb[48].mxu0 %v1602_v49  ;;  %v1659_v12 = vpop.permute.xlu0 %1658  ;;  %v1640_v17 = vsel %vm1637_vm3, %v1634_v61, %v1630_v50  ;;  %v1638_v8 = vsel %vm1637_vm3, %v1630_v50, %v1634_v61 }
 0x70e   : > { %1935 = vmatprep.mubr.f32.mxu0 %v1626_v57  ;;  %v1651_v22 = vmul.f32 %v1649_v19, %v1640_v17  ;;  %v1650_v28 = vmul.f32 %v1645_v21, %v1638_v8  ;;  %v2080_v8 = vld [vmem:[%s7051_s9 + $0x8] sm:$0xff] }
 0x70f   : > { %2090 = vperm.xlu0 %5215, %v2080_v8   ;;  %2112 = vperm.xlu1 %5216, %v2080_v8  }
 0x710   : > { %v1632_v16 = vpop.permute.xlu1 %1631 }
 0x711   : > { %1936 = vmatmul.mubr.f32.gmra.mrb[50].mxu0 %v1625_v13  ;;  %v1661_v23 = vpop.permute.xlu0 %1660  ;;  %v1641_v27 = vsel %vm1637_vm3, %v1636_v1, %v1632_v16  ;;  %v1639_v29 = vsel %vm1637_vm3, %v1632_v16, %v1636_v1  ;;  %v1720_v1 = vrot.slane %v6375_v11, %v5549_v63  ;;  %v1987_v11 = vld [vmem:[%s7048_s6 + $0x8] sm:$0xff] }
 0x712   : > { %1940 = vmatprep.mubr.f32.mxu0 %v1628_v15  ;;  %v1653_v30 = vmul.f32 %v1649_v19, %v1641_v27  ;;  %v1652_v36 = vmul.f32 %v1645_v21, %v1639_v29  ;;  %v2082_v27 = vld [vmem:[%s7051_s9 + $0x18] sm:$0xff] }
 0x713   : > { %5217 = vset.pattern.permute.xlu1 %v5301_v25 }
 0x714   : > { %v1655_v26 = vpop.permute.xlu1 %1654  ;;  %2100 = vperm.xlu1 %5217, %v2082_v27  }
 0x715   : > { %1941 = vmatmul.mubr.f32.gmra.mrb[52].mxu0 %v1627_v20  ;;  %v1665_v34 = vsel %vm1662_vm4, %v1659_v12, %v1655_v26  ;;  %v1684_v35 = vpop.permute.xlu0 %1683  ;;  %v1663_v38 = vsel %vm1662_vm4, %v1655_v26, %v1659_v12  ;;  %v2081_v26 = vld [vmem:[%s7051_s9 + $0x10] sm:$0xff] }
 0x716   : > { %1945 = vmatprep.mubr.f32.mxu0 %v1651_v22  ;;  %v1676_v39 = vmul.f32 %v1674_v32, %v1665_v34  ;;  %v1675_v41 = vmul.f32 %v1670_v37, %v1663_v38  ;;  %2095 = vperm.xlu0 %5215, %v2081_v26  }
 0x718   : > { %v1657_v31 = vpop.permute.xlu1 %1656  ;;  %5219 = vset.pattern.permute.xlu1 %v5300_v4 }
 0x719   : > { %1946 = vmatmul.mubr.f32.gmra.mrb[54].mxu0 %v1650_v28  ;;  %v1666_v58 = vsel %vm1662_vm4, %v1661_v23, %v1657_v31  ;;  %v1664_v51 = vsel %vm1662_vm4, %v1657_v31, %v1661_v23  ;;  %v1686_v7 = vpop.permute.xlu0 %1685  ;;  %2120 = vperm.xlu1 %5219, %v2082_v27  }
 0x71a   : > { %1950 = vmatprep.mubr.f32.mxu0 %v1653_v30  ;;  %v1678_v44 = vmul.f32 %v1674_v32, %v1666_v58  ;;  %v1677_v52 = vmul.f32 %v1670_v37, %v1664_v51  ;;  %5218 = vset.pattern.permute.xlu0 %v5300_v4 }
 0x71b   : > { %2116 = vperm.xlu0 %5218, %v2081_v26  }
 0x71c   : > { %v1680_v40 = vpop.permute.xlu1 %1679 }
 0x71d   : > { %1951 = vmatmul.mubr.f32.gmra.mrb[56].mxu0 %v1652_v36  ;;  %v1690_v46 = vsel %vm1687_vm5, %v1684_v35, %v1680_v40  ;;  %v1688_v48 = vsel %vm1687_vm5, %v1680_v40, %v1684_v35  ;;  %v1709_v61 = vpop.permute.xlu0 %1708 }
 0x71e   : > { %1955 = vmatprep.mubr.f32.mxu0 %v1676_v39  ;;  %v1701_v55 = vmul.f32 %v1699_v33, %v1690_v46  ;;  %v1700_v42 = vmul.f32 %v1695_v47, %v1688_v48 }
 0x720   : > { %v1682_v45 = vpop.permute.xlu1 %1681 }
 0x721   : > { %1956 = vmatmul.mubr.f32.gmra.mrb[58].mxu0 %v1675_v41  ;;  %v1691_v56 = vsel %vm1687_vm5, %v1686_v7, %v1682_v45  ;;  %v1689_v62 = vsel %vm1687_vm5, %v1682_v45, %v1686_v7  ;;  %v1711_v49 = vpop.permute.xlu0 %1710 }
 0x722   : > { %1960 = vmatprep.mubr.f32.mxu0 %v1678_v44  ;;  %v1703_v3 = vmul.f32 %v1699_v33, %v1691_v56  ;;  %v1702_v0 = vmul.f32 %v1695_v47, %v1689_v62 }
 0x724   : > { %v1705_v53 = vpop.permute.xlu1 %1704 }
 0x725   : > { %1961 = vmatmul.mubr.f32.gmra.mrb[60].mxu0 %v1677_v52  ;;  %v1715_v18 = vsel %vm1712_vm6, %v1709_v61, %v1705_v53  ;;  %v1713_v10 = vsel %vm1712_vm6, %v1705_v53, %v1709_v61 }
 0x726   : > { %1965 = vmatprep.mubr.f32.mxu0 %v1701_v55  ;;  %v1726_v9 = vmul.f32 %v1724_v60, %v1715_v18  ;;  %v1725_v59 = vmul.f32 %v1720_v1, %v1713_v10 }
 0x728   : > { %v1707_v43 = vpop.permute.xlu1 %1706 }
 0x729   : > { %1966 = vmatmul.mubr.f32.gmra.mrb[62].mxu0 %v1700_v42  ;;  %v1716_v57 = vsel %vm1712_vm6, %v1711_v49, %v1707_v43  ;;  %v1714_v50 = vsel %vm1712_vm6, %v1707_v43, %v1711_v49 }
 0x72a   : > { %1970 = vmatprep.mubr.f32.mxu0 %v1703_v3  ;;  %v1728_v24 = vmul.f32 %v1724_v60, %v1716_v57  ;;  %v1727_v12 = vmul.f32 %v1720_v1, %v1714_v50 }
 0x72d   : > { %1971 = vmatmul.mubr.f32.gmra.mrb[64].mxu0 %v1702_v0 }
 0x72e   : > { %1975 = vmatprep.mubr.f32.mxu0 %v1726_v9 }
 0x731   : > { %1976 = vmatmul.mubr.f32.gmra.mrb[66].mxu0 %v1725_v59 }
 0x732   : > { %1980 = vmatprep.mubr.f32.mxu0 %v1728_v24 }
 0x735   : > { %1981 = vmatmul.mubr.f32.gmra.mrb[68].mxu0 %v1727_v12 }
 0x736   : > { %2058 = vmatprep.mubr.f32.mxu0 %v1987_v11 }
 0x78c   : > { %v1827_v63 = vpop.f32.mrb[6].mxu0 }
 0x78d   : > { %v1829_v13 = vpop.f32.mrb[7].mxu0 }
 0x790   : > { %v1832_v14 = vpop.f32.mrb[8].mxu0 }
 0x791   : > { %v4926_v15 = vpack.c.bf16 %v1832_v14, %v1827_v63  ;;  %v1834_v19 = vpop.f32.mrb[9].mxu0 }
 0x794   : > { %v1837_v16 = vpop.f32.mrb[10].mxu0 }
 0x795   : > { %v1839_v17 = vpop.f32.mrb[11].mxu0 }
 0x798   : > { %v1842_v20 = vpop.f32.mrb[12].mxu0 }
 0x799   : > { %v4930_v5 = vpack.c.bf16 %v1842_v20, %v1837_v16  ;;  %v1844_v21 = vpop.f32.mrb[13].mxu0 }
 0x79c   : > { %v1847_v22 = vpop.f32.mrb[14].mxu0 }
 0x79d   : > { %v1849_v23 = vpop.f32.mrb[15].mxu0 }
 0x7a0   : > { %v1852_v28 = vpop.f32.mrb[16].mxu0 }
 0x7a1   : > { %v4934_v29 = vpack.c.bf16 %v1852_v28, %v1847_v22  ;;  %v1854_v30 = vpop.f32.mrb[17].mxu0 }
 0x7a4   : > { %v1857_v32 = vpop.f32.mrb[18].mxu0 }
 0x7a5   : > { %v1859_v31 = vpop.f32.mrb[19].mxu0 }
 0x7a8   : > { %v1862_v34 = vpop.f32.mrb[20].mxu0 }
 0x7a9   : > { %v4938_v35 = vpack.c.bf16 %v1862_v34, %v1857_v32  ;;  %v1864_v36 = vpop.f32.mrb[21].mxu0 }
 0x7ac   : > { %v1867_v37 = vpop.f32.mrb[22].mxu0 }
 0x7ad   : > { %v1869_v38 = vpop.f32.mrb[23].mxu0 }
 0x7ae   : > { %v1989_v38 = vld [vmem:[%s7048_s6 + $0x18] sm:$0xff] }
 0x7b0   : > { %v1872_v39 = vpop.f32.mrb[24].mxu0 }
 0x7b1   : > { %v4942_v40 = vpack.c.bf16 %v1872_v39, %v1867_v37  ;;  %v1874_v58 = vpop.f32.mrb[25].mxu0  ;;  %v1986_v37 = vld [vmem:[%s7048_s6] sm:$0xff]  ;;  %v1988_v39 = vld [vmem:[%s7048_s6 + $0x10] sm:$0xff] }
 0x7b2   : > { %v1990_v58 = vld [vmem:[%s7048_s6 + $0x20] sm:$0xff] }
 0x7b4   : > { %v1877_v41 = vpop.f32.mrb[26].mxu0 }
 0x7b5   : > { %v1879_v51 = vpop.f32.mrb[27].mxu0 }
 0x7b6   : > { %v1992_v51 = vld [vmem:[%s7048_s6 + $0x30] sm:$0xff] }
 0x7b8   : > { %v1882_v44 = vpop.f32.mrb[28].mxu0 }
 0x7b9   : > { %v4946_v7 = vpack.c.bf16 %v1882_v44, %v1877_v41  ;;  %v1884_v33 = vpop.f32.mrb[29].mxu0  ;;  %v1993_v41 = vld [vmem:[%s7048_s6 + $0x38] sm:$0xff]  ;;  %v2086_v44 = vpop.permute.xlu1 %2085 }
 0x7ba   : > { %v2091_v33 = vpop.permute.xlu0 %2090 }
 0x7bc   : > { %v1887_v45 = vpop.f32.mrb[30].mxu0 }
 0x7bd   : > { %v1889_v46 = vpop.f32.mrb[31].mxu0 }
 0x7c0   : > { %v1892_v52 = vpop.f32.mrb[32].mxu0 }
 0x7c1   : > { %v4950_v47 = vpack.c.bf16 %v1892_v52, %v1887_v45  ;;  %v1894_v4 = vpop.f32.mrb[33].mxu0 }
 0x7c4   : > { %v1897_v48 = vpop.f32.mrb[34].mxu0 }
 0x7c5   : > { %v1899_v55 = vpop.f32.mrb[35].mxu0 }
 0x7c8   : > { %v1902_v53 = vpop.f32.mrb[36].mxu0 }
 0x7c9   : > { %v4954_v56 = vpack.c.bf16 %v1902_v53, %v1897_v48  ;;  %v1904_v61 = vpop.f32.mrb[37].mxu0  ;;  %v2096_v53 = vpop.permute.xlu0 %2095 }
 0x7cc   : > { %v1907_v42 = vpop.f32.mrb[38].mxu0 }
 0x7cd   : > { %v1909_v62 = vpop.f32.mrb[39].mxu0 }
 0x7d0   : > { %v1912_v3 = vpop.f32.mrb[40].mxu0 }
 0x7d1   : > { %v4924_v60 = vpack.c.bf16 %v1912_v3, %v1907_v42  ;;  %v1914_v18 = vpop.f32.mrb[41].mxu0 }
 0x7d3   : > { %4925 = vmatprep.subr.bf16.mxu0 %v4924_v60 }
 0x7d4   : > { %v1917_v43 = vpop.f32.mrb[42].mxu0  ;;  %4927 = vmatpush3.bf16.msra.mxu0 %v4926_v15 }
 0x7d5   : > { %v1919_v0 = vpop.f32.mrb[43].mxu0 }
 0x7d8   : > { %v1922_v1 = vpop.f32.mrb[44].mxu0 }
 0x7d9   : > { %v4928_v49 = vpack.c.bf16 %v1922_v1, %v1917_v43  ;;  %v1924_v10 = vpop.f32.mrb[45].mxu0 }
 0x7db   : > { %4929 = vmatprep.subr.bf16.mxu0 %v4928_v49 }
 0x7dc   : > { %v1927_v9 = vpop.f32.mrb[46].mxu0  ;;  %4931 = vmatpush3.bf16.msra.mxu0 %v4930_v5 }
 0x7dd   : > { %v1929_v57 = vpop.f32.mrb[47].mxu0 }
 0x7e0   : > { %v1932_v59 = vpop.f32.mrb[48].mxu0 }
 0x7e1   : > { %v4932_v50 = vpack.c.bf16 %v1932_v59, %v1927_v9  ;;  %v1934_v24 = vpop.f32.mrb[49].mxu0  ;;  %v2117_v9 = vpop.permute.xlu0 %2116 }
 0x7e3   : > { %4933 = vmatprep.subr.bf16.mxu0 %v4932_v50 }
 0x7e4   : > { %v1937_v12 = vpop.f32.mrb[50].mxu0  ;;  %4935 = vmatpush3.bf16.msra.mxu0 %v4934_v29 }
 0x7e5   : > { %v1939_v63 = vpop.f32.mrb[51].mxu0 }
 0x7e8   : > { %v1942_v11 = vpop.f32.mrb[52].mxu0 }
 0x7e9   : > { %v4936_v13 = vpack.c.bf16 %v1942_v11, %v1937_v12  ;;  %v1944_v14 = vpop.f32.mrb[53].mxu0 }
 0x7eb   : > { %4937 = vmatprep.subr.bf16.mxu0 %v4936_v13 }
 0x7ec   : > { %v1947_v15 = vpop.f32.mrb[54].mxu0  ;;  %4939 = vmatpush3.bf16.msra.mxu0 %v4938_v35 }
 0x7ed   : > { %v1949_v19 = vpop.f32.mrb[55].mxu0 }
 0x7f0   : > { %v1952_v16 = vpop.f32.mrb[56].mxu0 }
 0x7f1   : > { %v4940_v17 = vpack.c.bf16 %v1952_v16, %v1947_v15  ;;  %v1954_v20 = vpop.f32.mrb[57].mxu0 }
 0x7f3   : > { %4941 = vmatprep.subr.bf16.mxu0 %v4940_v17 }
 0x7f4   : > { %v1957_v5 = vpop.f32.mrb[58].mxu0  ;;  %4943 = vmatpush3.bf16.msra.mxu0 %v4942_v40  ;;  %v1991_v40 = vld [vmem:[%s7048_s6 + $0x28] sm:$0xff] }
 0x7f5   : > { %v1959_v21 = vpop.f32.mrb[59].mxu0 }
 0x7f8   : > { %v1962_v8 = vpop.f32.mrb[60].mxu0 }
 0x7f9   : > { %v4944_v22 = vpack.c.bf16 %v1962_v8, %v1957_v5  ;;  %v1964_v23 = vpop.f32.mrb[61].mxu0 }
 0x7fb   : > { %4945 = vmatprep.subr.bf16.mxu0 %v4944_v22 }
 0x7fc   : > { %v1967_v26 = vpop.f32.mrb[62].mxu0  ;;  %4947 = vmatpush3.bf16.msra.mxu0 %v4946_v7  ;;  %v2109_v7 = vpop.permute.xlu1 %2108 }
 0x7fd   : > { %v1969_v27 = vpop.f32.mrb[63].mxu0 }
 0x7fe   : > { %v2139_v27 = vld [vmem:[%s7052_s10] sm:$0x3] }
 0x800   : > { %v1972_v28 = vpop.f32.mrb[64].mxu0  ;;  %v2113_v48 = vpop.permute.xlu1 %2112 }
 0x801   : > { %v4948_v29 = vpack.c.bf16 %v1972_v28, %v1967_v26  ;;  %v1974_v30 = vpop.f32.mrb[65].mxu0  ;;  %v5309_v28 = vmov 32  }
 0x802   : > { %5220 = vset.pattern.permute.xlu0 %v5309_v28 }
 0x803   : > { %4949 = vmatprep.subr.bf16.mxu0 %v4948_v29 }
 0x804   : > { %v1977_v32 = vpop.f32.mrb[66].mxu0  ;;  %4951 = vmatpush3.bf16.msra.mxu0 %v4950_v47  ;;  %v2101_v18 = vpop.permute.xlu1 %2100 }
 0x805   : > { %v1979_v31 = vpop.f32.mrb[67].mxu0 }
 0x808   : > { %v1982_v34 = vpop.f32.mrb[68].mxu0  ;;  %v2121_v14 = vpop.permute.xlu1 %2120 }
 0x809   : > { %v4952_v35 = vpack.c.bf16 %v1982_v34, %v1977_v32  ;;  %v1984_v36 = vpop.f32.mrb[69].mxu0 }
 0x80b   : > { %4953 = vmatprep.subr.bf16.mxu0 %v4952_v35 }
 0x80c   : > { %4955 = vmatpush3.bf16.msra.mxu0 %v4954_v56 }
 0x80d   : > { %4962 = vmatprep.subr.bf16.mxu0 %v5297_v54 }
 0x80f   : > { %2059 = vmatmul.mubr.f32.vlgmr.msra.gmra.mrb[70].mxu0 %v1986_v37 }
 0x810   : > { %2063 = vmatprep.mubr.f32.mxu0 %v1989_v38 }
 0x813   : > { %2064 = vmatmul.mubr.f32.gmra.mrb[72].mxu0 %v1988_v39 }
 0x814   : > { %2068 = vmatprep.mubr.f32.mxu0 %v1991_v40 }
 0x817   : > { %2069 = vmatmul.mubr.f32.gmra.mrb[74].mxu0 %v1990_v58 }
 0x818   : > { %2073 = vmatprep.mubr.f32.mxu0 %v1993_v41 }
 0x81b   : > { %2074 = vmatmul.mubr.f32.gmra.mrb[76].mxu0 %v1992_v51 }
 0x81c   : > { %4456 = vmatprep.mubr.msk.f32.mxu0 %vm5298_vm13, %v5294_v2 }
 0x8e2   : > { %v4228_v45 = vpop.f32.mrb[70].mxu0 }
 0x8e3   : > { %v4229_v46 = vpop.f32.mrb[71].mxu0 }
 0x8e4   : > { %v4230_v52 = vadd.f32 %v4229_v46, %v4228_v45  ;;  %v2140_v46 = vld [vmem:[%s7053_s11] sm:$0xff] }
 0x8e6   : > { %v4231_v47 = vpop.f32.mrb[72].mxu0  ;;  %v2103_v4 = vmul.f32 %v4230_v52, %v2086_v44  ;;  %v5310_v52 = vmov 2  }
 0x8e7   : > { %v4232_v55 = vpop.f32.mrb[73].mxu0  ;;  %5221 = vset.pattern.permute.xlu1 %v5310_v52  ;;  %v2484_v52 = vld [vmem:[%s7054_s12 + $0x40] sm:$0xff] }
 0x8e8   : > { %v2123_v56 = vadd.f32 %v2109_v7, %v2103_v4  ;;  %v4233_v61 = vadd.f32 %v4232_v55, %v4231_v47  ;;  %v2141_v47 = vld [vmem:[%s7053_s11 + $0x8] sm:$0xff]  ;;  %v2142_v4 = vld [vmem:[%s7053_s11 + $0x10] sm:$0xff] }
 0x8ea   : > { %v2131_v42 = vmul.f32 0.2, %v2123_v56  ;;  %v2104_v62 = vmul.f32 %v4233_v61, %v2091_v33  ;;  %v4234_v3 = vpop.f32.mrb[74].mxu0  ;;  %vm2127_vm7 = vcmp.ge.f32.partialorder %v2123_v56, 0.0 }
 0x8eb   : > { %v4235_v60 = vpop.f32.mrb[75].mxu0 }
 0x8ec   : > { %v2124_v43 = vadd.f32 %v2113_v48, %v2104_v62  ;;  %v4236_v0 = vadd.f32 %v4235_v60, %v4234_v3  ;;  %v6517_v1 = vsel %vm2127_vm7, %v2123_v56, %v2131_v42  ;;  %v2143_v48 = vld [vmem:[%s7053_s11 + $0x18] sm:$0xff] }
 0x8ed   : > { %v2162_v49 = vsel %vm2144_vm9, %v6517_v1, -inf  ;;  %v2145_v10 = vsel %vm2144_vm9, %v6517_v1, 0.0 }
 0x8ee   : > { %v2132_v57 = vmul.f32 0.2, %v2124_v43  ;;  %v4237_v59 = vpop.f32.mrb[76].mxu0  ;;  %2163 = vmax.xlane.f32.xlu0 %v2162_v49  ;;  %2146 = vadd.xlane.f32.xlu1 %v2145_v10  ;;  %v2105_v50 = vmul.f32 %v4236_v0, %v2096_v53  ;;  %vm2128_vm10 = vcmp.ge.f32.partialorder %v2124_v43, 0.0 }
 0x8ef   : > { %v4238_v24 = vpop.f32.mrb[77].mxu0 }
 0x8f0   : > { %v4239_v12 = vadd.f32 %v4238_v24, %v4237_v59  ;;  %v6523_v63 = vsel %vm2128_vm10, %v2124_v43, %v2132_v57  ;;  %v2125_v11 = vadd.f32 %v2117_v9, %v2105_v50 }
 0x8f1   : > { %v2148_v13 = vsel %vm2144_vm9, %v6523_v63, 0.0  ;;  %v2165_v15 = vsel %vm2144_vm9, %v6523_v63, -inf }
 0x8f2   : > { %2149 = vadd.xlane.f32.xlu0 %v2148_v13  ;;  %v2133_v19 = vmul.f32 0.2, %v2125_v11  ;;  %v2106_v16 = vmul.f32 %v4239_v12, %v2101_v18  ;;  %2166 = vmax.xlane.f32.xlu1 %v2165_v15  ;;  %vm2129_vm11 = vcmp.ge.f32.partialorder %v2125_v11, 0.0 }
 0x8f4   : > { %v2126_v17 = vadd.f32 %v2121_v14, %v2106_v16  ;;  %v6529_v20 = vsel %vm2129_vm11, %v2125_v11, %v2133_v19 }
 0x8f5   : > { %v2151_v5 = vsel %vm2144_vm9, %v6529_v20, 0.0  ;;  %v2168_v23 = vsel %vm2144_vm9, %v6529_v20, -inf }
 0x8f6   : > { %vm2130_vm12 = vcmp.ge.f32.partialorder %v2126_v17, 0.0  ;;  %v2134_v21 = vmul.f32 0.2, %v2126_v17  ;;  %2152 = vadd.xlane.f32.xlu0 %v2151_v5 }
 0x8f8   : > { %v6533_v8 = vsel %vm2130_vm12, %v2126_v17, %v2134_v21 }
 0x8f9   : > { %v2154_v22 = vsel %vm2144_vm9, %v6533_v8, 0.0  ;;  %v2171_v26 = vsel %vm2144_vm9, %v6533_v8, -inf }
 0x8fa   : > { %2155 = vadd.xlane.f32.xlu1 %v2154_v22  ;;  %2169 = vmax.xlane.f32.xlu0 %v2168_v23 }
 0x8fe   : > { %2172 = vmax.xlane.f32.xlu1 %v2171_v26 }
 0x90f   : > { %2259 = vperm.xlu1 %5221, %v2140_v46  }
 0x910   : > { %2180 = vperm.xlu0 %5220, %v2139_v27  }
 0x913   : > { %2264 = vperm.xlu1 %5221, %v2141_v47  }
 0x914   : > { %5222 = vset.pattern.permute.xlu0 %v5301_v25 }
 0x917   : > { %2269 = vperm.xlu1 %5221, %v2142_v4  }
 0x91b   : > { %2274 = vperm.xlu1 %5221, %v2143_v48  }
 0x91f   : > { %5223 = vset.pattern.permute.xlu1 %v5301_v25 }
 0x97b   : > { %v2164_v29 = vpop.xlane.xlu0 %2163  ;;  %v2147_v30 = vpop.xlane.xlu1 %2146 }
 0x97c   : > { %v2158_v32 = vmul.f32 0.015625, %v2147_v30 }
 0x97e   : > { %v2174_v36 = vsel %vm804_vm14, %v2158_v32, %v2164_v29 }
 0x97f   : > { %v2150_v31 = vpop.xlane.xlu0 %2149  ;;  %v2167_v35 = vpop.xlane.xlu1 %2166 }
 0x980   : > { %v2159_v34 = vmul.f32 0.015625, %v2150_v31 }
 0x982   : > { %v2175_v37 = vsel %vm804_vm14, %v2159_v34, %v2167_v35 }
 0x983   : > { %v4957_v38 = vpack.c.bf16 %v2175_v37, %v2174_v36  ;;  %v2153_v39 = vpop.xlane.xlu0 %2152  ;;  %v2476_v37 = vld [vmem:[%s7054_s12] sm:$0xff] }
 0x984   : > { %v2160_v41 = vmul.f32 0.015625, %v2153_v39  ;;  %v2478_v39 = vld [vmem:[%s7054_s12 + $0x10] sm:$0xff] }
 0x985   : > { %4958 = vmatpush3.bf16.msra.mxu1 %v4957_v38  ;;  %v2477_v38 = vld [vmem:[%s7054_s12 + $0x8] sm:$0xff] }
 0x986   : > { %4959 = vmatprep.subr.bf16.mxu1 %v5297_v54 }
 0x987   : > { %v2156_v40 = vpop.xlane.xlu1 %2155  ;;  %v2170_v58 = vpop.xlane.xlu0 %2169 }
 0x988   : > { %v2161_v51 = vmul.f32 0.015625, %v2156_v40  ;;  %v2176_v7 = vsel %vm804_vm14, %v2160_v41, %v2170_v58  ;;  %v4963_v40 = vpack.c.bf16 %v2477_v38, %v2476_v37  ;;  %v2479_v58 = vld [vmem:[%s7054_s12 + $0x18] sm:$0xff]  ;;  %v2493_v37 = vstv %s4095_s29 }
 0x989   : > { %v4966_v41 = vpack.c.bf16 %v2479_v58, %v2478_v39 }
 0x98a   : > { %4964 = vmatpush3.bf16.msra.mxu0 %v4963_v40 }
 0x98b   : > { %v2173_v44 = vpop.xlane.xlu1 %2172  ;;  %4965 = vmatprep.subr.bf16.mxu0 %v5297_v54 }
 0x98c   : > { %v2177_v33 = vsel %vm804_vm14, %v2161_v51, %v2173_v44  ;;  %vm2286_vm14 = vcmask 1041408   ;;  %v2480_v51 = vld [vmem:[%s7054_s12 + $0x20] sm:$0xff]  ;;  %v2481_v44 = vld [vmem:[%s7054_s12 + $0x28] sm:$0xff] }
 0x98d   : > { %v4960_v45 = vpack.c.bf16 %v2177_v33, %v2176_v7  ;;  %v4969_v7 = vpack.c.bf16 %v2481_v44, %v2480_v51  ;;  %v2482_v33 = vld [vmem:[%s7054_s12 + $0x30] sm:$0xff] }
 0x98e   : > { %4967 = vmatpush3.bf16.msra.mxu0 %v4966_v41 }
 0x98f   : > { %4961 = vmatpush3.bf16.msra.mxu1 %v4960_v45  ;;  %v2181_v55 = vpop.permute.xlu0 %2180  ;;  %v2260_v25 = vpop.permute.xlu1 %2259  ;;  %4968 = vmatprep.subr.bf16.mxu0 %v5297_v54  ;;  %v2483_v45 = vld [vmem:[%s7054_s12 + $0x38] sm:$0xff] }
 0x992   : > { %4414 = vmatmul.mubr.msk.f32.vlgmr.msra.gmra.mrb[4].mxu1 %vm2183_vm15, %v2139_v27  ;;  %4970 = vmatpush3.bf16.msra.mxu0 %v4969_v7 }
 0x993   : > { %4418 = vmatprep.mubr.msk.f32.mxu1 %vm2277_vm8, %v2140_v46  ;;  %v2265_v62 = vpop.permute.xlu1 %2264  ;;  %v4972_v46 = vpack.c.bf16 %v2483_v45, %v2482_v33  ;;  %4971 = vmatprep.subr.bf16.mxu0 %v5297_v54 }
 0x996   : > { %4973 = vmatpush3.bf16.msra.mxu0 %v4972_v46 }
 0x997   : > { %v2270_v3 = vpop.permute.xlu1 %2269  ;;  %4974 = vmatprep.subr.bf16.mxu0 %v5297_v54 }
 0x99b   : > { %v2275_v49 = vpop.permute.xlu1 %2274 }
 0xa65   : > { %v2252_v53 = vpop.f32.mrb[4].mxu1 }
 0xa66   : > { %v2253_v56 = vadd.f32 %v2252_v53, %v2181_v55  ;;  %v4415_v61 = vpop.f32.mrb[5].mxu1  ;;  %v2487_v55 = vld [vmem:[%s7054_s12 + $0x58] sm:$0xff] }
 0xa67   : > { %v2489_v61 = vld [vmem:[%s7054_s12 + $0x68] sm:$0xff] }
 0xa68   : > { %v2256_v42 = vmax.f32 %v2253_v56, 0.0  ;;  %v2488_v56 = vld [vmem:[%s7054_s12 + $0x60] sm:$0xff] }
 0xa6a   : > { %4416 = vmatprep.subr.msk.mxu1 %vm2286_vm14, %v2256_v42 }
 0xa6b   : > { %4417 = vmatpush3.msk.msra.mxu1 %vm2286_vm14, %v2256_v42  ;;  %v4981_v42 = vpack.c.bf16 %v2489_v61, %v2488_v56  ;;  %v4098_v56 = vld [vmem:[%s7055_s13 + $0x8] sm:$0xff]  ;;  %v4121_v61 = vld [vmem:[%s7055_s13 + $0x18] sm:$0xff] }
 0xa6c   : > { %4419 = vmatmul.mubr.msk.f32.vlgmr.msra.gmra.mrb[6].mxu1 %vm2277_vm8, %v2141_v47  ;;  %4986 = vmatprep.subr.bf16.mxu1 %v5297_v54  ;;  %v2485_v47 = vld [vmem:[%s7054_s12 + $0x48] sm:$0xff] }
 0xa6d   : > { %4421 = vmatprep.mubr.msk.f32.mxu1 %vm2277_vm8, %v2142_v4  ;;  %v4975_v4 = vpack.c.bf16 %v2485_v47, %v2484_v52 }
 0xa6f   : > { %4976 = vmatpush3.bf16.msra.mxu0 %v4975_v4 }
 0xa70   : > { %4422 = vmatmul.mubr.msk.f32.gmra.mrb[8].mxu1 %vm2277_vm8, %v2143_v48  ;;  %v2486_v48 = vld [vmem:[%s7054_s12 + $0x50] sm:$0xff]  ;;  %4977 = vmatprep.subr.bf16.mxu0 %v5297_v54 }
 0xa71   : > { %4467 = vmatprep.mubr.msk.f32.mxu1 %vm5298_vm13, %v5294_v2  ;;  %v4978_v53 = vpack.c.bf16 %v2487_v55, %v2486_v48  ;;  %v4110_v48 = vld [vmem:[%s7055_s13 + $0x10] sm:$0xff]  ;;  %v4100_v55 = vld [vmem:[%s7056_s14 + $0x40] sm:$0xff] }
 0xa73   : > { %4979 = vmatpush3.bf16.msra.mxu0 %v4978_v53  ;;  %v4101_v53 = vld [vmem:[%s7056_s14 + $0x48] sm:$0xff] }
 0xa74   : > { %4980 = vmatprep.subr.bf16.mxu0 %v5297_v54 }
 0xa77   : > { %4982 = vmatpush3.bf16.msra.mxu0 %v4981_v42  ;;  %v4999_v42 = vpack.c.bf16 %v4101_v53, %v4100_v55 }
 0xa78   : > { %4983 = vmatprep.subr.bf16.mxu0 %v5297_v54 }
 0xb3f   : > { %v4420_v60 = vpop.f32.mrb[6].mxu1 }
 0xb40   : > { %v2362_v18 = vadd.f32 %v4420_v60, %v2265_v62  ;;  %v2356_v43 = vpop.f32.mrb[7].mxu1  ;;  %v2491_v62 = vld [vmem:[%s7054_s12 + $0x78] sm:$0xff] }
 0xb41   : > { %v2357_v10 = vadd.f32 %v2356_v43, %v2260_v25  ;;  %v2490_v25 = vld [vmem:[%s7054_s12 + $0x70] sm:$0xff] }
 0xb42   : > { %2381 = vrot.lane.b32.xlu1 %v2362_v18, %s7076_s19 }
 0xb43   : > { %v4423_v0 = vpop.f32.mrb[8].mxu1 }
 0xb44   : > { %v2372_v9 = vadd.f32 %v4423_v0, %v2275_v49  ;;  %v2366_v57 = vpop.f32.mrb[9].mxu1 }
 0xb45   : > { %v2367_v59 = vadd.f32 %v2366_v57, %v2270_v3  ;;  %v4984_v3 = vpack.c.bf16 %v2491_v62, %v2490_v25  ;;  %v4102_v25 = vld [vmem:[%s7056_s14 + $0x50] sm:$0xff]  ;;  %v4103_v62 = vld [vmem:[%s7056_s14 + $0x58] sm:$0xff] }
 0xb46   : > { %2379 = vrot.lane.b32.xlu1 %v2357_v10, %s7076_s19  ;;  %2385 = vrot.lane.b32.xlu0 %v2372_v9, %s7076_s19 }
 0xb47   : > { %4985 = vmatpush3.bf16.msra.mxu0 %v4984_v3  ;;  %v5002_v3 = vpack.c.bf16 %v4103_v62, %v4102_v25  ;;  %v4129_v62 = vld [vmem:[%s7056_s14 + $0xf0] sm:$0xff] }
 0xb48   : > { %5022 = vmatprep.subr.bf16.mxu0 %v5297_v54 }
 0xb4a   : > { %2383 = vrot.lane.b32.xlu1 %v2367_v59, %s7076_s19 }
 0xbb4   : > { %v2382_v50 = vpop.permute.xlu1 %2381 }
 0xbb5   : > { %v2392_v24 = vadd.f32 %v2382_v50, %v2362_v18 }
 0xbb7   : > { %v4092_v12 = vmul.f32 -1.442695, %v2392_v24 }
 0xbb8   : > { %v2386_v11 = vpop.permute.xlu0 %2385  ;;  %v2380_v13 = vpop.permute.xlu1 %2379 }
 0xbb9   : > { %5240 = vpow2.f32 %v4092_v12  ;;  %v2391_v14 = vadd.f32 %v2380_v13, %v2357_v10  ;;  %v2394_v15 = vadd.f32 %v2386_v11, %v2372_v9 }
 0xbbb   : > { %v4091_v19 = vmul.f32 -1.442695, %v2391_v14  ;;  %v4094_v5 = vmul.f32 -1.442695, %v2394_v15 }
 0xbbc   : > { %v2384_v16 = vpop.permute.xlu1 %2383 }
 0xbbd   : > { %v2393_v17 = vadd.f32 %v2384_v16, %v2367_v59  ;;  %5242 = vpow2.f32 %v4091_v19 }
 0xbbf   : > { %v4093_v21 = vmul.f32 -1.442695, %v2393_v17 }
 0xbc1   : > { %5244 = vpow2.f32 %v4093_v21 }
 0xbc2   : > { %5246 = vpow2.f32 %v4094_v5 }
 0xbc3   : > { %v5241_v22 = vpop.eup %5240 }
 0xbc4   : > { %v2408_v23 = vadd.f32 1.0, %v5241_v22 }
 0xbc6   : > { %5248 = vrcp.f32 %v2408_v23 }
 0xbc7   : > { %v5243_v26 = vpop.eup %5242 }
 0xbc8   : > { %v2407_v27 = vadd.f32 1.0, %v5243_v26 }
 0xbca   : > { %5250 = vrcp.f32 %v2407_v27 }
 0xbcb   : > { %v5245_v28 = vpop.eup %5244 }
 0xbcc   : > { %v5247_v29 = vpop.eup %5246  ;;  %v2409_v30 = vadd.f32 1.0, %v5245_v28 }
 0xbcd   : > { %v2410_v32 = vadd.f32 1.0, %v5247_v29 }
 0xbce   : > { %5252 = vrcp.f32 %v2409_v30 }
 0xbcf   : > { %5254 = vrcp.f32 %v2410_v32 }
 0xbd0   : > { %v5249_v31 = vpop.eup %5248 }
 0xbd1   : > { %2426 = vperm.xlu0 %5222, %v5249_v31  }
 0xbd4   : > { %v5251_v34 = vpop.eup %5250 }
 0xbd5   : > { %2421 = vperm.xlu1 %5223, %v5251_v34  }
 0xbd8   : > { %v5253_v35 = vpop.eup %5252 }
 0xbd9   : > { %2431 = vperm.xlu1 %5223, %v5253_v35   ;;  %v5255_v36 = vpop.eup %5254 }
 0xbdd   : > { %2436 = vperm.xlu1 %5223, %v5255_v36  }
 0xc50   : > { %v2427_v18 = vpop.permute.xlu0 %2426 }
 0xc51   : > { %v2440_v49 = vmul.f32 %v2427_v18, %v6523_v63  ;;  %v4105_v18 = vld [vmem:[%s7056_s14 + $0x68] sm:$0xff] }
 0xc53   : > { %v2459_v50 = vsel %vm2144_vm9, %v2440_v49, -inf }
 0xc54   : > { %v2422_v60 = vpop.permute.xlu1 %2421 }
 0xc55   : > { %v2439_v0 = vmul.f32 %v2422_v60, %v6517_v1  ;;  %v4104_v60 = vld [vmem:[%s7056_s14 + $0x60] sm:$0xff] }
 0xc57   : > { %v2458_v57 = vsel %vm2144_vm9, %v2439_v0, -inf  ;;  %v2443_v17 = vsel %vm2144_vm9, %v2439_v0, 0.0 }
 0xc58   : > { %v2432_v43 = vpop.permute.xlu1 %2431  ;;  %v2462_v11 = vmax.f32 %v2458_v57, %v2459_v50  ;;  %v4143_v57 = vld [vmem:[%s7055_s13 + $0x28] sm:$0xff]  ;;  %v4165_v50 = vld [vmem:[%s7055_s13 + $0x38] sm:$0xff] }
 0xc59   : > { %v2441_v10 = vmul.f32 %v2432_v43, %v6529_v20  ;;  %v4132_v43 = vld [vmem:[%s7055_s13 + $0x20] sm:$0xff] }
 0xc5b   : > { %v2460_v24 = vsel %vm2144_vm9, %v2441_v10, -inf  ;;  %v2446_v5 = vsel %vm2144_vm9, %v2441_v10, 0.0 }
 0xc5c   : > { %v2437_v9 = vpop.permute.xlu1 %2436 }
 0xc5d   : > { %v2442_v59 = vmul.f32 %v2437_v9, %v6533_v8  ;;  %v2444_v8 = vsel %vm2144_vm9, %v2440_v49, 0.0 }
 0xc5e   : > { %v2445_v21 = vadd.f32 %v2444_v8, %v2443_v17 }
 0xc5f   : > { %v2461_v12 = vsel %vm2144_vm9, %v2442_v59, -inf  ;;  %v2448_v22 = vsel %vm2144_vm9, %v2442_v59, 0.0 }
 0xc60   : > { %v2463_v13 = vmax.f32 %v2460_v24, %v2461_v12  ;;  %v2447_v23 = vadd.f32 %v2446_v5, %v2445_v21  ;;  %v4176_v24 = vld [vmem:[%s7055_s13 + $0x40] sm:$0xff] }
 0xc62   : > { %v2464_v14 = vmax.f32 %v2462_v11, %v2463_v13  ;;  %v2449_v26 = vadd.f32 %v2448_v22, %v2447_v23  ;;  %v2656_v22 = vld [vmem:[%s7056_s14 + $0x20] sm:$0xff]  ;;  %v2657_v23 = vld [vmem:[%s7056_s14 + $0x28] sm:$0xff] }
 0xc64   : > { %v2465_v15 = vrot.slane %v2464_v14, 4  ;;  %v2450_v27 = vrot.slane %v2449_v26, 4 }
 0xc66   : > { %v2466_v1 = vmax.f32 %v2464_v14, %v2465_v15  ;;  %v2451_v28 = vadd.f32 %v2450_v27, %v2449_v26  ;;  %v2652_v15 = vld [vmem:[%s7056_s14] sm:$0xff]  ;;  %v5017_v26 = vpack.c.bf16 %v2657_v23, %v2656_v22  ;;  %v2658_v27 = vld [vmem:[%s7056_s14 + $0x30] sm:$0xff]  ;;  %v4152_v22 = vld [vmem:[%s7056_s14 + $0x178] sm:$0xff] }
 0xc68   : > { %v2467_v19 = vrot.slane %v2466_v1, 2  ;;  %v2452_v29 = vrot.slane %v2451_v28, 2 }
 0xc6a   : > { %v2468_v63 = vmax.f32 %v2466_v1, %v2467_v19  ;;  %v2453_v30 = vadd.f32 %v2452_v29, %v2451_v28  ;;  %v2653_v1 = vld [vmem:[%s7056_s14 + $0x8] sm:$0xff]  ;;  %v2659_v28 = vld [vmem:[%s7056_s14 + $0x38] sm:$0xff] }
 0xc6b   : > { %v5011_v19 = vpack.c.bf16 %v2653_v1, %v2652_v15  ;;  %v4145_v15 = vld [vmem:[%s7056_s14 + $0x140] sm:$0xff]  ;;  %v4146_v1 = vld [vmem:[%s7056_s14 + $0x148] sm:$0xff] }
 0xc6c   : > { %v2469_v16 = vrot.slane %v2468_v63, 1  ;;  %v2454_v32 = vrot.slane %v2453_v30, 1 }
 0xc6e   : > { %v2470_v20 = vmax.f32 %v2468_v63, %v2469_v16  ;;  %v2455_v31 = vadd.f32 %v2454_v32, %v2453_v30  ;;  %v2654_v63 = vld [vmem:[%s7056_s14 + $0x10] sm:$0xff]  ;;  %v2655_v16 = vld [vmem:[%s7056_s14 + $0x18] sm:$0xff]  ;;  %v5020_v32 = vpack.c.bf16 %v2659_v28, %v2658_v27  ;;  %v4157_v27 = vld [vmem:[%s7056_s14 + $0x188] sm:$0xff] }
 0xc6f   : > { %v5014_v21 = vpack.c.bf16 %v2655_v16, %v2654_v63  ;;  %v4147_v63 = vld [vmem:[%s7056_s14 + $0x150] sm:$0xff]  ;;  %v4148_v16 = vld [vmem:[%s7056_s14 + $0x158] sm:$0xff] }
 0xc70   : > { %2472 = vrot.lane.b32.xlu0 %v2470_v20, %s5311_s23  ;;  %v2457_v34 = vmul.f32 0.03125, %v2455_v31  ;;  %v4112_v31 = vld [vmem:[%s7056_s14 + $0x80] sm:$0xff] }
 0xce2   : > { %v2473_v35 = vpop.permute.xlu0 %2472 }
 0xce3   : > { %v2475_v36 = vsel %vm2144_vm9, %v2457_v34, %v2473_v35  ;;  %v4113_v34 = vld [vmem:[%s7056_s14 + $0x88] sm:$0xff] }
 0xce4   : > { %4457 = vmatmul.mubr.f32.vlgmr.msra.gmra.mrb[78].mxu0 %v2475_v36  ;;  %v5029_v35 = vpack.c.bf16 %v4113_v34, %v4112_v31  ;;  %v4114_v36 = vld [vmem:[%s7056_s14 + $0x90] sm:$0xff]  ;;  %v4160_v31 = vld [vmem:[%s7056_s14 + $0x1a0] sm:$0xff]  ;;  %v4161_v34 = vld [vmem:[%s7056_s14 + $0x1a8] sm:$0xff] }
 0xce5   : > { %4527 = vmatprep.mubr.msk.f32.mxu0 %vm5298_vm13, %v5294_v2 }
 0xdb7   : > { %v2560_v38 = vpop.f32.mrb[78].mxu0 }
 0xdb8   : > { %v2561_v39 = vadd.f32 %v2560_v38, %v2493_v37  ;;  %v4458_v40 = vpop.f32.mrb[79].mxu0  ;;  %v4115_v37 = vld [vmem:[%s7056_s14 + $0x98] sm:$0xff] }
 0xdb9   : > { %v5032_v40 = vpack.c.bf16 %v4115_v37, %v4114_v36  ;;  %v4162_v36 = vld [vmem:[%s7056_s14 + $0x1b0] sm:$0xff]  ;;  %v4163_v37 = vld [vmem:[%s7056_s14 + $0x1b8] sm:$0xff] }
 0xdba   : > { %v4096_v58 = vmul.f32 -1.442695, %v2561_v39 }
 0xdbc   : > { %5256 = vpow2.f32 %v4096_v58  ;;  %v4116_v58 = vld [vmem:[%s7056_s14 + $0xa0] sm:$0xff] }
 0xdc6   : > { %v5257_v41 = vpop.eup %5256 }
 0xdc7   : > { %v2567_v51 = vadd.f32 1.0, %v5257_v41  ;;  %v4117_v41 = vld [vmem:[%s7056_s14 + $0xa8] sm:$0xff] }
 0xdc9   : > { %5258 = vrcp.f32 %v2567_v51  ;;  %v5035_v51 = vpack.c.bf16 %v4117_v41, %v4116_v58  ;;  %v4169_v41 = vld [vmem:[%s7056_s14 + $0x1d0] sm:$0xff] }
 0xdd3   : > { %v5259_v44 = vpop.eup %5258 }
 0xdd4   : > { %v2573_v7 = vrot.slane %v5259_v44, %v5467_v6  ;;  %v2578_v6 = vld [vmem:[%s7055_s13] sm:$0xff]  ;;  %v4118_v44 = vld [vmem:[%s7056_s14 + $0xb0] sm:$0xff] }
 0xdd6   : > { %v2574_v33 = vmul.f32 %v2573_v7, %v2439_v0  ;;  %v2575_v45 = vmul.f32 %v2573_v7, %v2440_v49  ;;  %v2576_v46 = vmul.f32 %v2573_v7, %v2441_v10  ;;  %v2577_v52 = vmul.f32 %v2573_v7, %v2442_v59  ;;  %v4106_v49 = vld [vmem:[%s7056_s14 + $0x70] sm:$0xff]  ;;  %v4107_v10 = vld [vmem:[%s7056_s14 + $0x78] sm:$0xff] }
 0xdd7   : > { %v5005_v0 = vpack.c.bf16 %v4105_v18, %v4104_v60  ;;  %v5008_v9 = vpack.c.bf16 %v4107_v10, %v4106_v49  ;;  %v4154_v59 = vld [vmem:[%s7055_s13 + $0x30] sm:$0xff]  ;;  %v4119_v7 = vld [vmem:[%s7056_s14 + $0xb8] sm:$0xff]  ;;  %v4135_v49 = vld [vmem:[%s7056_s14 + $0x108] sm:$0xff] }
 0xdd8   : > { %v6647_v47 = vpack.c.bf16 %v2575_v45, %v2574_v33  ;;  %v6653_v4 = vpack.c.bf16 %v2577_v52, %v2576_v46  ;;  %v5038_v46 = vpack.c.bf16 %v4119_v7, %v4118_v44  ;;  %v4123_v52 = vld [vmem:[%s7056_s14 + $0xc0] sm:$0xff] }
 0xdd9   : > { %v4171_v7 = vld [vmem:[%s7056_s14 + $0x1e0] sm:$0xff] }
 0xdda   : > { %4988 = vmatpush3.bf16.msra.mxu1 %v6647_v47  ;;  %5024 = vmatpush3.bf16.msra.mxu0 %v6647_v47 }
 0xddb   : > { %4989 = vmatprep.subr.bf16.mxu1 %v5297_v54  ;;  %5025 = vmatprep.subr.bf16.mxu0 %v5297_v54 }
 0xdde   : > { %4991 = vmatpush3.bf16.msra.mxu1 %v6653_v4  ;;  %5027 = vmatpush3.bf16.msra.mxu0 %v6653_v4 }
 0xddf   : > { %4992 = vmatprep.subr.bf16.mxu1 %v5297_v54  ;;  %5040 = vmatprep.subr.bf16.mxu0 %v5297_v54 }
 0xde1   : > { %4468 = vmatmul.mubr.msk.f32.vlgmr.msra.gmra.mrb[10].mxu1 %vm2183_vm15, %v2578_v6  ;;  %4528 = vmatmul.mubr.msk.f32.vlgmr.msra.gmra.mrb[80].mxu0 %vm2183_vm15, %v4110_v48  ;;  %v4125_v6 = vld [vmem:[%s7056_s14 + $0xd0] sm:$0xff]  ;;  %v4126_v48 = vld [vmem:[%s7056_s14 + $0xd8] sm:$0xff] }
 0xde2   : > { %4994 = vmatpush3.bf16.msra.mxu1 %v6647_v47  ;;  %5042 = vmatpush3.bf16.msra.mxu0 %v6647_v47 }
 0xde3   : > { %4995 = vmatprep.subr.bf16.mxu1 %v5297_v54  ;;  %5043 = vmatprep.subr.bf16.mxu0 %v5297_v54 }
 0xde4   : > { %4478 = vmatprep.mubr.msk.f32.mxu1 %vm5298_vm13, %v5294_v2  ;;  %4557 = vmatprep.mubr.msk.f32.mxu0 %vm5298_vm13, %v5294_v2 }
 0xde6   : > { %4997 = vmatpush3.bf16.msra.mxu1 %v6653_v4  ;;  %5045 = vmatpush3.bf16.msra.mxu0 %v6653_v4 }
 0xde7   : > { %5058 = vmatprep.subr.bf16.mxu0 %v5297_v54  ;;  %4998 = vmatprep.subr.bf16.mxu1 %v5297_v54 }
 0xde9   : > { %4479 = vmatmul.mubr.msk.f32.vlgmr.msra.gmra.mrb[12].mxu1 %vm2183_vm15, %v4098_v56  ;;  %4558 = vmatmul.mubr.msk.f32.vlgmr.msra.gmra.mrb[82].mxu0 %vm2183_vm15, %v4121_v61  ;;  %v5050_v56 = vpack.c.bf16 %v4126_v48, %v4125_v6  ;;  %v4127_v61 = vld [vmem:[%s7056_s14 + $0xe0] sm:$0xff]  ;;  %v4179_v6 = vld [vmem:[%s7056_s14 + $0x208] sm:$0xff] }
 0xdea   : > { %5060 = vmatpush3.bf16.msra.mxu0 %v6647_v47  ;;  %4587 = vmatprep.mubr.msk.f32.mxu0 %vm5298_vm13, %v5294_v2 }
 0xdeb   : > { %5061 = vmatprep.subr.bf16.mxu0 %v5297_v54  ;;  %5000 = vmatpush3.bf16.msra.mxu1 %v4999_v42  ;;  %v4128_v42 = vld [vmem:[%s7056_s14 + $0xe8] sm:$0xff] }
 0xdec   : > { %5001 = vmatprep.subr.bf16.mxu1 %v5297_v54  ;;  %4497 = vmatprep.mubr.msk.f32.mxu1 %vm5298_vm13, %v5294_v2  ;;  %v5053_v25 = vpack.c.bf16 %v4128_v42, %v4127_v61  ;;  %v4182_v42 = vld [vmem:[%s7056_s14 + $0x220] sm:$0xff] }
 0xdee   : > { %5063 = vmatpush3.bf16.msra.mxu0 %v6653_v4 }
 0xdef   : > { %5076 = vmatprep.subr.bf16.mxu0 %v5297_v54  ;;  %5003 = vmatpush3.bf16.msra.mxu1 %v5002_v3  ;;  %v4130_v3 = vld [vmem:[%s7056_s14 + $0xf8] sm:$0xff] }
 0xdf0   : > { %5004 = vmatprep.subr.bf16.mxu1 %v5297_v54 }
 0xdf1   : > { %4588 = vmatmul.mubr.msk.f32.vlgmr.msra.gmra.mrb[84].mxu0 %vm2183_vm15, %v4132_v43  ;;  %v5056_v43 = vpack.c.bf16 %v4130_v3, %v4129_v62 }
 0xdf2   : > { %5078 = vmatpush3.bf16.msra.mxu0 %v6647_v47  ;;  %4617 = vmatprep.mubr.msk.f32.mxu0 %vm5298_vm13, %v5294_v2 }
 0xdf3   : > { %5079 = vmatprep.subr.bf16.mxu0 %v5297_v54  ;;  %5006 = vmatpush3.bf16.msra.mxu1 %v5005_v0  ;;  %v4134_v0 = vld [vmem:[%s7056_s14 + $0x100] sm:$0xff] }
 0xdf4   : > { %5007 = vmatprep.subr.bf16.mxu1 %v5297_v54  ;;  %v5065_v10 = vpack.c.bf16 %v4135_v49, %v4134_v0 }
 0xdf6   : > { %5081 = vmatpush3.bf16.msra.mxu0 %v6653_v4 }
 0xdf7   : > { %5094 = vmatprep.subr.bf16.mxu0 %v5297_v54  ;;  %5009 = vmatpush3.bf16.msra.mxu1 %v5008_v9  ;;  %v4136_v9 = vld [vmem:[%s7056_s14 + $0x110] sm:$0xff] }
 0xdf8   : > { %5010 = vmatprep.subr.bf16.mxu1 %v5297_v54 }
 0xdf9   : > { %4618 = vmatmul.mubr.msk.f32.vlgmr.msra.gmra.mrb[86].mxu0 %vm2183_vm15, %v4143_v57  ;;  %v4137_v57 = vld [vmem:[%s7056_s14 + $0x118] sm:$0xff] }
 0xdfa   : > { %5096 = vmatpush3.bf16.msra.mxu0 %v6647_v47  ;;  %4647 = vmatprep.mubr.msk.f32.mxu0 %vm5298_vm13, %v5294_v2 }
 0xdfb   : > { %5097 = vmatprep.subr.bf16.mxu0 %v5297_v54 }
 0xdfe   : > { %5099 = vmatpush3.bf16.msra.mxu0 %v6653_v4 }
 0xdff   : > { %5112 = vmatprep.subr.bf16.mxu0 %v5297_v54 }
 0xe01   : > { %4648 = vmatmul.mubr.msk.f32.vlgmr.msra.gmra.mrb[88].mxu0 %vm2183_vm15, %v4154_v59  ;;  %v5068_v59 = vpack.c.bf16 %v4137_v57, %v4136_v9 }
 0xe02   : > { %5114 = vmatpush3.bf16.msra.mxu0 %v6647_v47  ;;  %4677 = vmatprep.mubr.msk.f32.mxu0 %vm5298_vm13, %v5294_v2 }
 0xe03   : > { %5115 = vmatprep.subr.bf16.mxu0 %v5297_v54 }
 0xe06   : > { %5117 = vmatpush3.bf16.msra.mxu0 %v6653_v4 }
 0xe07   : > { %5130 = vmatprep.subr.bf16.mxu0 %v5297_v54 }
 0xe09   : > { %4678 = vmatmul.mubr.msk.f32.vlgmr.msra.gmra.mrb[90].mxu0 %vm2183_vm15, %v4165_v50  ;;  %v4138_v50 = vld [vmem:[%s7056_s14 + $0x120] sm:$0xff] }
 0xe0a   : > { %5132 = vmatpush3.bf16.msra.mxu0 %v6647_v47  ;;  %4707 = vmatprep.mubr.msk.f32.mxu0 %vm5298_vm13, %v5294_v2  ;;  %v4124_v47 = vld [vmem:[%s7056_s14 + $0xc8] sm:$0xff] }
 0xe0b   : > { %5133 = vmatprep.subr.bf16.mxu0 %v5297_v54 }
 0xe0e   : > { %5135 = vmatpush3.bf16.msra.mxu0 %v6653_v4  ;;  %v5047_v4 = vpack.c.bf16 %v4124_v47, %v4123_v52  ;;  %v4174_v52 = vld [vmem:[%s7056_s14 + $0x1f8] sm:$0xff] }
 0xe11   : > { %4708 = vmatmul.mubr.msk.f32.vlgmr.msra.gmra.mrb[92].mxu0 %vm2183_vm15, %v4176_v24  ;;  %v4139_v24 = vld [vmem:[%s7056_s14 + $0x128] sm:$0xff] }
 0xeb4   : > { %v2648_v12 = vpop.f32.mrb[10].mxu1  ;;  %v6766_v11 = vpop.f32.mrb[80].mxu0 }
 0xeb5   : > { %v4469_v13 = vpop.f32.mrb[11].mxu1  ;;  %v4529_v14 = vpop.f32.mrb[81].mxu0 }
 0xeb6   : > { %v4141_v13 = vld [vmem:[%s7056_s14 + $0x138] sm:$0xff] }
 0xebc   : > { %v2731_v20 = vpop.f32.mrb[12].mxu1  ;;  %v6780_v17 = vpop.f32.mrb[82].mxu0 }
 0xebd   : > { %4498 = vmatmul.mubr.msk.f32.vlgmr.msra.gmra.mrb[14].mxu1 %vm2144_vm9, %v2731_v20  ;;  %v4559_v8 = vpop.f32.mrb[83].mxu0  ;;  %v4480_v5 = vpop.f32.mrb[13].mxu1  ;;  %v5086_v20 = vpack.c.bf16 %v4148_v16, %v4147_v63 }
 0xebe   : > { %5012 = vmatpush3.bf16.msra.mxu1 %v5011_v19  ;;  %4516 = vmatprep.mubr.msk.f32.mxu1 %vm5298_vm13, %v5294_v2  ;;  %v5083_v19 = vpack.c.bf16 %v4146_v1, %v4145_v15  ;;  %v4150_v8 = vld [vmem:[%s7056_s14 + $0x168] sm:$0xff] }
 0xebf   : > { %5013 = vmatprep.subr.bf16.mxu1 %v5297_v54 }
 0xec2   : > { %5015 = vmatpush3.bf16.msra.mxu1 %v5014_v21  ;;  %v4151_v21 = vld [vmem:[%s7056_s14 + $0x170] sm:$0xff] }
 0xec3   : > { %5016 = vmatprep.subr.bf16.mxu1 %v5297_v54  ;;  %v5092_v23 = vpack.c.bf16 %v4152_v22, %v4151_v21 }
 0xec4   : > { %v6799_v29 = vpop.f32.mrb[84].mxu0 }
 0xec5   : > { %v4589_v30 = vpop.f32.mrb[85].mxu0 }
 0xec6   : > { %5018 = vmatpush3.bf16.msra.mxu1 %v5017_v26  ;;  %v4156_v26 = vld [vmem:[%s7056_s14 + $0x180] sm:$0xff]  ;;  %v4159_v30 = vld [vmem:[%s7056_s14 + $0x198] sm:$0xff] }
 0xec7   : > { %5019 = vmatprep.subr.bf16.mxu1 %v5297_v54  ;;  %v5101_v28 = vpack.c.bf16 %v4157_v27, %v4156_v26 }
 0xeca   : > { %5021 = vmatpush3.bf16.msra.mxu1 %v5020_v32 }
 0xecb   : > { %5028 = vmatprep.subr.bf16.mxu1 %v5297_v54 }
 0xecc   : > { %v6815_v38 = vpop.f32.mrb[86].mxu0 }
 0xecd   : > { %4517 = vmatmul.mubr.msk.f32.vlgmr.msra.gmra.mrb[14].mxu1 %vm2144_vm9, %v2648_v12  ;;  %v4619_v39 = vpop.f32.mrb[87].mxu0  ;;  %v5071_v12 = vpack.c.bf16 %v4139_v24, %v4138_v50 }
 0xece   : > { %5030 = vmatpush3.bf16.msra.mxu1 %v5029_v35  ;;  %4546 = vmatprep.mubr.msk.f32.mxu1 %vm5298_vm13, %v5294_v2  ;;  %v5107_v35 = vpack.c.bf16 %v4161_v34, %v4160_v31  ;;  %v4167_v39 = vld [vmem:[%s7056_s14 + $0x1c0] sm:$0xff] }
 0xecf   : > { %5031 = vmatprep.subr.bf16.mxu1 %v5297_v54 }
 0xed2   : > { %5033 = vmatpush3.bf16.msra.mxu1 %v5032_v40  ;;  %v4168_v40 = vld [vmem:[%s7056_s14 + $0x1c8] sm:$0xff] }
 0xed3   : > { %5034 = vmatprep.subr.bf16.mxu1 %v5297_v54  ;;  %v5119_v58 = vpack.c.bf16 %v4168_v40, %v4167_v39 }
 0xed4   : > { %v6834_v33 = vpop.f32.mrb[88].mxu0 }
 0xed5   : > { %v4649_v45 = vpop.f32.mrb[89].mxu0 }
 0xed6   : > { %5036 = vmatpush3.bf16.msra.mxu1 %v5035_v51  ;;  %v4170_v51 = vld [vmem:[%s7056_s14 + $0x1d8] sm:$0xff]  ;;  %v4172_v45 = vld [vmem:[%s7056_s14 + $0x1e8] sm:$0xff] }
 0xed7   : > { %5037 = vmatprep.subr.bf16.mxu1 %v5297_v54  ;;  %v5122_v44 = vpack.c.bf16 %v4170_v51, %v4169_v41 }
 0xeda   : > { %5039 = vmatpush3.bf16.msra.mxu1 %v5038_v46  ;;  %v5125_v46 = vpack.c.bf16 %v4172_v45, %v4171_v7 }
 0xedb   : > { %5046 = vmatprep.subr.bf16.mxu1 %v5297_v54 }
 0xedc   : > { %v6850_v55 = vpop.f32.mrb[90].mxu0 }
 0xedd   : > { %4547 = vmatmul.mubr.msk.f32.vlgmr.msra.gmra.mrb[14].mxu1 %vm2144_vm9, %v6766_v11  ;;  %v4679_v53 = vpop.f32.mrb[91].mxu0  ;;  %v4140_v11 = vld [vmem:[%s7056_s14 + $0x130] sm:$0xff] }
 0xede   : > { %5048 = vmatpush3.bf16.msra.mxu1 %v5047_v4  ;;  %4576 = vmatprep.mubr.msk.f32.mxu1 %vm5298_vm13, %v5294_v2  ;;  %v5074_v14 = vpack.c.bf16 %v4141_v13, %v4140_v11  ;;  %v4178_v4 = vld [vmem:[%s7056_s14 + $0x200] sm:$0xff]  ;;  %v4180_v53 = vld [vmem:[%s7056_s14 + $0x210] sm:$0xff] }
 0xedf   : > { %5049 = vmatprep.subr.bf16.mxu1 %v5297_v54  ;;  %v5137_v48 = vpack.c.bf16 %v4179_v6, %v4178_v4 }
 0xee2   : > { %5051 = vmatpush3.bf16.msra.mxu1 %v5050_v56  ;;  %v4181_v56 = vld [vmem:[%s7056_s14 + $0x218] sm:$0xff] }
 0xee3   : > { %5052 = vmatprep.subr.bf16.mxu1 %v5297_v54  ;;  %v5140_v61 = vpack.c.bf16 %v4181_v56, %v4180_v53 }
 0xee4   : > { %v6870_v60 = vpop.f32.mrb[92].mxu0 }
 0xee5   : > { %v4709_v18 = vpop.f32.mrb[93].mxu0 }
 0xee6   : > { %5054 = vmatpush3.bf16.msra.mxu1 %v5053_v25  ;;  %v4183_v25 = vld [vmem:[%s7056_s14 + $0x228] sm:$0xff] }
 0xee7   : > { %5055 = vmatprep.subr.bf16.mxu1 %v5297_v54  ;;  %v5143_v62 = vpack.c.bf16 %v4183_v25, %v4182_v42 }
 0xeea   : > { %5057 = vmatpush3.bf16.msra.mxu1 %v5056_v43 }
 0xeeb   : > { %5064 = vmatprep.subr.bf16.mxu1 %v5297_v54 }
 0xeed   : > { %4577 = vmatmul.mubr.msk.f32.vlgmr.msra.gmra.mrb[14].mxu1 %vm2144_vm9, %v6780_v17  ;;  %v4149_v17 = vld [vmem:[%s7056_s14 + $0x160] sm:$0xff] }
 0xeee   : > { %5066 = vmatpush3.bf16.msra.mxu1 %v5065_v10  ;;  %4606 = vmatprep.mubr.msk.f32.mxu1 %vm5298_vm13, %v5294_v2  ;;  %v5089_v5 = vpack.c.bf16 %v4150_v8, %v4149_v17 }
 0xeef   : > { %5067 = vmatprep.subr.bf16.mxu1 %v5297_v54 }
 0xef2   : > { %5069 = vmatpush3.bf16.msra.mxu1 %v5068_v59 }
 0xef3   : > { %5070 = vmatprep.subr.bf16.mxu1 %v5297_v54 }
 0xef6   : > { %5072 = vmatpush3.bf16.msra.mxu1 %v5071_v12 }
 0xef7   : > { %5073 = vmatprep.subr.bf16.mxu1 %v5297_v54 }
 0xefa   : > { %5075 = vmatpush3.bf16.msra.mxu1 %v5074_v14 }
 0xefb   : > { %5082 = vmatprep.subr.bf16.mxu1 %v5297_v54 }
 0xefd   : > { %4607 = vmatmul.mubr.msk.f32.vlgmr.msra.gmra.mrb[14].mxu1 %vm2144_vm9, %v6799_v29  ;;  %v4158_v29 = vld [vmem:[%s7056_s14 + $0x190] sm:$0xff] }
 0xefe   : > { %5084 = vmatpush3.bf16.msra.mxu1 %v5083_v19  ;;  %4636 = vmatprep.mubr.msk.f32.mxu1 %vm5298_vm13, %v5294_v2  ;;  %v5104_v32 = vpack.c.bf16 %v4159_v30, %v4158_v29 }
 0xeff   : > { %5085 = vmatprep.subr.bf16.mxu1 %v5297_v54 }
 0xf02   : > { %5087 = vmatpush3.bf16.msra.mxu1 %v5086_v20 }
 0xf03   : > { %5088 = vmatprep.subr.bf16.mxu1 %v5297_v54 }
 0xf06   : > { %5090 = vmatpush3.bf16.msra.mxu1 %v5089_v5 }
 0xf07   : > { %5091 = vmatprep.subr.bf16.mxu1 %v5297_v54 }
 0xf0a   : > { %5093 = vmatpush3.bf16.msra.mxu1 %v5092_v23 }
 0xf0b   : > { %5100 = vmatprep.subr.bf16.mxu1 %v5297_v54 }
 0xf0d   : > { %4637 = vmatmul.mubr.msk.f32.vlgmr.msra.gmra.mrb[14].mxu1 %vm2144_vm9, %v6815_v38  ;;  %v5110_v38 = vpack.c.bf16 %v4163_v37, %v4162_v36 }
 0xf0e   : > { %5102 = vmatpush3.bf16.msra.mxu1 %v5101_v28  ;;  %4666 = vmatprep.mubr.msk.f32.mxu1 %vm5298_vm13, %v5294_v2 }
 0xf0f   : > { %5103 = vmatprep.subr.bf16.mxu1 %v5297_v54 }
 0xf12   : > { %5105 = vmatpush3.bf16.msra.mxu1 %v5104_v32 }
 0xf13   : > { %5106 = vmatprep.subr.bf16.mxu1 %v5297_v54 }
 0xf16   : > { %5108 = vmatpush3.bf16.msra.mxu1 %v5107_v35 }
 0xf17   : > { %5109 = vmatprep.subr.bf16.mxu1 %v5297_v54 }
 0xf1a   : > { %5111 = vmatpush3.bf16.msra.mxu1 %v5110_v38 }
 0xf1b   : > { %5118 = vmatprep.subr.bf16.mxu1 %v5297_v54 }
 0xf1d   : > { %4667 = vmatmul.mubr.msk.f32.vlgmr.msra.gmra.mrb[14].mxu1 %vm2144_vm9, %v6834_v33  ;;  %v4173_v33 = vld [vmem:[%s7056_s14 + $0x1f0] sm:$0xff] }
 0xf1e   : > { %5120 = vmatpush3.bf16.msra.mxu1 %v5119_v58  ;;  %4696 = vmatprep.mubr.msk.f32.mxu1 %vm5298_vm13, %v5294_v2  ;;  %v5128_v47 = vpack.c.bf16 %v4174_v52, %v4173_v33 }
 0xf1f   : > { %5121 = vmatprep.subr.bf16.mxu1 %v5297_v54 }
 0xf22   : > { %5123 = vmatpush3.bf16.msra.mxu1 %v5122_v44 }
 0xf23   : > { %5124 = vmatprep.subr.bf16.mxu1 %v5297_v54 }
 0xf26   : > { %5126 = vmatpush3.bf16.msra.mxu1 %v5125_v46 }
 0xf27   : > { %5127 = vmatprep.subr.bf16.mxu1 %v5297_v54 }
 0xf2a   : > { %5129 = vmatpush3.bf16.msra.mxu1 %v5128_v47 }
 0xf2b   : > { %5136 = vmatprep.subr.bf16.mxu1 %v5297_v54 }
 0xf2d   : > { %4697 = vmatmul.mubr.msk.f32.vlgmr.msra.gmra.mrb[14].mxu1 %vm2144_vm9, %v6850_v55  ;;  %v4184_v55 = vld [vmem:[%s7056_s14 + $0x230] sm:$0xff] }
 0xf2e   : > { %5138 = vmatpush3.bf16.msra.mxu1 %v5137_v48  ;;  %4726 = vmatprep.mubr.msk.f32.mxu1 %vm5298_vm13, %v5294_v2  ;;  %v4185_v2 = vld [vmem:[%s7056_s14 + $0x238] sm:$0xff]  ;;  %vm3996_vm13 = vcmask 293888  }
 0xf2f   : > { %5139 = vmatprep.subr.bf16.mxu1 %v5297_v54  ;;  %v5146_v3 = vpack.c.bf16 %v4185_v2, %v4184_v55 }
 0xf32   : > { %5141 = vmatpush3.bf16.msra.mxu1 %v5140_v61 }
 0xf33   : > { %5142 = vmatprep.subr.bf16.mxu1 %v5297_v54 }
 0xf36   : > { %5144 = vmatpush3.bf16.msra.mxu1 %v5143_v62 }
 0xf37   : > { %5145 = vmatprep.subr.bf16.mxu1 %v5297_v54 }
 0xf3a   : > { %5147 = vmatpush3.bf16.msra.mxu1 %v5146_v3 }
 0xf3d   : > { %4727 = vmatmul.mubr.msk.f32.vlgmr.msra.gmra.mrb[14].mxu1 %vm2144_vm9, %v6870_v60 }
0x1010   : > { %v3991_v18 = vpop.f32.mrb[14].mxu1 }
0x1011   : > { %3997 = vst.msk [vmem:[%s533_s17] sm:$0xff] %vm3996_vm13, %v3991_v18  ;;  %v4728_v43 = vpop.f32.mrb[15].mxu1 }
0x1012 PF: > { %s27_s21 = sadd.s32 1, %s5285_s21  }
0x1013   : > { %p24_p1 = scmp.ge.s32.totalorder %s27_s21, 4  }
0x1015   :  { %26 = sbr.rel (!%p24_p1) target bundleno = 3 (0x3), region = 135 }
0x101c   :  { %4017 = vsyncpa [#allocation3], 1 }
0x101d   :  { %4019 = vsyncpa [#allocation3 + $0x1], 1 }

</bundles_post_ra>
